<compile_context>
chip_gen: v5e
topology: v5e:2x2
jax: 0.10.0
libtpu: 0.0.40
codegen_flags: <defaults>
</compile_context>

<pallas_src>
import math

import jax
import jax.numpy as jnp
from jax.experimental import pallas as pl
from jax.experimental.pallas import tpu as pltpu

# ---- small synthetic config (stands in for model_config['Stylespeech']) ----
N_MEL     = 16          # n_mel_channels
HIDDEN    = 32          # style_hidden
OUT_DIM   = 32          # style_vector_dim
KSIZE     = 5           # style_kernel_size
N_HEAD    = 2           # style_head
D_K       = HIDDEN // N_HEAD
SYNC_COEF = 4           # HPM_Dubbing.Synchronization_coefficient


def _mish(x):
    return x * jnp.tanh(jax.nn.softplus(x))


def _mel_style_encoder_kernel(
        mels_ref,                 # (N_MEL, L)   channels-first mel block
        am_ref,                   # (L, L)       additive attn mask, keys on sublanes
        pp_ref,                   # (L, B_BLK)   pooling matrix (query mask, 1/len baked in)
        s_ref,                    # (KSIZE, L, L) conv temporal-shift matrices
        w1_ref, b1_ref,           # (H, M), (H, 1)
        w2_ref, b2_ref,           # (H, H), (H, 1)
        wc1_ref, bc1_ref,         # (K, 2H, H), (2H, 1)
        wc2_ref, bc2_ref,         # (K, 2H, H), (2H, 1)
        wqkv_ref, bqkv_ref,       # (3H, H), (3H, 1)
        wo_ref, bo_ref,           # (H, H), (H, 1)
        wf_ref, bf_ref,           # (OUT, H), (OUT, 1)
        out_ref):                 # (1, OUT, B_BLK)
    f32 = jnp.float32
    H = HIDDEN
    x = mels_ref[...].astype(f32)                      # (M, L)
    L = x.shape[1]

    # ---------- spectral: Linear -> Mish -> (Dropout=id) -> Linear -> Mish ----
    h = _mish(jnp.dot(w1_ref[...], x, preferred_element_type=f32) + b1_ref[...])
    h = _mish(jnp.dot(w2_ref[...], h, preferred_element_type=f32) + b2_ref[...])

    # ---------- temporal: two Conv1dGLU blocks (residual + GLU, 'same' conv) ----
    # Each temporal tap is a matmul against a host-built (L, L) shift matrix:
    # no lane slices, no concatenations -> no relayout copies, pure MXU work.
    def conv1d_glu(h_in, wc_ref, bc_ref):
        acc = jnp.zeros((2 * H, L), f32)
        for k in range(KSIZE):                         # static unroll, K = 5
            shifted = jnp.dot(h_in, s_ref[k], preferred_element_type=f32)
            acc = acc + jnp.dot(wc_ref[k], shifted, preferred_element_type=f32)
        acc = acc + bc_ref[...]
        x1 = acc[:H, :]
        x2 = acc[H:, :]
        return h_in + x1 * jax.nn.sigmoid(x2)          # dropout = id

    h = conv1d_glu(h, wc1_ref, bc1_ref)
    h = conv1d_glu(h, wc2_ref, bc2_ref)

    # ---------- multi-head self-attention (StyleSpeech MultiHeadAttention) ----
    # Note: the reference zeroes padded frames before attention; that zeroing
    # is dropped here because (a) padded keys are -1e9-masked so their values
    # never contribute, and (b) padded queries are zeroed by the pooling
    # matrix — the final style vector is bit-for-bit equivalent.
    residual = h
    qkv = jnp.dot(wqkv_ref[...], h, preferred_element_type=f32) + bqkv_ref[...]
    q = qkv[:H, :]
    k = qkv[H:2 * H, :]
    v = qkv[2 * H:, :]
    inv_temp = 1.0 / math.sqrt(float(H))               # StyleSpeech: 1/sqrt(d_model)
    am = am_ref[...]                                   # (L_k, L_q), 0 or -1e9 (finite)
    heads = []
    for hd in range(N_HEAD):                           # static unroll, N_HEAD = 2
        lo, hi = hd * D_K, (hd + 1) * D_K
        qh = q[lo:hi, :]                               # (D_K, L) sublane slices
        kh = k[lo:hi, :]
        vh = v[lo:hi, :]
        # scoresᵀ (keys on sublanes): softmax along sublanes; the value matmul
        # then needs no (L, L) transpose.
        scores_t = jnp.dot(kh.T, qh, preferred_element_type=f32) * inv_temp + am
        m = jnp.max(scores_t, axis=0, keepdims=True)   # (1, L_q)
        ex = jnp.exp(scores_t - m)
        denom = jnp.sum(ex, axis=0, keepdims=True)
        attn_t = ex * pl.reciprocal(denom, approx=True)   # approx recip only here
        heads.append(jnp.dot(vh, attn_t, preferred_element_type=f32))  # (D_K, L)
    o = jnp.concatenate(heads, axis=0)                 # (H, L), sublane concat
    h = jnp.dot(wo_ref[...], o, preferred_element_type=f32) + bo_ref[...] + residual

    # ---------- fc + masked temporal average pooling ----------
    y = jnp.dot(wf_ref[...], h, preferred_element_type=f32) + bf_ref[...]   # (OUT, L)
    # pooling matrix already contains the padding mask and the *exact* 1/len.
    pooled = jnp.dot(y, pp_ref[...], preferred_element_type=f32)            # (OUT, B_BLK)
    out_ref[...] = pooled[None, :, :].astype(out_ref.dtype)


_WEIGHT_ORDER = ("w1", "b1", "w2", "b2", "wc1", "bc1", "wc2", "bc2",
                 "wq", "bq", "wk", "bk", "wv", "bv", "wo", "bo", "wf", "bf")


def _choose_batch_block(B, T):
    """Pick (B_pad, B_BLK).

    * lane width B_BLK*T must be a multiple of 128 when the grid has > 1 step
      (BlockSpec constraint), or cover the full batch in a single block;
    * tiny batches -> one full-extent block, no garbage padding (v5e/v6e);
    * big batches -> >= 2 grid steps so the batch axis shards across the two
      TensorCores on v7x, while keeping blocks large to amortize per-step cost.
    """
    g = 128 // math.gcd(T, 128)          # smallest group with lane width % 128 == 0
    if B < 2 * g:
        return B, B                      # single full-extent block
    n_groups = -(-B // g)                # ceil
    B_pad = n_groups * g
    blocks_per_step = max(1, n_groups // 2)
    while n_groups % blocks_per_step:
        blocks_per_step -= 1
    return B_pad, blocks_per_step * g


def _build_aux(mel_lens, T, B_pad, B_BLK):
    """Host-side constants: attention mask, pooling matrix, conv shift matrices."""
    L = B_BLK * T
    nb = B_pad // B_BLK
    lane = jnp.arange(L)
    lane_b = lane // T                   # batch element (within block) of each lane
    lane_t = lane % T                    # time index of each lane

    # Conv shift matrices (block independent): S[k][j, l] = 1 iff lane j is the
    # 'same'-padded source of output lane l for tap k (same sequence, in range).
    pad = (KSIZE - 1) // 2
    s_mats = []
    for k in range(KSIZE):
        d = k - pad
        src = lane + d
        same_seq = (src // T) == lane_b                  # also false when out of range
        m = (lane[:, None] == src[None, :]) & same_seq[None, :]
        s_mats.append(m.astype(jnp.float32))
    shift_s = jnp.stack(s_mats, axis=0)                  # (K, L, L)

    lens = mel_lens.astype(jnp.int32)
    col = jnp.arange(B_BLK)
    am_blocks, pp_blocks = [], []
    for blk in range(nb):
        blk_lens = lens[blk * B_BLK:(blk + 1) * B_BLK]   # (B_BLK,)
        valid = lane_t < blk_lens[lane_b]                # (L,) valid (non-padded) frame
        same = lane_b[:, None] == lane_b[None, :]        # (L_k, L_q) same sequence
        am_blocks.append(
            jnp.where(same & valid[:, None], 0.0, -1e9).astype(jnp.float32))
        inv_len = 1.0 / jnp.maximum(blk_lens, 1).astype(jnp.float32)  # exact divide
        pp = (valid[:, None] & (lane_b[:, None] == col[None, :])).astype(jnp.float32)
        pp_blocks.append(pp * inv_len[None, :])
    am = jnp.concatenate(am_blocks, axis=0)              # (nb*L, L)
    pp = jnp.concatenate(pp_blocks, axis=0)              # (nb*L, B_BLK)
    return am, pp, shift_s


def _const_spec(a):
    zeros = (0,) * a.ndim
    return pl.BlockSpec(a.shape, lambda b, _z=zeros: _z)


def mel_style_encoder(params, mels, mel_lens):
    """params: dict of weights; mels: (B, T, N_MEL) f32; mel_lens: (B,) int lengths."""
    B, T, M = mels.shape
    B_pad, B_BLK = _choose_batch_block(B, T)
    if B_pad != B:
        mels = jnp.pad(mels, ((0, B_pad - B), (0, 0), (0, 0)))
        mel_lens = jnp.pad(mel_lens, (0, B_pad - B))
    L = B_BLK * T
    nb = B_pad // B_BLK

    # Channels-first mel slab: lane axis = (batch, time) -> lane-dense trunk.
    mels_cf = jnp.transpose(mels.astype(jnp.float32), (2, 0, 1)).reshape(M, B_pad * T)

    am, pp, shift_s = _build_aux(mel_lens, T, B_pad, B_BLK)

    # Weights pre-transposed to channels-first on the host and passed as
    # separate operands (constant index maps -> fetched once, never re-sliced
    # or re-laid-out inside the kernel).
    w1   = params["w1"].T                                # (H, M)
    b1   = params["b1"].T                                # (H, 1)
    w2   = params["w2"].T
    b2   = params["b2"].T
    wc1  = jnp.transpose(params["wc1"], (0, 2, 1))       # (K, 2H, H)
    bc1  = params["bc1"].T                               # (2H, 1)
    wc2  = jnp.transpose(params["wc2"], (0, 2, 1))
    bc2  = params["bc2"].T
    wqkv = jnp.concatenate([params["wq"].T, params["wk"].T, params["wv"].T],
                           axis=0)                       # (3H, H)
    bqkv = jnp.concatenate([params["bq"], params["bk"], params["bv"]], axis=1).T
    wo   = params["wo"].T
    bo   = params["bo"].T
    wf   = params["wf"].T                                # (OUT, H)
    bf   = params["bf"].T                                # (OUT, 1)

    weights = (w1, b1, w2, b2, wc1, bc1, wc2, bc2, wqkv, bqkv, wo, bo, wf, bf)

    in_specs = [
        pl.BlockSpec((M, L), lambda b: (0, b)),          # mel slab
        pl.BlockSpec((L, L), lambda b: (b, 0)),          # attention additive mask
        pl.BlockSpec((L, B_BLK), lambda b: (b, 0)),      # pooling matrix
        _const_spec(shift_s),                            # conv shift matrices
    ] + [_const_spec(w) for w in weights]

    out = pl.pallas_call(
        _mel_style_encoder_kernel,
        out_shape=jax.ShapeDtypeStruct((nb, OUT_DIM, B_BLK), jnp.float32),
        grid=(nb,),
        in_specs=in_specs,
        out_specs=pl.BlockSpec((1, OUT_DIM, B_BLK), lambda b: (b, 0, 0)),
        compiler_params=pltpu.CompilerParams(
            dimension_semantics=("parallel",),
            vmem_limit_bytes=32 * 1024 * 1024),
    )(mels_cf, am, pp, shift_s, *weights)

    out = jnp.transpose(out, (0, 2, 1)).reshape(B_pad, OUT_DIM)
    return out[:B]                                       # (B, OUT_DIM)


def get_mask_from_lengths(lengths, max_len):
    ids = jnp.arange(max_len, dtype=lengths.dtype)[None, :]
    return ids >= lengths[:, None]                       # True == padded


def hpm_dubbing_forward(params, speakers, texts, src_lens, max_src_len,
                        mels, lip_lens, max_lip_len):
    """Implements the fully-specified part of HPM_Dubbing.forward (useGT=False path)."""
    src_masks = get_mask_from_lengths(src_lens, max_src_len)
    lip_masks = get_mask_from_lengths(lip_lens, max_lip_len)
    mel_lens = lip_lens * SYNC_COEF
    mel_masks = get_mask_from_lengths(mel_lens, max_lip_len * SYNC_COEF)

    # "Extract Style Vector following V2C" -- Pallas kernel
    style_vector = mel_style_encoder(params, mels, mel_lens)

    # TODO(synk): Multi_head_Duration_Aligner, Affective_Prosody_Adaptor,
    # Scene_aTmos_Booster, Decoder, PostNet, mel_linear and the speaker/emotion
    # embedding branches are not defined in the provided source, so they are
    # not implemented here.
    return (style_vector, src_masks, lip_masks, mel_masks,
            mel_lens, max_src_len)


def init_params(key):
    ks = jax.random.split(key, len(_WEIGHT_ORDER))
    shapes = {
        "w1": (N_MEL, HIDDEN),   "b1": (1, HIDDEN),
        "w2": (HIDDEN, HIDDEN),  "b2": (1, HIDDEN),
        "wc1": (KSIZE, HIDDEN, 2 * HIDDEN), "bc1": (1, 2 * HIDDEN),
        "wc2": (KSIZE, HIDDEN, 2 * HIDDEN), "bc2": (1, 2 * HIDDEN),
        "wq": (HIDDEN, HIDDEN),  "bq": (1, HIDDEN),
        "wk": (HIDDEN, HIDDEN),  "bk": (1, HIDDEN),
        "wv": (HIDDEN, HIDDEN),  "bv": (1, HIDDEN),
        "wo": (HIDDEN, HIDDEN),  "bo": (1, HIDDEN),
        "wf": (HIDDEN, OUT_DIM), "bf": (1, OUT_DIM),
    }
    return {name: 0.1 * jax.random.normal(k, shapes[name], jnp.float32)
            for name, k in zip(_WEIGHT_ORDER, ks)}


if __name__ == "__main__":
    key = jax.random.PRNGKey(0)
    k_params, k_mels = jax.random.split(key)
    params = init_params(k_params)

    B = 2
    max_lip_len = 16
    max_mel_len = max_lip_len * SYNC_COEF          # 64 mel frames
    max_src_len = 8

    mels = jax.random.normal(k_mels, (B, max_mel_len, N_MEL), jnp.float32)
    lip_lens = jnp.array([16, 11], dtype=jnp.int32)   # -> mel lens [64, 44]
    src_lens = jnp.array([8, 6], dtype=jnp.int32)
    texts = jnp.zeros((B, max_src_len), dtype=jnp.int32)
    speakers = jnp.zeros((B,), dtype=jnp.int32)

    outs = hpm_dubbing_forward(params, speakers, texts, src_lens, max_src_len,
                               mels, lip_lens, max_lip_len)
    jax.block_until_ready(outs)
    style_vector = outs[0]
    assert style_vector.shape == (B, OUT_DIM)
    assert bool(jnp.all(jnp.isfinite(style_vector)))
    print("KERNEL_OK")
</pallas_src>

<mosaic_0001>
module attributes {stable_mosaic.version = 11 : i64} {
  func.func @_mel_style_encoder_kernel(%arg0: i32, %arg1: memref<16x128xf32, #tpu.memory_space<vmem>>, %arg2: memref<128x128xf32, #tpu.memory_space<vmem>>, %arg3: memref<128x2xf32, #tpu.memory_space<vmem>>, %arg4: memref<5x128x128xf32, #tpu.memory_space<vmem>>, %arg5: memref<32x16xf32, #tpu.memory_space<vmem>>, %arg6: memref<32x1xf32, #tpu.memory_space<vmem>>, %arg7: memref<32x32xf32, #tpu.memory_space<vmem>>, %arg8: memref<32x1xf32, #tpu.memory_space<vmem>>, %arg9: memref<5x64x32xf32, #tpu.memory_space<vmem>>, %arg10: memref<64x1xf32, #tpu.memory_space<vmem>>, %arg11: memref<5x64x32xf32, #tpu.memory_space<vmem>>, %arg12: memref<64x1xf32, #tpu.memory_space<vmem>>, %arg13: memref<96x32xf32, #tpu.memory_space<vmem>>, %arg14: memref<96x1xf32, #tpu.memory_space<vmem>>, %arg15: memref<32x32xf32, #tpu.memory_space<vmem>>, %arg16: memref<32x1xf32, #tpu.memory_space<vmem>>, %arg17: memref<32x32xf32, #tpu.memory_space<vmem>>, %arg18: memref<32x1xf32, #tpu.memory_space<vmem>>, %arg19: memref<1x32x2xf32, #tpu.memory_space<vmem>>) attributes {dimension_semantics = [#tpu.dimension_semantics<parallel>], iteration_bounds = array<i64: 1>, scalar_prefetch = 0 : i64, scratch_operands = 0 : i64, tpu.core_type = #tpu.core_type<tc>, window_params = [{transform_indices = @transform_0, window_bounds = array<i64: 16, 128>}, {transform_indices = @transform_1, window_bounds = array<i64: 128, 128>}, {transform_indices = @transform_2, window_bounds = array<i64: 128, 2>}, {pipeline_mode = #tpu.pipeline_mode<synchronous>, transform_indices = @transform_3, window_bounds = array<i64: 5, 128, 128>}, {pipeline_mode = #tpu.pipeline_mode<synchronous>, transform_indices = @transform_4, window_bounds = array<i64: 32, 16>}, {pipeline_mode = #tpu.pipeline_mode<synchronous>, transform_indices = @transform_5, window_bounds = array<i64: 32, 1>}, {pipeline_mode = #tpu.pipeline_mode<synchronous>, transform_indices = @transform_6, window_bounds = array<i64: 32, 32>}, {pipeline_mode = #tpu.pipeline_mode<synchronous>, transform_indices = @transform_7, window_bounds = array<i64: 32, 1>}, {pipeline_mode = #tpu.pipeline_mode<synchronous>, transform_indices = @transform_8, window_bounds = array<i64: 5, 64, 32>}, {pipeline_mode = #tpu.pipeline_mode<synchronous>, transform_indices = @transform_9, window_bounds = array<i64: 64, 1>}, {pipeline_mode = #tpu.pipeline_mode<synchronous>, transform_indices = @transform_10, window_bounds = array<i64: 5, 64, 32>}, {pipeline_mode = #tpu.pipeline_mode<synchronous>, transform_indices = @transform_11, window_bounds = array<i64: 64, 1>}, {pipeline_mode = #tpu.pipeline_mode<synchronous>, transform_indices = @transform_12, window_bounds = array<i64: 96, 32>}, {pipeline_mode = #tpu.pipeline_mode<synchronous>, transform_indices = @transform_13, window_bounds = array<i64: 96, 1>}, {pipeline_mode = #tpu.pipeline_mode<synchronous>, transform_indices = @transform_14, window_bounds = array<i64: 32, 32>}, {pipeline_mode = #tpu.pipeline_mode<synchronous>, transform_indices = @transform_15, window_bounds = array<i64: 32, 1>}, {pipeline_mode = #tpu.pipeline_mode<synchronous>, transform_indices = @transform_16, window_bounds = array<i64: 32, 32>}, {pipeline_mode = #tpu.pipeline_mode<synchronous>, transform_indices = @transform_17, window_bounds = array<i64: 32, 1>}, {transform_indices = @transform_18, window_bounds = array<i64: 1, 32, 2>}]} {
    %c0 = arith.constant 0 : index
    %c0_0 = arith.constant 0 : index
    %0 = vector.load %arg1[%c0, %c0_0] : memref<16x128xf32, #tpu.memory_space<vmem>>, vector<16x128xf32>
    %c0_1 = arith.constant 0 : index
    %c0_2 = arith.constant 0 : index
    %1 = vector.load %arg5[%c0_1, %c0_2] : memref<32x16xf32, #tpu.memory_space<vmem>>, vector<32x16xf32>
    %cst = arith.constant dense<0.000000e+00> : vector<32x128xf32>
    %2 = tpu.matmul %1, %0, %cst {dimension_numbers = #tpu.dot_dimension_numbers<[1], [0], [0], [1], [0, 0, 1, 1], [], []>} : vector<32x16xf32>, vector<16x128xf32>, vector<32x128xf32> -> vector<32x128xf32>
    %c0_3 = arith.constant 0 : index
    %c0_4 = arith.constant 0 : index
    %3 = vector.load %arg6[%c0_3, %c0_4] : memref<32x1xf32, #tpu.memory_space<vmem>>, vector<32x1xf32>
    %4 = vector.broadcast %3 : vector<32x1xf32> to vector<32x128xf32>
    %5 = arith.addf %2, %4 : vector<32x128xf32>
    %cst_5 = arith.constant 0.000000e+00 : f32
    %6 = vector.broadcast %cst_5 : f32 to vector<32x128xf32>
    %7 = arith.maximumf %5, %6 : vector<32x128xf32>
    %8 = vector.broadcast %cst_5 : f32 to vector<32x128xf32>
    %9 = arith.subf %5, %8 : vector<32x128xf32>
    %10 = arith.cmpf one, %9, %9 : vector<32x128xf32>
    %11 = vector.broadcast %cst_5 : f32 to vector<32x128xf32>
    %12 = arith.addf %5, %11 : vector<32x128xf32>
    %13 = math.absf %9 : vector<32x128xf32>
    %cst_6 = arith.constant 0.000000e+00 : f32
    %14 = vector.broadcast %cst_6 : f32 to vector<32x128xf32>
    %15 = arith.subf %14, %13 : vector<32x128xf32>
    %16 = math.exp %15 : vector<32x128xf32>
    %17 = math.log1p %16 : vector<32x128xf32>
    %18 = arith.addf %7, %17 : vector<32x128xf32>
    %19 = arith.select %10, %12, %18 : vector<32x128xi1>, vector<32x128xf32>
    %20 = math.tanh %19 : vector<32x128xf32>
    %21 = arith.mulf %5, %20 : vector<32x128xf32>
    %c0_7 = arith.constant 0 : index
    %c0_8 = arith.constant 0 : index
    %22 = vector.load %arg7[%c0_7, %c0_8] : memref<32x32xf32, #tpu.memory_space<vmem>>, vector<32x32xf32>
    %cst_9 = arith.constant dense<0.000000e+00> : vector<32x128xf32>
    %23 = tpu.matmul %22, %21, %cst_9 {dimension_numbers = #tpu.dot_dimension_numbers<[1], [0], [0], [1], [0, 0, 1, 1], [], []>} : vector<32x32xf32>, vector<32x128xf32>, vector<32x128xf32> -> vector<32x128xf32>
    %c0_10 = arith.constant 0 : index
    %c0_11 = arith.constant 0 : index
    %24 = vector.load %arg8[%c0_10, %c0_11] : memref<32x1xf32, #tpu.memory_space<vmem>>, vector<32x1xf32>
    %25 = vector.broadcast %24 : vector<32x1xf32> to vector<32x128xf32>
    %26 = arith.addf %23, %25 : vector<32x128xf32>
    %cst_12 = arith.constant 0.000000e+00 : f32
    %27 = vector.broadcast %cst_12 : f32 to vector<32x128xf32>
    %28 = arith.maximumf %26, %27 : vector<32x128xf32>
    %29 = vector.broadcast %cst_12 : f32 to vector<32x128xf32>
    %30 = arith.subf %26, %29 : vector<32x128xf32>
    %31 = arith.cmpf one, %30, %30 : vector<32x128xf32>
    %32 = vector.broadcast %cst_12 : f32 to vector<32x128xf32>
    %33 = arith.addf %26, %32 : vector<32x128xf32>
    %34 = math.absf %30 : vector<32x128xf32>
    %cst_13 = arith.constant 0.000000e+00 : f32
    %35 = vector.broadcast %cst_13 : f32 to vector<32x128xf32>
    %36 = arith.subf %35, %34 : vector<32x128xf32>
    %37 = math.exp %36 : vector<32x128xf32>
    %38 = math.log1p %37 : vector<32x128xf32>
    %39 = arith.addf %28, %38 : vector<32x128xf32>
    %40 = arith.select %31, %33, %39 : vector<32x128xi1>, vector<32x128xf32>
    %41 = math.tanh %40 : vector<32x128xf32>
    %42 = arith.mulf %26, %41 : vector<32x128xf32>
    %cst_14 = arith.constant 0.000000e+00 : f32
    %43 = vector.broadcast %cst_14 : f32 to vector<64x128xf32>
    %c0_15 = arith.constant 0 : index
    %c0_16 = arith.constant 0 : index
    %c0_17 = arith.constant 0 : index
    %44 = vector.load %arg4[%c0_15, %c0_16, %c0_17] : memref<5x128x128xf32, #tpu.memory_space<vmem>>, vector<1x128x128xf32>
    %45 = vector.shape_cast %44 : vector<1x128x128xf32> to vector<128x128xf32>
    %cst_18 = arith.constant dense<0.000000e+00> : vector<32x128xf32>
    %46 = tpu.matmul %42, %45, %cst_18 {dimension_numbers = #tpu.dot_dimension_numbers<[1], [0], [0], [1], [0, 0, 1, 1], [], []>} : vector<32x128xf32>, vector<128x128xf32>, vector<32x128xf32> -> vector<32x128xf32>
    %c0_19 = arith.constant 0 : index
    %c0_20 = arith.constant 0 : index
    %c0_21 = arith.constant 0 : index
    %47 = vector.load %arg9[%c0_19, %c0_20, %c0_21] : memref<5x64x32xf32, #tpu.memory_space<vmem>>, vector<1x64x32xf32>
    %48 = vector.shape_cast %47 : vector<1x64x32xf32> to vector<64x32xf32>
    %cst_22 = arith.constant dense<0.000000e+00> : vector<64x128xf32>
    %49 = tpu.matmul %48, %46, %cst_22 {dimension_numbers = #tpu.dot_dimension_numbers<[1], [0], [0], [1], [0, 0, 1, 1], [], []>} : vector<64x32xf32>, vector<32x128xf32>, vector<64x128xf32> -> vector<64x128xf32>
    %50 = arith.addf %43, %49 : vector<64x128xf32>
    %c1 = arith.constant 1 : index
    %c0_23 = arith.constant 0 : index
    %c0_24 = arith.constant 0 : index
    %51 = vector.load %arg4[%c1, %c0_23, %c0_24] : memref<5x128x128xf32, #tpu.memory_space<vmem>>, vector<1x128x128xf32>
    %52 = vector.shape_cast %51 : vector<1x128x128xf32> to vector<128x128xf32>
    %cst_25 = arith.constant dense<0.000000e+00> : vector<32x128xf32>
    %53 = tpu.matmul %42, %52, %cst_25 {dimension_numbers = #tpu.dot_dimension_numbers<[1], [0], [0], [1], [0, 0, 1, 1], [], []>} : vector<32x128xf32>, vector<128x128xf32>, vector<32x128xf32> -> vector<32x128xf32>
    %c1_26 = arith.constant 1 : index
    %c0_27 = arith.constant 0 : index
    %c0_28 = arith.constant 0 : index
    %54 = vector.load %arg9[%c1_26, %c0_27, %c0_28] : memref<5x64x32xf32, #tpu.memory_space<vmem>>, vector<1x64x32xf32>
    %55 = vector.shape_cast %54 : vector<1x64x32xf32> to vector<64x32xf32>
    %cst_29 = arith.constant dense<0.000000e+00> : vector<64x128xf32>
    %56 = tpu.matmul %55, %53, %cst_29 {dimension_numbers = #tpu.dot_dimension_numbers<[1], [0], [0], [1], [0, 0, 1, 1], [], []>} : vector<64x32xf32>, vector<32x128xf32>, vector<64x128xf32> -> vector<64x128xf32>
    %57 = arith.addf %50, %56 : vector<64x128xf32>
    %c2 = arith.constant 2 : index
    %c0_30 = arith.constant 0 : index
    %c0_31 = arith.constant 0 : index
    %58 = vector.load %arg4[%c2, %c0_30, %c0_31] : memref<5x128x128xf32, #tpu.memory_space<vmem>>, vector<1x128x128xf32>
    %59 = vector.shape_cast %58 : vector<1x128x128xf32> to vector<128x128xf32>
    %cst_32 = arith.constant dense<0.000000e+00> : vector<32x128xf32>
    %60 = tpu.matmul %42, %59, %cst_32 {dimension_numbers = #tpu.dot_dimension_numbers<[1], [0], [0], [1], [0, 0, 1, 1], [], []>} : vector<32x128xf32>, vector<128x128xf32>, vector<32x128xf32> -> vector<32x128xf32>
    %c2_33 = arith.constant 2 : index
    %c0_34 = arith.constant 0 : index
    %c0_35 = arith.constant 0 : index
    %61 = vector.load %arg9[%c2_33, %c0_34, %c0_35] : memref<5x64x32xf32, #tpu.memory_space<vmem>>, vector<1x64x32xf32>
    %62 = vector.shape_cast %61 : vector<1x64x32xf32> to vector<64x32xf32>
    %cst_36 = arith.constant dense<0.000000e+00> : vector<64x128xf32>
    %63 = tpu.matmul %62, %60, %cst_36 {dimension_numbers = #tpu.dot_dimension_numbers<[1], [0], [0], [1], [0, 0, 1, 1], [], []>} : vector<64x32xf32>, vector<32x128xf32>, vector<64x128xf32> -> vector<64x128xf32>
    %64 = arith.addf %57, %63 : vector<64x128xf32>
    %c3 = arith.constant 3 : index
    %c0_37 = arith.constant 0 : index
    %c0_38 = arith.constant 0 : index
    %65 = vector.load %arg4[%c3, %c0_37, %c0_38] : memref<5x128x128xf32, #tpu.memory_space<vmem>>, vector<1x128x128xf32>
    %66 = vector.shape_cast %65 : vector<1x128x128xf32> to vector<128x128xf32>
    %cst_39 = arith.constant dense<0.000000e+00> : vector<32x128xf32>
    %67 = tpu.matmul %42, %66, %cst_39 {dimension_numbers = #tpu.dot_dimension_numbers<[1], [0], [0], [1], [0, 0, 1, 1], [], []>} : vector<32x128xf32>, vector<128x128xf32>, vector<32x128xf32> -> vector<32x128xf32>
    %c3_40 = arith.constant 3 : index
    %c0_41 = arith.constant 0 : index
    %c0_42 = arith.constant 0 : index
    %68 = vector.load %arg9[%c3_40, %c0_41, %c0_42] : memref<5x64x32xf32, #tpu.memory_space<vmem>>, vector<1x64x32xf32>
    %69 = vector.shape_cast %68 : vector<1x64x32xf32> to vector<64x32xf32>
    %cst_43 = arith.constant dense<0.000000e+00> : vector<64x128xf32>
    %70 = tpu.matmul %69, %67, %cst_43 {dimension_numbers = #tpu.dot_dimension_numbers<[1], [0], [0], [1], [0, 0, 1, 1], [], []>} : vector<64x32xf32>, vector<32x128xf32>, vector<64x128xf32> -> vector<64x128xf32>
    %71 = arith.addf %64, %70 : vector<64x128xf32>
    %c4 = arith.constant 4 : index
    %c0_44 = arith.constant 0 : index
    %c0_45 = arith.constant 0 : index
    %72 = vector.load %arg4[%c4, %c0_44, %c0_45] : memref<5x128x128xf32, #tpu.memory_space<vmem>>, vector<1x128x128xf32>
    %73 = vector.shape_cast %72 : vector<1x128x128xf32> to vector<128x128xf32>
    %cst_46 = arith.constant dense<0.000000e+00> : vector<32x128xf32>
    %74 = tpu.matmul %42, %73, %cst_46 {dimension_numbers = #tpu.dot_dimension_numbers<[1], [0], [0], [1], [0, 0, 1, 1], [], []>} : vector<32x128xf32>, vector<128x128xf32>, vector<32x128xf32> -> vector<32x128xf32>
    %c4_47 = arith.constant 4 : index
    %c0_48 = arith.constant 0 : index
    %c0_49 = arith.constant 0 : index
    %75 = vector.load %arg9[%c4_47, %c0_48, %c0_49] : memref<5x64x32xf32, #tpu.memory_space<vmem>>, vector<1x64x32xf32>
    %76 = vector.shape_cast %75 : vector<1x64x32xf32> to vector<64x32xf32>
    %cst_50 = arith.constant dense<0.000000e+00> : vector<64x128xf32>
    %77 = tpu.matmul %76, %74, %cst_50 {dimension_numbers = #tpu.dot_dimension_numbers<[1], [0], [0], [1], [0, 0, 1, 1], [], []>} : vector<64x32xf32>, vector<32x128xf32>, vector<64x128xf32> -> vector<64x128xf32>
    %78 = arith.addf %71, %77 : vector<64x128xf32>
    %c0_51 = arith.constant 0 : index
    %c0_52 = arith.constant 0 : index
    %79 = vector.load %arg10[%c0_51, %c0_52] : memref<64x1xf32, #tpu.memory_space<vmem>>, vector<64x1xf32>
    %80 = vector.broadcast %79 : vector<64x1xf32> to vector<64x128xf32>
    %81 = arith.addf %78, %80 : vector<64x128xf32>
    %82 = vector.extract_strided_slice %81 {offsets = [0, 0], sizes = [32, 128], strides = [1, 1]} : vector<64x128xf32> to vector<32x128xf32>
    %83 = vector.extract_strided_slice %81 {offsets = [32, 0], sizes = [32, 128], strides = [1, 1]} : vector<64x128xf32> to vector<32x128xf32>
    %84 = arith.negf %83 : vector<32x128xf32>
    %85 = math.exp %84 : vector<32x128xf32>
    %cst_53 = arith.constant 1.000000e+00 : f32
    %86 = vector.broadcast %cst_53 : f32 to vector<32x128xf32>
    %87 = arith.addf %86, %85 : vector<32x128xf32>
    %88 = arith.divf %86, %87 : vector<32x128xf32>
    %89 = arith.mulf %82, %88 : vector<32x128xf32>
    %90 = arith.addf %42, %89 : vector<32x128xf32>
    %cst_54 = arith.constant 0.000000e+00 : f32
    %91 = vector.broadcast %cst_54 : f32 to vector<64x128xf32>
    %c0_55 = arith.constant 0 : index
    %c0_56 = arith.constant 0 : index
    %c0_57 = arith.constant 0 : index
    %92 = vector.load %arg4[%c0_55, %c0_56, %c0_57] : memref<5x128x128xf32, #tpu.memory_space<vmem>>, vector<1x128x128xf32>
    %93 = vector.shape_cast %92 : vector<1x128x128xf32> to vector<128x128xf32>
    %cst_58 = arith.constant dense<0.000000e+00> : vector<32x128xf32>
    %94 = tpu.matmul %90, %93, %cst_58 {dimension_numbers = #tpu.dot_dimension_numbers<[1], [0], [0], [1], [0, 0, 1, 1], [], []>} : vector<32x128xf32>, vector<128x128xf32>, vector<32x128xf32> -> vector<32x128xf32>
    %c0_59 = arith.constant 0 : index
    %c0_60 = arith.constant 0 : index
    %c0_61 = arith.constant 0 : index
    %95 = vector.load %arg11[%c0_59, %c0_60, %c0_61] : memref<5x64x32xf32, #tpu.memory_space<vmem>>, vector<1x64x32xf32>
    %96 = vector.shape_cast %95 : vector<1x64x32xf32> to vector<64x32xf32>
    %cst_62 = arith.constant dense<0.000000e+00> : vector<64x128xf32>
    %97 = tpu.matmul %96, %94, %cst_62 {dimension_numbers = #tpu.dot_dimension_numbers<[1], [0], [0], [1], [0, 0, 1, 1], [], []>} : vector<64x32xf32>, vector<32x128xf32>, vector<64x128xf32> -> vector<64x128xf32>
    %98 = arith.addf %91, %97 : vector<64x128xf32>
    %c1_63 = arith.constant 1 : index
    %c0_64 = arith.constant 0 : index
    %c0_65 = arith.constant 0 : index
    %99 = vector.load %arg4[%c1_63, %c0_64, %c0_65] : memref<5x128x128xf32, #tpu.memory_space<vmem>>, vector<1x128x128xf32>
    %100 = vector.shape_cast %99 : vector<1x128x128xf32> to vector<128x128xf32>
    %cst_66 = arith.constant dense<0.000000e+00> : vector<32x128xf32>
    %101 = tpu.matmul %90, %100, %cst_66 {dimension_numbers = #tpu.dot_dimension_numbers<[1], [0], [0], [1], [0, 0, 1, 1], [], []>} : vector<32x128xf32>, vector<128x128xf32>, vector<32x128xf32> -> vector<32x128xf32>
    %c1_67 = arith.constant 1 : index
    %c0_68 = arith.constant 0 : index
    %c0_69 = arith.constant 0 : index
    %102 = vector.load %arg11[%c1_67, %c0_68, %c0_69] : memref<5x64x32xf32, #tpu.memory_space<vmem>>, vector<1x64x32xf32>
    %103 = vector.shape_cast %102 : vector<1x64x32xf32> to vector<64x32xf32>
    %cst_70 = arith.constant dense<0.000000e+00> : vector<64x128xf32>
    %104 = tpu.matmul %103, %101, %cst_70 {dimension_numbers = #tpu.dot_dimension_numbers<[1], [0], [0], [1], [0, 0, 1, 1], [], []>} : vector<64x32xf32>, vector<32x128xf32>, vector<64x128xf32> -> vector<64x128xf32>
    %105 = arith.addf %98, %104 : vector<64x128xf32>
    %c2_71 = arith.constant 2 : index
    %c0_72 = arith.constant 0 : index
    %c0_73 = arith.constant 0 : index
    %106 = vector.load %arg4[%c2_71, %c0_72, %c0_73] : memref<5x128x128xf32, #tpu.memory_space<vmem>>, vector<1x128x128xf32>
    %107 = vector.shape_cast %106 : vector<1x128x128xf32> to vector<128x128xf32>
    %cst_74 = arith.constant dense<0.000000e+00> : vector<32x128xf32>
    %108 = tpu.matmul %90, %107, %cst_74 {dimension_numbers = #tpu.dot_dimension_numbers<[1], [0], [0], [1], [0, 0, 1, 1], [], []>} : vector<32x128xf32>, vector<128x128xf32>, vector<32x128xf32> -> vector<32x128xf32>
    %c2_75 = arith.constant 2 : index
    %c0_76 = arith.constant 0 : index
    %c0_77 = arith.constant 0 : index
    %109 = vector.load %arg11[%c2_75, %c0_76, %c0_77] : memref<5x64x32xf32, #tpu.memory_space<vmem>>, vector<1x64x32xf32>
    %110 = vector.shape_cast %109 : vector<1x64x32xf32> to vector<64x32xf32>
    %cst_78 = arith.constant dense<0.000000e+00> : vector<64x128xf32>
    %111 = tpu.matmul %110, %108, %cst_78 {dimension_numbers = #tpu.dot_dimension_numbers<[1], [0], [0], [1], [0, 0, 1, 1], [], []>} : vector<64x32xf32>, vector<32x128xf32>, vector<64x128xf32> -> vector<64x128xf32>
    %112 = arith.addf %105, %111 : vector<64x128xf32>
    %c3_79 = arith.constant 3 : index
    %c0_80 = arith.constant 0 : index
    %c0_81 = arith.constant 0 : index
    %113 = vector.load %arg4[%c3_79, %c0_80, %c0_81] : memref<5x128x128xf32, #tpu.memory_space<vmem>>, vector<1x128x128xf32>
    %114 = vector.shape_cast %113 : vector<1x128x128xf32> to vector<128x128xf32>
    %cst_82 = arith.constant dense<0.000000e+00> : vector<32x128xf32>
    %115 = tpu.matmul %90, %114, %cst_82 {dimension_numbers = #tpu.dot_dimension_numbers<[1], [0], [0], [1], [0, 0, 1, 1], [], []>} : vector<32x128xf32>, vector<128x128xf32>, vector<32x128xf32> -> vector<32x128xf32>
    %c3_83 = arith.constant 3 : index
    %c0_84 = arith.constant 0 : index
    %c0_85 = arith.constant 0 : index
    %116 = vector.load %arg11[%c3_83, %c0_84, %c0_85] : memref<5x64x32xf32, #tpu.memory_space<vmem>>, vector<1x64x32xf32>
    %117 = vector.shape_cast %116 : vector<1x64x32xf32> to vector<64x32xf32>
    %cst_86 = arith.constant dense<0.000000e+00> : vector<64x128xf32>
    %118 = tpu.matmul %117, %115, %cst_86 {dimension_numbers = #tpu.dot_dimension_numbers<[1], [0], [0], [1], [0, 0, 1, 1], [], []>} : vector<64x32xf32>, vector<32x128xf32>, vector<64x128xf32> -> vector<64x128xf32>
    %119 = arith.addf %112, %118 : vector<64x128xf32>
    %c4_87 = arith.constant 4 : index
    %c0_88 = arith.constant 0 : index
    %c0_89 = arith.constant 0 : index
    %120 = vector.load %arg4[%c4_87, %c0_88, %c0_89] : memref<5x128x128xf32, #tpu.memory_space<vmem>>, vector<1x128x128xf32>
    %121 = vector.shape_cast %120 : vector<1x128x128xf32> to vector<128x128xf32>
    %cst_90 = arith.constant dense<0.000000e+00> : vector<32x128xf32>
    %122 = tpu.matmul %90, %121, %cst_90 {dimension_numbers = #tpu.dot_dimension_numbers<[1], [0], [0], [1], [0, 0, 1, 1], [], []>} : vector<32x128xf32>, vector<128x128xf32>, vector<32x128xf32> -> vector<32x128xf32>
    %c4_91 = arith.constant 4 : index
    %c0_92 = arith.constant 0 : index
    %c0_93 = arith.constant 0 : index
    %123 = vector.load %arg11[%c4_91, %c0_92, %c0_93] : memref<5x64x32xf32, #tpu.memory_space<vmem>>, vector<1x64x32xf32>
    %124 = vector.shape_cast %123 : vector<1x64x32xf32> to vector<64x32xf32>
    %cst_94 = arith.constant dense<0.000000e+00> : vector<64x128xf32>
    %125 = tpu.matmul %124, %122, %cst_94 {dimension_numbers = #tpu.dot_dimension_numbers<[1], [0], [0], [1], [0, 0, 1, 1], [], []>} : vector<64x32xf32>, vector<32x128xf32>, vector<64x128xf32> -> vector<64x128xf32>
    %126 = arith.addf %119, %125 : vector<64x128xf32>
    %c0_95 = arith.constant 0 : index
    %c0_96 = arith.constant 0 : index
    %127 = vector.load %arg12[%c0_95, %c0_96] : memref<64x1xf32, #tpu.memory_space<vmem>>, vector<64x1xf32>
    %128 = vector.broadcast %127 : vector<64x1xf32> to vector<64x128xf32>
    %129 = arith.addf %126, %128 : vector<64x128xf32>
    %130 = vector.extract_strided_slice %129 {offsets = [0, 0], sizes = [32, 128], strides = [1, 1]} : vector<64x128xf32> to vector<32x128xf32>
    %131 = vector.extract_strided_slice %129 {offsets = [32, 0], sizes = [32, 128], strides = [1, 1]} : vector<64x128xf32> to vector<32x128xf32>
    %132 = arith.negf %131 : vector<32x128xf32>
    %133 = math.exp %132 : vector<32x128xf32>
    %cst_97 = arith.constant 1.000000e+00 : f32
    %134 = vector.broadcast %cst_97 : f32 to vector<32x128xf32>
    %135 = arith.addf %134, %133 : vector<32x128xf32>
    %136 = arith.divf %134, %135 : vector<32x128xf32>
    %137 = arith.mulf %130, %136 : vector<32x128xf32>
    %138 = arith.addf %90, %137 : vector<32x128xf32>
    %c0_98 = arith.constant 0 : index
    %c0_99 = arith.constant 0 : index
    %139 = vector.load %arg13[%c0_98, %c0_99] : memref<96x32xf32, #tpu.memory_space<vmem>>, vector<96x32xf32>
    %cst_100 = arith.constant dense<0.000000e+00> : vector<96x128xf32>
    %140 = tpu.matmul %139, %138, %cst_100 {dimension_numbers = #tpu.dot_dimension_numbers<[1], [0], [0], [1], [0, 0, 1, 1], [], []>} : vector<96x32xf32>, vector<32x128xf32>, vector<96x128xf32> -> vector<96x128xf32>
    %c0_101 = arith.constant 0 : index
    %c0_102 = arith.constant 0 : index
    %141 = vector.load %arg14[%c0_101, %c0_102] : memref<96x1xf32, #tpu.memory_space<vmem>>, vector<96x1xf32>
    %142 = vector.broadcast %141 : vector<96x1xf32> to vector<96x128xf32>
    %143 = arith.addf %140, %142 : vector<96x128xf32>
    %144 = vector.extract_strided_slice %143 {offsets = [0, 0], sizes = [32, 128], strides = [1, 1]} : vector<96x128xf32> to vector<32x128xf32>
    %145 = vector.extract_strided_slice %143 {offsets = [32, 0], sizes = [32, 128], strides = [1, 1]} : vector<96x128xf32> to vector<32x128xf32>
    %146 = vector.extract_strided_slice %143 {offsets = [64, 0], sizes = [32, 128], strides = [1, 1]} : vector<96x128xf32> to vector<32x128xf32>
    %c0_103 = arith.constant 0 : index
    %c0_104 = arith.constant 0 : index
    %147 = vector.load %arg2[%c0_103, %c0_104] : memref<128x128xf32, #tpu.memory_space<vmem>>, vector<128x128xf32>
    %148 = vector.extract_strided_slice %144 {offsets = [0, 0], sizes = [16, 128], strides = [1, 1]} : vector<32x128xf32> to vector<16x128xf32>
    %149 = vector.extract_strided_slice %145 {offsets = [0, 0], sizes = [16, 128], strides = [1, 1]} : vector<32x128xf32> to vector<16x128xf32>
    %150 = vector.extract_strided_slice %146 {offsets = [0, 0], sizes = [16, 128], strides = [1, 1]} : vector<32x128xf32> to vector<16x128xf32>
    %151 = tpu.transpose %149, [1, 0] : vector<16x128xf32> -> vector<128x16xf32>
    %cst_105 = arith.constant dense<0.000000e+00> : vector<128x128xf32>
    %152 = tpu.matmul %151, %148, %cst_105 {dimension_numbers = #tpu.dot_dimension_numbers<[1], [0], [0], [1], [0, 0, 1, 1], [], []>} : vector<128x16xf32>, vector<16x128xf32>, vector<128x128xf32> -> vector<128x128xf32>
    %cst_106 = arith.constant 0.176776692 : f32
    %153 = vector.broadcast %cst_106 : f32 to vector<128x128xf32>
    %154 = arith.mulf %152, %153 : vector<128x128xf32>
    %155 = arith.addf %154, %147 : vector<128x128xf32>
    %cst_107 = arith.constant dense<0xFF800000> : vector<128xf32>
    %156 = vector.multi_reduction <maximumf>, %155, %cst_107 [0] : vector<128x128xf32> to vector<128xf32>
    %157 = vector.shape_cast %156 : vector<128xf32> to vector<1x128xf32>
    %158 = vector.broadcast %157 : vector<1x128xf32> to vector<128x128xf32>
    %159 = arith.subf %155, %158 : vector<128x128xf32>
    %160 = math.exp %159 : vector<128x128xf32>
    %cst_108 = arith.constant dense<0.000000e+00> : vector<128xf32>
    %161 = vector.multi_reduction <add>, %160, %cst_108 [0] : vector<128x128xf32> to vector<128xf32>
    %162 = vector.shape_cast %161 : vector<128xf32> to vector<1x128xf32>
    %163 = tpu.reciprocal %162 {approx = true} : vector<1x128xf32> -> vector<1x128xf32>
    %164 = vector.broadcast %163 : vector<1x128xf32> to vector<128x128xf32>
    %165 = arith.mulf %160, %164 : vector<128x128xf32>
    %cst_109 = arith.constant dense<0.000000e+00> : vector<16x128xf32>
    %166 = tpu.matmul %150, %165, %cst_109 {dimension_numbers = #tpu.dot_dimension_numbers<[1], [0], [0], [1], [0, 0, 1, 1], [], []>} : vector<16x128xf32>, vector<128x128xf32>, vector<16x128xf32> -> vector<16x128xf32>
    %167 = vector.extract_strided_slice %144 {offsets = [16, 0], sizes = [16, 128], strides = [1, 1]} : vector<32x128xf32> to vector<16x128xf32>
    %168 = vector.extract_strided_slice %145 {offsets = [16, 0], sizes = [16, 128], strides = [1, 1]} : vector<32x128xf32> to vector<16x128xf32>
    %169 = vector.extract_strided_slice %146 {offsets = [16, 0], sizes = [16, 128], strides = [1, 1]} : vector<32x128xf32> to vector<16x128xf32>
    %170 = tpu.transpose %168, [1, 0] : vector<16x128xf32> -> vector<128x16xf32>
    %cst_110 = arith.constant dense<0.000000e+00> : vector<128x128xf32>
    %171 = tpu.matmul %170, %167, %cst_110 {dimension_numbers = #tpu.dot_dimension_numbers<[1], [0], [0], [1], [0, 0, 1, 1], [], []>} : vector<128x16xf32>, vector<16x128xf32>, vector<128x128xf32> -> vector<128x128xf32>
    %cst_111 = arith.constant 0.176776692 : f32
    %172 = vector.broadcast %cst_111 : f32 to vector<128x128xf32>
    %173 = arith.mulf %171, %172 : vector<128x128xf32>
    %174 = arith.addf %173, %147 : vector<128x128xf32>
    %cst_112 = arith.constant dense<0xFF800000> : vector<128xf32>
    %175 = vector.multi_reduction <maximumf>, %174, %cst_112 [0] : vector<128x128xf32> to vector<128xf32>
    %176 = vector.shape_cast %175 : vector<128xf32> to vector<1x128xf32>
    %177 = vector.broadcast %176 : vector<1x128xf32> to vector<128x128xf32>
    %178 = arith.subf %174, %177 : vector<128x128xf32>
    %179 = math.exp %178 : vector<128x128xf32>
    %cst_113 = arith.constant dense<0.000000e+00> : vector<128xf32>
    %180 = vector.multi_reduction <add>, %179, %cst_113 [0] : vector<128x128xf32> to vector<128xf32>
    %181 = vector.shape_cast %180 : vector<128xf32> to vector<1x128xf32>
    %182 = tpu.reciprocal %181 {approx = true} : vector<1x128xf32> -> vector<1x128xf32>
    %183 = vector.broadcast %182 : vector<1x128xf32> to vector<128x128xf32>
    %184 = arith.mulf %179, %183 : vector<128x128xf32>
    %cst_114 = arith.constant dense<0.000000e+00> : vector<16x128xf32>
    %185 = tpu.matmul %169, %184, %cst_114 {dimension_numbers = #tpu.dot_dimension_numbers<[1], [0], [0], [1], [0, 0, 1, 1], [], []>} : vector<16x128xf32>, vector<128x128xf32>, vector<16x128xf32> -> vector<16x128xf32>
    %186 = tpu.concatenate %166, %185 in 0 : vector<16x128xf32>, vector<16x128xf32> -> vector<32x128xf32>
    %c0_115 = arith.constant 0 : index
    %c0_116 = arith.constant 0 : index
    %187 = vector.load %arg15[%c0_115, %c0_116] : memref<32x32xf32, #tpu.memory_space<vmem>>, vector<32x32xf32>
    %cst_117 = arith.constant dense<0.000000e+00> : vector<32x128xf32>
    %188 = tpu.matmul %187, %186, %cst_117 {dimension_numbers = #tpu.dot_dimension_numbers<[1], [0], [0], [1], [0, 0, 1, 1], [], []>} : vector<32x32xf32>, vector<32x128xf32>, vector<32x128xf32> -> vector<32x128xf32>
    %c0_118 = arith.constant 0 : index
    %c0_119 = arith.constant 0 : index
    %189 = vector.load %arg16[%c0_118, %c0_119] : memref<32x1xf32, #tpu.memory_space<vmem>>, vector<32x1xf32>
    %190 = vector.broadcast %189 : vector<32x1xf32> to vector<32x128xf32>
    %191 = arith.addf %188, %190 : vector<32x128xf32>
    %192 = arith.addf %191, %138 : vector<32x128xf32>
    %c0_120 = arith.constant 0 : index
    %c0_121 = arith.constant 0 : index
    %193 = vector.load %arg17[%c0_120, %c0_121] : memref<32x32xf32, #tpu.memory_space<vmem>>, vector<32x32xf32>
    %cst_122 = arith.constant dense<0.000000e+00> : vector<32x128xf32>
    %194 = tpu.matmul %193, %192, %cst_122 {dimension_numbers = #tpu.dot_dimension_numbers<[1], [0], [0], [1], [0, 0, 1, 1], [], []>} : vector<32x32xf32>, vector<32x128xf32>, vector<32x128xf32> -> vector<32x128xf32>
    %c0_123 = arith.constant 0 : index
    %c0_124 = arith.constant 0 : index
    %195 = vector.load %arg18[%c0_123, %c0_124] : memref<32x1xf32, #tpu.memory_space<vmem>>, vector<32x1xf32>
    %196 = vector.broadcast %195 : vector<32x1xf32> to vector<32x128xf32>
    %197 = arith.addf %194, %196 : vector<32x128xf32>
    %c0_125 = arith.constant 0 : index
    %c0_126 = arith.constant 0 : index
    %198 = vector.load %arg3[%c0_125, %c0_126] : memref<128x2xf32, #tpu.memory_space<vmem>>, vector<128x2xf32>
    %cst_127 = arith.constant dense<0.000000e+00> : vector<32x2xf32>
    %199 = tpu.matmul %197, %198, %cst_127 {dimension_numbers = #tpu.dot_dimension_numbers<[1], [0], [0], [1], [0, 0, 1, 1], [], []>} : vector<32x128xf32>, vector<128x2xf32>, vector<32x2xf32> -> vector<32x2xf32>
    %200 = vector.shape_cast %199 : vector<32x2xf32> to vector<1x32x2xf32>
    %c0_128 = arith.constant 0 : index
    %c0_129 = arith.constant 0 : index
    %c0_130 = arith.constant 0 : index
    %201 = vector.load %arg19[%c0_128, %c0_129, %c0_130] : memref<1x32x2xf32, #tpu.memory_space<vmem>>, vector<1x32x2xf32>
    tpu.vector_store %arg19[%c0_128, %c0_129, %c0_130], %200 {strides = array<i32>} : memref<1x32x2xf32, #tpu.memory_space<vmem>>, vector<1x32x2xf32>,
    return
  }
  func.func @transform_0(%arg0: i32) -> (i32, i32) {
    %c0_i32 = arith.constant 0 : i32
    %c0_i32_0 = arith.constant 0 : i32
    return %c0_i32, %arg0 : i32, i32
  }
  func.func @transform_1(%arg0: i32) -> (i32, i32) {
    %c0_i32 = arith.constant 0 : i32
    %c0_i32_0 = arith.constant 0 : i32
    return %arg0, %c0_i32 : i32, i32
  }
  func.func @transform_2(%arg0: i32) -> (i32, i32) {
    %c0_i32 = arith.constant 0 : i32
    %c0_i32_0 = arith.constant 0 : i32
    return %arg0, %c0_i32 : i32, i32
  }
  func.func @transform_3(%arg0: i32) -> (i32, i32, i32) {
    %c0_i32 = arith.constant 0 : i32
    %c0_i32_0 = arith.constant 0 : i32
    %c0_i32_1 = arith.constant 0 : i32
    %c0_i32_2 = arith.constant 0 : i32
    return %c0_i32, %c0_i32_0, %c0_i32_1 : i32, i32, i32
  }
  func.func @transform_4(%arg0: i32) -> (i32, i32) {
    %c0_i32 = arith.constant 0 : i32
    %c0_i32_0 = arith.constant 0 : i32
    %c0_i32_1 = arith.constant 0 : i32
    return %c0_i32, %c0_i32_0 : i32, i32
  }
  func.func @transform_5(%arg0: i32) -> (i32, i32) {
    %c0_i32 = arith.constant 0 : i32
    %c0_i32_0 = arith.constant 0 : i32
    %c0_i32_1 = arith.constant 0 : i32
    return %c0_i32, %c0_i32_0 : i32, i32
  }
  func.func @transform_6(%arg0: i32) -> (i32, i32) {
    %c0_i32 = arith.constant 0 : i32
    %c0_i32_0 = arith.constant 0 : i32
    %c0_i32_1 = arith.constant 0 : i32
    return %c0_i32, %c0_i32_0 : i32, i32
  }
  func.func @transform_7(%arg0: i32) -> (i32, i32) {
    %c0_i32 = arith.constant 0 : i32
    %c0_i32_0 = arith.constant 0 : i32
    %c0_i32_1 = arith.constant 0 : i32
    return %c0_i32, %c0_i32_0 : i32, i32
  }
  func.func @transform_8(%arg0: i32) -> (i32, i32, i32) {
    %c0_i32 = arith.constant 0 : i32
    %c0_i32_0 = arith.constant 0 : i32
    %c0_i32_1 = arith.constant 0 : i32
    %c0_i32_2 = arith.constant 0 : i32
    return %c0_i32, %c0_i32_0, %c0_i32_1 : i32, i32, i32
  }
  func.func @transform_9(%arg0: i32) -> (i32, i32) {
    %c0_i32 = arith.constant 0 : i32
    %c0_i32_0 = arith.constant 0 : i32
    %c0_i32_1 = arith.constant 0 : i32
    return %c0_i32, %c0_i32_0 : i32, i32
  }
  func.func @transform_10(%arg0: i32) -> (i32, i32, i32) {
    %c0_i32 = arith.constant 0 : i32
    %c0_i32_0 = arith.constant 0 : i32
    %c0_i32_1 = arith.constant 0 : i32
    %c0_i32_2 = arith.constant 0 : i32
    return %c0_i32, %c0_i32_0, %c0_i32_1 : i32, i32, i32
  }
  func.func @transform_11(%arg0: i32) -> (i32, i32) {
    %c0_i32 = arith.constant 0 : i32
    %c0_i32_0 = arith.constant 0 : i32
    %c0_i32_1 = arith.constant 0 : i32
    return %c0_i32, %c0_i32_0 : i32, i32
  }
  func.func @transform_12(%arg0: i32) -> (i32, i32) {
    %c0_i32 = arith.constant 0 : i32
    %c0_i32_0 = arith.constant 0 : i32
    %c0_i32_1 = arith.constant 0 : i32
    return %c0_i32, %c0_i32_0 : i32, i32
  }
  func.func @transform_13(%arg0: i32) -> (i32, i32) {
    %c0_i32 = arith.constant 0 : i32
    %c0_i32_0 = arith.constant 0 : i32
    %c0_i32_1 = arith.constant 0 : i32
    return %c0_i32, %c0_i32_0 : i32, i32
  }
  func.func @transform_14(%arg0: i32) -> (i32, i32) {
    %c0_i32 = arith.constant 0 : i32
    %c0_i32_0 = arith.constant 0 : i32
    %c0_i32_1 = arith.constant 0 : i32
    return %c0_i32, %c0_i32_0 : i32, i32
  }
  func.func @transform_15(%arg0: i32) -> (i32, i32) {
    %c0_i32 = arith.constant 0 : i32
    %c0_i32_0 = arith.constant 0 : i32
    %c0_i32_1 = arith.constant 0 : i32
    return %c0_i32, %c0_i32_0 : i32, i32
  }
  func.func @transform_16(%arg0: i32) -> (i32, i32) {
    %c0_i32 = arith.constant 0 : i32
    %c0_i32_0 = arith.constant 0 : i32
    %c0_i32_1 = arith.constant 0 : i32
    return %c0_i32, %c0_i32_0 : i32, i32
  }
  func.func @transform_17(%arg0: i32) -> (i32, i32) {
    %c0_i32 = arith.constant 0 : i32
    %c0_i32_0 = arith.constant 0 : i32
    %c0_i32_1 = arith.constant 0 : i32
    return %c0_i32, %c0_i32_0 : i32, i32
  }
  func.func @transform_18(%arg0: i32) -> (i32, i32, i32) {
    %c0_i32 = arith.constant 0 : i32
    %c0_i32_0 = arith.constant 0 : i32
    %c0_i32_1 = arith.constant 0 : i32
    return %arg0, %c0_i32, %c0_i32_0 : i32, i32, i32
  }
}

</mosaic_0001>

<bundles_post_ra>
// kernel: tpu_custom_call.1
= control target key start
LH: loop header
LB: loop body
LE: loop exit
PB: predicated region body
PF: predicated region fallthrough
CT: control target
= control target key end

     0   :  { %v3245_v0 = vmov 0   ;;  %vm89_vm0 = vcmask 130048   ;;  %vm239_vm9 = vcmask 261120   ;;  %s5180_s5 = inlined_call_operand.vmem [shape: f32[32,1], index: 5, kind: input, shape index: {}]   ;;  %s5181_s0 = inlined_call_operand.vmem [shape: f32[16,128], index: 0, kind: input, shape index: {}]   ;;  %s5182_s4 = inlined_call_operand.vmem [shape: f32[32,16], index: 4, kind: input, shape index: {}]   ;;  %s5183_s7 = inlined_call_operand.vmem [shape: f32[32,1], index: 7, kind: input, shape index: {}]   ;;  %s5184_s9 = inlined_call_operand.vmem [shape: f32[64,1], index: 9, kind: input, shape index: {}]   ;;  %s5185_s11 = inlined_call_operand.vmem [shape: f32[64,1], index: 11, kind: input, shape index: {}]   ;;  %s5186_s13 = inlined_call_operand.vmem [shape: f32[96,1], index: 13, kind: input, shape index: {}]   ;;  %s5187_s15 = inlined_call_operand.vmem [shape: f32[32,1], index: 15, kind: input, shape index: {}]   ;;  %s5188_s17 = inlined_call_operand.vmem [shape: f32[32,1], index: 17, kind: input, shape index: {}]   ;;  %s5189_s6 = inlined_call_operand.vmem [shape: f32[32,32], index: 6, kind: input, shape index: {}]   ;;  %s5190_s3 = inlined_call_operand.vmem [shape: f32[5,128,128], index: 3, kind: input, shape index: {}]   ;;  %s5191_s8 = inlined_call_operand.vmem [shape: f32[5,64,32], index: 8, kind: input, shape index: {}]   ;;  %s5192_s10 = inlined_call_operand.vmem [shape: f32[5,64,32], index: 10, kind: input, shape index: {}]   ;;  %s5193_s12 = inlined_call_operand.vmem [shape: f32[96,32], index: 12, kind: input, shape index: {}]   ;;  %s5194_s1 = inlined_call_operand.vmem [shape: f32[128,128], index: 1, kind: input, shape index: {}]   ;;  %s5195_s14 = inlined_call_operand.vmem [shape: f32[32,32], index: 14, kind: input, shape index: {}]   ;;  %s5196_s2 = inlined_call_operand.vmem [shape: f32[128,2], index: 2, kind: input, shape index: {}]   ;;  %s5197_s16 = inlined_call_operand.vmem [shape: f32[32,32], index: 16, kind: input, shape index: {}]   ;;  %s5198_s18 = inlined_call_operand.vmem [shape: f32[1,32,2], index: 18, kind: output, shape index: {}]  }
   0x1   :  { %5227 = sst [smem:[#allocation27_spill]] %s5180_s5  ;;  %3095 = vset.pattern.permute.xlu1 %v3245_v0  ;;  %3094 = vset.pattern.permute.xlu0 %v3245_v0  ;;  %v217_v9 = vld [vmem:[%s5183_s7 + $0x10] sm:$0xff]  ;;  %v218_v10 = vld [vmem:[%s5183_s7 + $0x18] sm:$0xff]  ;;  %v988_v12 = vld [vmem:[%s5184_s9 + $0x28] sm:$0xff] }
   0x2   :  { %5228 = sst [smem:[#allocation28_spill]] %s5181_s0  ;;  %3096 = vset.pattern.permute.xlu2 %v3245_v0  ;;  %v989_v13 = vld [vmem:[%s5184_s9 + $0x30] sm:$0xff]  ;;  %v983_v15 = vld [vmem:[%s5184_s9] sm:$0xff]  ;;  %v984_v16 = vld [vmem:[%s5184_s9 + $0x8] sm:$0xff] }
   0x3   :  { %5229 = sst [smem:[#allocation29_spill]] %s5182_s4  ;;  %v986_v17 = vld [vmem:[%s5184_s9 + $0x18] sm:$0xff]  ;;  %v1666_v19 = vld [vmem:[%s5185_s11 + $0x28] sm:$0xff]  ;;  %v1665_v20 = vld [vmem:[%s5185_s11 + $0x20] sm:$0xff] }
   0x4   :  { %s5230_s29 = sld [smem:[#allocation27_spill]]  ;;  %v1668_v18 = vld [vmem:[%s5185_s11 + $0x38] sm:$0xff]  ;;  %v1663_v21 = vld [vmem:[%s5185_s11 + $0x10] sm:$0xff]  ;;  %v1662_v22 = vld [vmem:[%s5185_s11 + $0x8] sm:$0xff] }
   0x5   :  { %s5231_s20 = sld [smem:[#allocation28_spill]]  ;;  %v1817_v23 = vld [vmem:[%s5186_s13 + $0x20] sm:$0xff]  ;;  %v1818_v24 = vld [vmem:[%s5186_s13 + $0x28] sm:$0xff]  ;;  %v1819_v25 = vld [vmem:[%s5186_s13 + $0x30] sm:$0xff] }
   0x6   :  { %s5232_s24 = sld [smem:[#allocation29_spill]]  ;;  %v1813_v26 = vld [vmem:[%s5186_s13] sm:$0xff]  ;;  %v1816_v27 = vld [vmem:[%s5186_s13 + $0x18] sm:$0xff]  ;;  %v1815_v28 = vld [vmem:[%s5186_s13 + $0x10] sm:$0xff] }
   0x7   :  { %v1821_v29 = vld [vmem:[%s5186_s13 + $0x40] sm:$0xff]  ;;  %v1822_v30 = vld [vmem:[%s5186_s13 + $0x48] sm:$0xff]  ;;  %v1824_v31 = vld [vmem:[%s5186_s13 + $0x58] sm:$0xff] }
   0x8   :  { %v1823_v32 = vld [vmem:[%s5186_s13 + $0x50] sm:$0xff]  ;;  %v2611_v33 = vld [vmem:[%s5187_s15 + $0x18] sm:$0xff]  ;;  %v2609_v35 = vld [vmem:[%s5187_s15 + $0x8] sm:$0xff] }
   0x9   :  { %v215_v37 = vld [vmem:[%s5183_s7] sm:$0xff]  ;;  %v216_v44 = vld [vmem:[%s5183_s7 + $0x8] sm:$0xff]  ;;  %v2683_v57 = vld [vmem:[%s5188_s17 + $0x10] sm:$0xff] }
   0xa   :  { %v68_v1 = vld [vmem:[%s5230_s29 + $0x18] sm:$0xff]  ;;  %v66_v2 = vld [vmem:[%s5230_s29 + $0x8] sm:$0xff]  ;;  %v67_v6 = vld [vmem:[%s5230_s29 + $0x10] sm:$0xff]  ;;  %221 = vperm.xlu2 %3096, %v215_v37  }
   0xb   :  { %v60_v3 = vld [vmem:[%s5231_s20 + $0x8] sm:$0xff]  ;;  %86 = vperm.xlu0 %3094, %v68_v1   ;;  %76 = vperm.xlu1 %3095, %v66_v2   ;;  %v59_v4 = vld [vmem:[%s5231_s20] sm:$0xff]  ;;  %v990_v63 = vld [vmem:[%s5184_s9 + $0x38] sm:$0xff] }
   0xc   :  { %116 = vmatpush.msra.mxu0 %v60_v3  ;;  %v61_v5 = vld [vmem:[%s5232_s24] sm:$0xff]  ;;  %v62_v8 = vld [vmem:[%s5232_s24 + $0x8] sm:$0xff]  ;;  %v63_v11 = vld [vmem:[%s5232_s24 + $0x10] sm:$0xff] }
   0xd   :  { %v65_v7 = vld [vmem:[%s5230_s29] sm:$0xff]  ;;  %v64_v14 = vld [vmem:[%s5232_s24 + $0x18] sm:$0xff]  ;;  %v2682_v47 = vld [vmem:[%s5188_s17 + $0x8] sm:$0xff] }
   0xe   :  { %117 = vmatpush.msra.mxu0 %v59_v4  ;;  %v2681_v38 = vld [vmem:[%s5188_s17] sm:$0xff]  ;;  %v2684_v1 = vld [vmem:[%s5188_s17 + $0x18] sm:$0xff] }
   0xf   :  { %2800 = vmatmul.msk.f32.vlgmr.msra.gmra.mxu0 %vm89_vm0, %v61_v5  ;;  %v987_v54 = vld [vmem:[%s5184_s9 + $0x20] sm:$0xff] }
  0x12   :  { %226 = vperm.xlu2 %3096, %v216_v44  }
  0x13   :  { %81 = vperm.xlu0 %3094, %v67_v6   ;;  %71 = vperm.xlu1 %3095, %v65_v7  }
  0x17   :  { %2801 = vmatmul.msk.f32.gmra.mxu0 %vm89_vm0, %v62_v8 }
  0x1a   :  { %1013 = vperm.xlu2 %3096, %v987_v54  }
  0x1b   :  { %231 = vperm.xlu0 %3094, %v217_v9   ;;  %236 = vperm.xlu1 %3095, %v218_v10  }
  0x1f   :  { %2802 = vmatmul.msk.f32.gmra.mxu0 %vm89_vm0, %v63_v11 }
  0x22   :  { %1028 = vperm.xlu2 %3096, %v990_v63   ;;  %v1661_v63 = vld [vmem:[%s5185_s11] sm:$0xff] }
  0x23   :  { %1018 = vperm.xlu0 %3094, %v988_v12   ;;  %1023 = vperm.xlu1 %3095, %v989_v13  }
  0x27   :  { %2803 = vmatmul.msk.f32.gmra.mxu0 %vm89_vm0, %v64_v14 }
  0x2b   :  { %993 = vperm.xlu0 %3094, %v983_v15   ;;  %998 = vperm.xlu1 %3095, %v984_v16   ;;  %v985_v16 = vld [vmem:[%s5184_s9 + $0x10] sm:$0xff] }
  0x2c   :  { %1003 = vperm.xlu2 %3096, %v985_v16   ;;  %v3606_v16 = vld [vmem:[%s5190_s3 + $0x50] sm:$0xff] }
  0x33   :  { %1008 = vperm.xlu0 %3094, %v986_v17   ;;  %1706 = vperm.xlu1 %3095, %v1668_v18  }
  0x3b   :  { %1696 = vperm.xlu0 %3094, %v1666_v19   ;;  %1691 = vperm.xlu1 %3095, %v1665_v20  }
  0x43   :  { %1681 = vperm.xlu0 %3094, %v1663_v21   ;;  %1676 = vperm.xlu1 %3095, %v1662_v22  }
  0x4b   :  { %1847 = vperm.xlu0 %3094, %v1817_v23   ;;  %1852 = vperm.xlu1 %3095, %v1818_v24  }
  0x53   :  { %1857 = vperm.xlu0 %3094, %v1819_v25   ;;  %1827 = vperm.xlu1 %3095, %v1813_v26  }
  0x5b   :  { %1842 = vperm.xlu0 %3094, %v1816_v27   ;;  %1837 = vperm.xlu1 %3095, %v1815_v28  }
  0x63   :  { %1867 = vperm.xlu1 %3095, %v1821_v29  }
  0x6b   :  { %1872 = vperm.xlu1 %3095, %v1822_v30  }
  0x73   :  { %1882 = vperm.xlu1 %3095, %v1824_v31  }
  0x7b   :  { %1877 = vperm.xlu1 %3095, %v1823_v32  }
  0x7d   :  { %v77_v34 = vpop.permute.xlu1 %76  ;;  %v87_v39 = vpop.permute.xlu0 %86 }
  0x83   :  { %2629 = vperm.xlu1 %3095, %v2611_v33  }
  0x85   :  { %v72_v40 = vpop.permute.xlu1 %71  ;;  %v82_v51 = vpop.permute.xlu0 %81 }
  0x8b   :  { %2619 = vperm.xlu1 %3095, %v2609_v35  }
  0x8c   :  { %v119_v36 = vpop.f32.mrf.mxu0 }
  0x8d   :  { %v3453_v41 = vadd.f32 %v119_v36, %v72_v40 }
  0x8f   :  { %v143_v45 = vand.u32 2147483647, %v3453_v41  ;;  %vm135_vm8 = vcmp.ne.f32.partialorder %v3453_v41, %v3453_v41 }
  0x91   :  { %v147_v49 = vsub.f32 0.0, %v143_v45 }
  0x93   :  { %2687 = vperm.xlu1 %3095, %v2681_v38   ;;  %v151_v55 = vmul.f32 1.442695, %v147_v49  ;;  %v1667_v38 = vld [vmem:[%s5185_s11 + $0x30] sm:$0xff] }
  0x94   :  { %v122_v42 = vpop.f32.mrf.mxu0  ;;  %1701 = vperm.xlu2 %3096, %v1667_v38   ;;  %v3717_v38 = vld [vmem:[%s5190_s3 + $0x8] sm:$0xff] }
  0x95   :  { %v3455_v43 = vadd.f32 %v122_v42, %v77_v34  ;;  %v131_v42 = vmax.f32 %v3453_v41, 0.0 }
  0x97   :  { %v144_v46 = vand.u32 2147483647, %v3455_v43  ;;  %v132_v40 = vmax.f32 %v3455_v43, 0.0  ;;  %vm136_vm7 = vcmp.ne.f32.partialorder %v3455_v43, %v3455_v43 }
  0x99   :  { %v148_v48 = vsub.f32 0.0, %v144_v46 }
  0x9b   :  { %v153_v50 = vmul.f32 1.442695, %v148_v48  ;;  %2692 = vperm.xlu1 %3095, %v2682_v47  }
  0x9c   :  { %v125_v52 = vpop.f32.mrf.mxu0 }
  0x9d   :  { %v3465_v53 = vadd.f32 %v125_v52, %v82_v51  ;;  %3097 = vpow2.f32 %v153_v50 }
  0x9e   :  { %3099 = vpow2.f32 %v151_v55 }
  0x9f   :  { %v145_v56 = vand.u32 2147483647, %v3465_v53  ;;  %v133_v29 = vmax.f32 %v3465_v53, 0.0  ;;  %vm137_vm5 = vcmp.ne.f32.partialorder %v3465_v53, %v3465_v53 }
  0xa1   :  { %v149_v58 = vsub.f32 0.0, %v145_v56  ;;  %v1664_v56 = vld [vmem:[%s5185_s11 + $0x18] sm:$0xff] }
  0xa2   :  { %1686 = vperm.xlu2 %3096, %v1664_v56  }
  0xa3   :  { %v155_v59 = vmul.f32 1.442695, %v149_v58  ;;  %2697 = vperm.xlu1 %3095, %v2683_v57   ;;  %v3098_v61 = vpop.eup %3097 }
  0xa4   :  { %v128_v60 = vpop.f32.mrf.mxu0  ;;  %v168_v2 = vadd.f32 1.0, %v3098_v61  ;;  %v3100_v3 = vpop.eup %3099  ;;  %v171_v10 = vmul.f32 -0.5, %v3098_v61  ;;  %v174_v24 = vand.u32 2147483647, %v3098_v61 }
  0xa5   :  { %3101 = vpow2.f32 %v155_v59  ;;  %v3474_v62 = vadd.f32 %v128_v60, %v87_v39  ;;  %v159_v8 = vadd.f32 1.0, %v3100_v3  ;;  %v162_v15 = vmul.f32 -0.5, %v3100_v3 }
  0xa6   :  { %3103 = vlog2.f32 %v168_v2  ;;  %v172_v21 = vadd.f32 1.0, %v171_v10  ;;  %v165_v28 = vand.u32 2147483647, %v3100_v3  ;;  %vm3487_vm2 = vcmp.lt.f32.partialorder %v174_v24, 0.0004427343  ;;  %v3570_v10 = vld [vmem:[%s5190_s3 + $0x68] sm:$0xff] }
  0xa7   :  { %v146_v0 = vand.u32 2147483647, %v3474_v62  ;;  %v163_v26 = vadd.f32 1.0, %v162_v15  ;;  %v134_v47 = vmax.f32 %v3474_v62, 0.0  ;;  %vm138_vm6 = vcmp.ne.f32.partialorder %v3474_v62, %v3474_v62  ;;  %v3599_v15 = vld [vmem:[%s5190_s3 + $0xd8] sm:$0xff]  ;;  %v3654_v24 = vld [vmem:[%s5190_s3 + $0x30] sm:$0xff] }
  0xa8   :  { %v173_v31 = vmul.f32 %v3098_v61, %v172_v21  ;;  %vm166_vm3 = vcmp.lt.f32.partialorder %v165_v28, 0.0004427343  ;;  %v3635_v21 = vld [vmem:[%s5190_s3 + $0xc0] sm:$0xff]  ;;  %v222_v28 = vpop.permute.xlu2 %221 }
  0xa9   :  { %v150_v4 = vsub.f32 0.0, %v146_v0  ;;  %v164_v37 = vmul.f32 %v3100_v3, %v163_v26  ;;  %v3666_v26 = vld [vmem:[%s5190_s3 + $0x28] sm:$0xff] }
  0xaa   :  { %1671 = vperm.xlu2 %3096, %v1661_v63   ;;  %v3768_v63 = vld [vmem:[%s5190_s3 + $0x158] sm:$0xff] }
  0xab   :  { %v3102_v5 = vpop.eup %3101  ;;  %v157_v6 = vmul.f32 1.442695, %v150_v4  ;;  %2702 = vperm.xlu1 %3095, %v2684_v1   ;;  %v1814_v4 = vld [vmem:[%s5186_s13 + $0x8] sm:$0xff] }
  0xac   :  { %v177_v7 = vadd.f32 1.0, %v3102_v5  ;;  %v180_v9 = vmul.f32 -0.5, %v3102_v5  ;;  %v3104_v11 = vpop.eup %3103  ;;  %v183_v14 = vand.u32 2147483647, %v3102_v5 }
  0xad   :  { %3105 = vpow2.f32 %v157_v6  ;;  %v170_v25 = vmul.f32 0.6931472, %v3104_v11  ;;  %v3546_v6 = vld [vmem:[%s5190_s3 + $0x78] sm:$0xff]  ;;  %v3575_v11 = vld [vmem:[%s5190_s3 + $0xe8] sm:$0xff] }
  0xae   :  { %3107 = vlog2.f32 %v177_v7  ;;  %v181_v12 = vadd.f32 1.0, %v180_v9  ;;  %vm184_vm1 = vcmp.lt.f32.partialorder %v183_v14, 0.0004427343  ;;  %v3551_v7 = vld [vmem:[%s5190_s3 + $0xf8] sm:$0xff]  ;;  %v3563_v9 = vld [vmem:[%s5190_s3 + $0xf0] sm:$0xff] }
  0xaf   :  { %3109 = vlog2.f32 %v159_v8  ;;  %v176_v36 = vsel %vm3487_vm2, %v173_v31, %v170_v25  ;;  %431 = vmatpush.msra.mxu3 %v3551_v7  ;;  %v3558_v8 = vld [vmem:[%s5190_s3 + $0x70] sm:$0xff]  ;;  %v3594_v14 = vld [vmem:[%s5190_s3 + $0x58] sm:$0xff] }
  0xb0   :  { %v182_v23 = vmul.f32 %v3102_v5, %v181_v12  ;;  %v196_v48 = vadd.f32 %v176_v36, %v132_v40  ;;  %v214_v5 = vld [vmem:[%s5189_s6 + $0x18] sm:$0xff]  ;;  %v3582_v12 = vld [vmem:[%s5190_s3 + $0x60] sm:$0xff]  ;;  %v3659_v25 = vld [vmem:[%s5190_s3 + $0xb0] sm:$0xff] }
  0xb1   :  { %432 = vmatpush.msra.mxu3 %v3563_v9  ;;  %v3709_v36 = vld [vmem:[%s5190_s3 + $0x90] sm:$0xff] }
  0xb2   :  { %v200_v55 = vsel %vm136_vm7, %v3455_v43, %v196_v48  ;;  %1832 = vperm.xlu2 %3096, %v1814_v4   ;;  %v3741_v48 = vld [vmem:[%s5190_s3 + $0x178] sm:$0xff] }
  0xb3   :  { %v3106_v13 = vpop.eup %3105  ;;  %433 = vmatpush.msra.mxu3 %v3575_v11 }
  0xb4   :  { %v3108_v17 = vpop.eup %3107  ;;  %v186_v18 = vadd.f32 1.0, %v3106_v13  ;;  %v189_v19 = vmul.f32 -0.5, %v3106_v13  ;;  %v192_v33 = vand.u32 2147483647, %v3106_v13 }
  0xb5   :  { %v179_v20 = vmul.f32 0.6931472, %v3108_v17  ;;  %v3110_v22 = vpop.eup %3109  ;;  %v3611_v17 = vld [vmem:[%s5190_s3 + $0xd0] sm:$0xff] }
  0xb6   :  { %3111 = vlog2.f32 %v186_v18  ;;  %v190_v30 = vadd.f32 1.0, %v189_v19  ;;  %v161_v32 = vmul.f32 0.6931472, %v3110_v22  ;;  %vm193_vm4 = vcmp.lt.f32.partialorder %v192_v33, 0.0004427343  ;;  %v3618_v18 = vld [vmem:[%s5190_s3 + $0x48] sm:$0xff] }
  0xb7   :  { %v185_v27 = vsel %vm184_vm1, %v182_v23, %v179_v20  ;;  %v3623_v19 = vld [vmem:[%s5190_s3 + $0xc8] sm:$0xff]  ;;  %v3630_v20 = vld [vmem:[%s5190_s3 + $0x40] sm:$0xff]  ;;  %v3642_v22 = vld [vmem:[%s5190_s3 + $0x38] sm:$0xff] }
  0xb8   :  { %v197_v35 = vadd.f32 %v185_v27, %v133_v29  ;;  %v191_v45 = vmul.f32 %v3106_v13, %v190_v30  ;;  %v167_v46 = vsel %vm166_vm3, %v164_v37, %v161_v32  ;;  %v3587_v13 = vld [vmem:[%s5190_s3 + $0xe0] sm:$0xff]  ;;  %v3647_v23 = vld [vmem:[%s5190_s3 + $0xb8] sm:$0xff]  ;;  %v3671_v27 = vld [vmem:[%s5190_s3 + $0xa8] sm:$0xff] }
  0xb9   :  { %v195_v52 = vadd.f32 %v167_v46, %v131_v42  ;;  %434 = vmatpush.msra.mxu3 %v3587_v13  ;;  %v3678_v29 = vld [vmem:[%s5190_s3 + $0x20] sm:$0xff]  ;;  %v3690_v32 = vld [vmem:[%s5190_s3 + $0x18] sm:$0xff]  ;;  %v227_v46 = vpop.permute.xlu2 %226 }
  0xba   :  { %v201_v50 = vsel %vm137_vm5, %v3465_v53, %v197_v35  ;;  %v3683_v30 = vld [vmem:[%s5190_s3 + $0xa0] sm:$0xff]  ;;  %v3695_v33 = vld [vmem:[%s5190_s3 + $0x98] sm:$0xff]  ;;  %v3704_v35 = vld [vmem:[%s5190_s3 + $0x10] sm:$0xff] }
  0xbb   :  { %3113 = vtanh.f32 %v201_v50  ;;  %v199_v57 = vsel %vm135_vm8, %v3453_v41, %v195_v52  ;;  %435 = vmatpush.msra.mxu3 %v3599_v15  ;;  %v3729_v42 = vld [vmem:[%s5190_s3] sm:$0xff]  ;;  %v3749_v50 = vld [vmem:[%s5190_s3 + $0x170] sm:$0xff]  ;;  %v3756_v52 = vld [vmem:[%s5190_s3 + $0x168] sm:$0xff] }
  0xbc   :  { %v3112_v39 = vpop.eup %3111 }
  0xbd   :  { %v188_v44 = vmul.f32 0.6931472, %v3112_v39  ;;  %436 = vmatpush.msra.mxu3 %v3611_v17  ;;  %v3722_v39 = vld [vmem:[%s5190_s3 + $0x88] sm:$0xff] }
  0xbf   :  { %v194_v49 = vsel %vm193_vm4, %v191_v45, %v188_v44  ;;  %437 = vmatpush.msra.mxu3 %v3623_v19  ;;  %v3734_v44 = vld [vmem:[%s5190_s3 + $0x80] sm:$0xff] }
  0xc0   :  { %v198_v51 = vadd.f32 %v194_v49, %v134_v47 }
  0xc1   :  { %v3114_v58 = vpop.eup %3113  ;;  %438 = vmatpush.msra.mxu3 %v3635_v21 }
  0xc2   :  { %v202_v54 = vsel %vm138_vm6, %v3474_v62, %v198_v51  ;;  %v209_v0 = vmul.f32 %v3114_v58, %v3465_v53  ;;  %v213_v53 = vld [vmem:[%s5189_s6 + $0x10] sm:$0xff]  ;;  %v232_v58 = vpop.permute.xlu0 %231 }
  0xc3   :  { %3115 = vtanh.f32 %v202_v54  ;;  %439 = vmatpush.msra.mxu3 %v3647_v23 }
  0xc4   :  { %3117 = vtanh.f32 %v200_v55  ;;  %v3762_v55 = vld [vmem:[%s5190_s3 + $0x160] sm:$0xff] }
  0xc5   :  { %3119 = vtanh.f32 %v199_v57  ;;  %440 = vmatpush.msra.mxu3 %v3659_v25 }
  0xc7   :  { %441 = vmatpush.msra.mxu3 %v3671_v27 }
  0xc9   :  { %v3116_v59 = vpop.eup %3115  ;;  %442 = vmatpush.msra.mxu3 %v3683_v30 }
  0xca   :  { %v210_v60 = vmul.f32 %v3116_v59, %v3474_v62  ;;  %v3118_v61 = vpop.eup %3117  ;;  %v211_v62 = vld [vmem:[%s5189_s6] sm:$0xff] }
  0xcb   :  { %v3120_v1 = vpop.eup %3119  ;;  %v208_v2 = vmul.f32 %v3118_v61, %v3455_v43  ;;  %v212_v43 = vld [vmem:[%s5189_s6 + $0x8] sm:$0xff]  ;;  %443 = vmatpush.msra.mxu3 %v3695_v33 }
  0xcc   :  { %264 = vmatpush.msra.mxu2 %v210_v60  ;;  %v207_v3 = vmul.f32 %v3120_v1, %v3453_v41  ;;  %v1820_v41 = vld [vmem:[%s5186_s13 + $0x38] sm:$0xff]  ;;  %v3776_v1 = vld [vmem:[%s5190_s3 + $0x150] sm:$0xff] }
  0xcd   :  { %1862 = vperm.xlu2 %3096, %v1820_v41   ;;  %444 = vmatpush.msra.mxu3 %v3709_v36  ;;  %v3789_v41 = vld [vmem:[%s5190_s3 + $0x140] sm:$0xff] }
  0xce   :  { %265 = vmatpush.msra.mxu2 %v209_v0 }
  0xcf   :  { %445 = vmatpush.msra.mxu3 %v3722_v39 }
  0xd0   :  { %266 = vmatpush.msra.mxu2 %v208_v2 }
  0xd1   :  { %446 = vmatpush.msra.mxu3 %v3734_v44 }
  0xd2   :  { %267 = vmatpush.msra.mxu2 %v207_v3 }
  0xd3   :  { %2804 = vmatmul.msk.f32.vlgmr.msra.gmra.mxu2 %vm239_vm9, %v211_v62  ;;  %v3783_v62 = vld [vmem:[%s5190_s3 + $0x148] sm:$0xff] }
  0xd4   :  { %377 = vmatpush.msrb.mxu2 %v3546_v6 }
  0xd6   :  { %378 = vmatpush.msrb.mxu2 %v3558_v8 }
  0xd8   :  { %379 = vmatpush.msrb.mxu2 %v3570_v10 }
  0xda   :  { %380 = vmatpush.msrb.mxu2 %v3582_v12 }
  0xdb   :  { %2805 = vmatmul.msk.f32.gmra.mxu2 %vm239_vm9, %v212_v43 }
  0xdc   :  { %381 = vmatpush.msrb.mxu2 %v3594_v14 }
  0xde   :  { %382 = vmatpush.msrb.mxu2 %v3606_v16 }
  0xe0   :  { %383 = vmatpush.msrb.mxu2 %v3618_v18 }
  0xe2   :  { %384 = vmatpush.msrb.mxu2 %v3630_v20 }
  0xe3   :  { %2806 = vmatmul.msk.f32.gmra.mxu2 %vm239_vm9, %v213_v53 }
  0xe4   :  { %385 = vmatpush.msrb.mxu2 %v3642_v22 }
  0xe6   :  { %386 = vmatpush.msrb.mxu2 %v3654_v24 }
  0xe8   :  { %387 = vmatpush.msrb.mxu2 %v3666_v26 }
  0xea   :  { %388 = vmatpush.msrb.mxu2 %v3678_v29 }
  0xeb   :  { %2807 = vmatmul.msk.f32.gmra.mxu2 %vm239_vm9, %v214_v5 }
  0xec   :  { %389 = vmatpush.msrb.mxu2 %v3690_v32 }
  0xee   :  { %390 = vmatpush.msrb.mxu2 %v3704_v35 }
  0xf0   :  { %391 = vmatpush.msrb.mxu2 %v3717_v38 }
  0xf2   :  { %392 = vmatpush.msrb.mxu2 %v3729_v42 }
  0xf4   :  { %616 = vmatpush.msra.mxu2 %v3741_v48 }
  0xf6   :  { %617 = vmatpush.msra.mxu2 %v3749_v50 }
  0xf8   :  { %618 = vmatpush.msra.mxu2 %v3756_v52 }
  0xfa   :  { %619 = vmatpush.msra.mxu2 %v3762_v55 }
  0xfc   :  { %620 = vmatpush.msra.mxu2 %v3768_v63 }
  0xfe   :  { %621 = vmatpush.msra.mxu2 %v3776_v1 }
 0x100   :  { %622 = vmatpush.msra.mxu2 %v3783_v62 }
 0x102   :  { %623 = vmatpush.msra.mxu2 %v3789_v41 }
 0x156   :  { %v269_v31 = vpop.f32.mrf.mxu2 }
 0x157   :  { %v3697_v34 = vadd.f32 %v269_v31, %v222_v28  ;;  %v237_v31 = vpop.permute.xlu1 %236 }
 0x159   :  { %v293_v37 = vand.u32 2147483647, %v3697_v34  ;;  %vm285_vm11 = vcmp.ne.f32.partialorder %v3697_v34, %v3697_v34 }
 0x15b   :  { %v297_v40 = vsub.f32 0.0, %v293_v37 }
 0x15d   :  { %v301_v45 = vmul.f32 1.442695, %v297_v40 }
 0x15e   :  { %v272_v47 = vpop.f32.mrf.mxu2 }
 0x15f   :  { %3121 = vpow2.f32 %v301_v45  ;;  %v3743_v49 = vadd.f32 %v272_v47, %v227_v46  ;;  %v3795_v46 = vld [vmem:[%s5190_s3 + $0x138] sm:$0xff] }
 0x160   :  { %624 = vmatpush.msra.mxu2 %v3795_v46 }
 0x161   :  { %v294_v51 = vand.u32 2147483647, %v3743_v49  ;;  %vm286_vm13 = vcmp.ne.f32.partialorder %v3743_v49, %v3743_v49 }
 0x163   :  { %v298_v54 = vsub.f32 0.0, %v294_v51 }
 0x165   :  { %v3122_v56 = vpop.eup %3121  ;;  %v303_v57 = vmul.f32 1.442695, %v298_v54 }
 0x166   :  { %v309_v59 = vadd.f32 1.0, %v3122_v56  ;;  %v312_v60 = vmul.f32 -0.5, %v3122_v56  ;;  %v275_v61 = vpop.f32.mrf.mxu2  ;;  %v315_v43 = vand.u32 2147483647, %v3122_v56 }
 0x167   :  { %3123 = vpow2.f32 %v303_v57  ;;  %v3770_v0 = vadd.f32 %v275_v61, %v232_v58  ;;  %v281_v57 = vmax.f32 %v3697_v34, 0.0  ;;  %v3811_v61 = vld [vmem:[%s5190_s3 + $0x128] sm:$0xff] }
 0x168   :  { %3125 = vlog2.f32 %v309_v59  ;;  %v313_v3 = vadd.f32 1.0, %v312_v60  ;;  %vm316_vm10 = vcmp.lt.f32.partialorder %v315_v43, 0.0004427343 }
 0x169   :  { %v295_v2 = vand.u32 2147483647, %v3770_v0  ;;  %vm287_vm15 = vcmp.ne.f32.partialorder %v3770_v0, %v3770_v0 }
 0x16a   :  { %v314_v37 = vmul.f32 %v3122_v56, %v313_v3  ;;  %v3804_v56 = vld [vmem:[%s5190_s3 + $0x130] sm:$0xff] }
 0x16b   :  { %v299_v4 = vsub.f32 0.0, %v295_v2  ;;  %625 = vmatpush.msra.mxu2 %v3804_v56 }
 0x16d   :  { %v3124_v53 = vpop.eup %3123  ;;  %v305_v5 = vmul.f32 1.442695, %v299_v4  ;;  %626 = vmatpush.msra.mxu2 %v3811_v61 }
 0x16e   :  { %v3126_v28 = vpop.eup %3125  ;;  %v318_v40 = vadd.f32 1.0, %v3124_v53  ;;  %v278_v45 = vpop.f32.mrf.mxu2  ;;  %v321_v51 = vmul.f32 -0.5, %v3124_v53  ;;  %v324_v43 = vand.u32 2147483647, %v3124_v53 }
 0x16f   :  { %v311_v47 = vmul.f32 0.6931472, %v3126_v28  ;;  %3127 = vpow2.f32 %v305_v5  ;;  %v3797_v54 = vadd.f32 %v278_v45, %v237_v31  ;;  %v3820_v5 = vld [vmem:[%s5190_s3 + $0x120] sm:$0xff]  ;;  %v3826_v45 = vld [vmem:[%s5190_s3 + $0x118] sm:$0xff] }
 0x170   :  { %3129 = vlog2.f32 %v318_v40  ;;  %v322_v2 = vadd.f32 1.0, %v321_v51  ;;  %627 = vmatpush.msra.mxu2 %v3820_v5  ;;  %vm325_vm12 = vcmp.lt.f32.partialorder %v324_v43, 0.0004427343 }
 0x171   :  { %v317_v58 = vsel %vm316_vm10, %v314_v37, %v311_v47  ;;  %v296_v59 = vand.u32 2147483647, %v3797_v54  ;;  %v3831_v47 = vld [vmem:[%s5190_s3 + $0x110] sm:$0xff]  ;;  %vm288_vm2 = vcmp.ne.f32.partialorder %v3797_v54, %v3797_v54 }
 0x172   :  { %v345_v60 = vadd.f32 %v317_v58, %v281_v57  ;;  %5235 = vst [vmem:[#allocation2_spill] sm:$0xff] %v3831_v47  ;;  %v323_v57 = vmul.f32 %v3124_v53, %v322_v2  ;;  %628 = vmatpush.msra.mxu2 %v3826_v45  ;;  %v3844_v53 = vld [vmem:[%s5190_s3 + $0x100] sm:$0xff] }
 0x173   :  { %v300_v3 = vsub.f32 0.0, %v296_v59  ;;  %v282_v59 = vmax.f32 %v3743_v49, 0.0  ;;  %5237 = vst [vmem:[#allocation4_spill] sm:$0xff] %v3844_v53 }
 0x174   :  { %v349_v4 = vsel %vm285_vm11, %v3697_v34, %v345_v60  ;;  %v3838_v60 = vld [vmem:[%s5190_s3 + $0x108] sm:$0xff]  ;;  %629 = vmatpush.msra.mxu2 %v3831_v47 }
 0x175   :  { %v3128_v28 = vpop.eup %3127  ;;  %3131 = vtanh.f32 %v349_v4  ;;  %v307_v31 = vmul.f32 1.442695, %v300_v3  ;;  %5236 = vst [vmem:[#allocation3_spill] sm:$0xff] %v3838_v60 }
 0x176   :  { %v3130_v37 = vpop.eup %3129  ;;  %v327_v40 = vadd.f32 1.0, %v3128_v28  ;;  %v330_v58 = vmul.f32 -0.5, %v3128_v28  ;;  %630 = vmatpush.msra.mxu2 %v3838_v60 }
 0x177   :  { %v320_v51 = vmul.f32 0.6931472, %v3130_v37  ;;  %3133 = vpow2.f32 %v307_v31 }
 0x178   :  { %3135 = vlog2.f32 %v327_v40  ;;  %v331_v43 = vadd.f32 1.0, %v330_v58  ;;  %v333_v40 = vand.u32 2147483647, %v3128_v28  ;;  %631 = vmatpush.msra.mxu2 %v3844_v53  ;;  %v3859_v58 = vld [vmem:[%s5190_s3 + $0x1f8] sm:$0xff]  ;;  %v3871_v53 = vld [vmem:[%s5190_s3 + $0x1e8] sm:$0xff] }
 0x179   :  { %v326_v3 = vsel %vm325_vm12, %v323_v57, %v320_v51  ;;  %5238 = vst [vmem:[#allocation5_spill] sm:$0xff] %v3871_v53 }
 0x17a   :  { %v346_v4 = vadd.f32 %v326_v3, %v282_v59  ;;  %vm334_vm14 = vcmp.lt.f32.partialorder %v333_v40, 0.0004427343 }
 0x17b   :  { %v3132_v2 = vpop.eup %3131 }
 0x17c   :  { %v3850_v31 = vmul.f32 %v3132_v2, %v3697_v34  ;;  %v350_v37 = vsel %vm286_vm13, %v3743_v49, %v346_v4  ;;  %v3864_v34 = vld [vmem:[%s5190_s3 + $0x1f0] sm:$0xff]  ;;  %v332_v4 = vmul.f32 %v3128_v28, %v331_v43  ;;  %v3877_v28 = vld [vmem:[%s5190_s3 + $0x1e0] sm:$0xff] }
 0x17d   :  { %v3134_v51 = vpop.eup %3133  ;;  %3137 = vtanh.f32 %v350_v37  ;;  %v283_v37 = vmax.f32 %v3770_v0, 0.0  ;;  %5239 = vst [vmem:[#allocation6_spill] sm:$0xff] %v3877_v28 }
 0x17e   :  { %v3136_v57 = vpop.eup %3135  ;;  %v336_v59 = vadd.f32 1.0, %v3134_v51  ;;  %393 = vmatmul.f32.vlgmr.msrb.gmra.mxu2 %v3850_v31  ;;  %447 = vmatmul.f32.vlgmr.msra.gmra.mxu3 %v3850_v31  ;;  %v339_v2 = vmul.f32 -0.5, %v3134_v51 }
 0x17f   :  { %v329_v3 = vmul.f32 0.6931472, %v3136_v57  ;;  %744 = vmatpush.msrb.mxu2 %v3859_v58 }
 0x180   :  { %3139 = vlog2.f32 %v336_v59  ;;  %v340_v40 = vadd.f32 1.0, %v339_v2 }
 0x181   :  { %v335_v60 = vsel %vm334_vm14, %v332_v4, %v329_v3  ;;  %745 = vmatpush.msrb.mxu2 %v3864_v34  ;;  %v342_v3 = vand.u32 2147483647, %v3134_v51  ;;  %v3892_v4 = vld [vmem:[%s5190_s3 + $0x1d8] sm:$0xff] }
 0x182   :  { %v347_v47 = vadd.f32 %v335_v60, %v283_v37  ;;  %v341_v2 = vmul.f32 %v3134_v51, %v340_v40  ;;  %v284_v37 = vmax.f32 %v3797_v54, 0.0 }
 0x183   :  { %v3138_v43 = vpop.eup %3137  ;;  %746 = vmatpush.msrb.mxu2 %v3871_v53  ;;  %vm343_vm1 = vcmp.lt.f32.partialorder %v342_v3, 0.0004427343  ;;  %v3910_v53 = vld [vmem:[%s5190_s3 + $0x1c0] sm:$0xff] }
 0x184   :  { %v3883_v57 = vmul.f32 %v3138_v43, %v3743_v49  ;;  %v351_v59 = vsel %vm287_vm15, %v3770_v0, %v347_v47  ;;  %v3897_v49 = vld [vmem:[%s5190_s3 + $0x1d0] sm:$0xff]  ;;  %v3904_v43 = vld [vmem:[%s5190_s3 + $0x1c8] sm:$0xff]  ;;  %5240 = vst [vmem:[#allocation7_spill] sm:$0xff] %v3910_v53 }
 0x185   :  { %3141 = vtanh.f32 %v351_v59  ;;  %747 = vmatpush.msrb.mxu2 %v3877_v28 }
 0x186   :  { %v3140_v60 = vpop.eup %3139  ;;  %396 = vmatmul.f32.gmra.mxu2 %v3883_v57  ;;  %450 = vmatmul.f32.gmra.mxu3 %v3883_v57 }
 0x187   :  { %v338_v47 = vmul.f32 0.6931472, %v3140_v60  ;;  %748 = vmatpush.msrb.mxu2 %v3892_v4  ;;  %v3925_v60 = vld [vmem:[%s5190_s3 + $0x1b8] sm:$0xff] }
 0x188   :  { %5241 = vst [vmem:[#allocation8_spill] sm:$0xff] %v3925_v60 }
 0x189   :  { %v344_v59 = vsel %vm343_vm1, %v341_v2, %v338_v47  ;;  %749 = vmatpush.msrb.mxu2 %v3897_v49  ;;  %v3930_v47 = vld [vmem:[%s5190_s3 + $0x1b0] sm:$0xff] }
 0x18a   :  { %v348_v28 = vadd.f32 %v344_v59, %v284_v37  ;;  %5242 = vst [vmem:[#allocation9_spill] sm:$0xff] %v3930_v47  ;;  %v3954_v59 = vld [vmem:[%s5190_s3 + $0x198] sm:$0xff] }
 0x18b   :  { %v3142_v51 = vpop.eup %3141  ;;  %750 = vmatpush.msrb.mxu2 %v3904_v43  ;;  %5245 = vst [vmem:[#allocation12_spill] sm:$0xff] %v3954_v59 }
 0x18c   :  { %v3916_v40 = vmul.f32 %v3142_v51, %v3770_v0  ;;  %v352_v3 = vsel %vm288_vm2, %v3797_v54, %v348_v28  ;;  %v3936_v0 = vld [vmem:[%s5190_s3 + $0x1a8] sm:$0xff]  ;;  %v3942_v28 = vld [vmem:[%s5190_s3 + $0x1a0] sm:$0xff]  ;;  %v3959_v51 = vld [vmem:[%s5190_s3 + $0x190] sm:$0xff] }
 0x18d   :  { %3143 = vtanh.f32 %v352_v3  ;;  %751 = vmatpush.msrb.mxu2 %v3910_v53  ;;  %5243 = vst [vmem:[#allocation10_spill] sm:$0xff] %v3936_v0  ;;  %v3971_v3 = vld [vmem:[%s5190_s3 + $0x180] sm:$0xff] }
 0x18e   :  { %399 = vmatmul.f32.gmra.mxu2 %v3916_v40  ;;  %453 = vmatmul.f32.gmra.mxu3 %v3916_v40  ;;  %5244 = vst [vmem:[#allocation11_spill] sm:$0xff] %v3942_v28  ;;  %v406_v53 = vld [vmem:[%s5191_s8] sm:$0xff] }
 0x18f   :  { %752 = vmatpush.msrb.mxu2 %v3925_v60  ;;  %5246 = vst [vmem:[#allocation13_spill] sm:$0xff] %v3959_v51  ;;  %v2824_v60 = vld [vmem:[%s5191_s8 + $0x40] sm:$0xff] }
 0x190   :  { %5248 = vst [vmem:[#allocation15_spill] sm:$0xff] %v3971_v3 }
 0x191   :  { %753 = vmatpush.msrb.mxu2 %v3930_v47 }
 0x193   :  { %v3144_v2 = vpop.eup %3143  ;;  %754 = vmatpush.msrb.mxu2 %v3936_v0 }
 0x194   :  { %v3946_v37 = vmul.f32 %v3144_v2, %v3797_v54  ;;  %v3965_v54 = vld [vmem:[%s5190_s3 + $0x188] sm:$0xff] }
 0x195   :  { %755 = vmatpush.msrb.mxu2 %v3942_v28  ;;  %5247 = vst [vmem:[#allocation14_spill] sm:$0xff] %v3965_v54 }
 0x196   :  { %402 = vmatmul.f32.gmra.mxu2 %v3946_v37  ;;  %456 = vmatmul.f32.gmra.mxu3 %v3946_v37 }
 0x197   :  { %756 = vmatpush.msrb.mxu2 %v3954_v59 }
 0x199   :  { %757 = vmatpush.msrb.mxu2 %v3959_v51 }
 0x19b   :  { %758 = vmatpush.msrb.mxu2 %v3965_v54 }
 0x19d   :  { %759 = vmatpush.msrb.mxu2 %v3971_v3 }
 0x19e   :  { %632 = vmatmul.f32.vlgmr.msra.gmra.mxu2 %v3850_v31 }
 0x1a6   :  { %635 = vmatmul.f32.gmra.mxu2 %v3883_v57 }
 0x1ae   :  { %638 = vmatmul.f32.gmra.mxu2 %v3916_v40 }
 0x1b6   :  { %641 = vmatmul.f32.gmra.mxu2 %v3946_v37 }
 0x1be   :  { %760 = vmatmul.f32.vlgmr.msrb.gmra.mxu2 %v3850_v31 }
 0x1c6   :  { %763 = vmatmul.f32.gmra.mxu2 %v3883_v57 }
 0x1ce   :  { %766 = vmatmul.f32.gmra.mxu2 %v3916_v40 }
 0x1d6   :  { %769 = vmatmul.f32.gmra.mxu2 %v3946_v37 }
 0x201   :  { %v394_v2 = vpop.f32.mrf.mxu2  ;;  %v448_v54 = vpop.f32.mrf.mxu3 }
 0x209   :  { %v397_v51 = vpop.f32.mrf.mxu2  ;;  %v451_v3 = vpop.f32.mrf.mxu3 }
 0x211   :  { %v400_v59 = vpop.f32.mrf.mxu2  ;;  %v454_v28 = vpop.f32.mrf.mxu3 }
 0x219   :  { %v403_v0 = vpop.f32.mrf.mxu2  ;;  %v457_v47 = vpop.f32.mrf.mxu3 }
 0x21a   :  { %505 = vmatpush.msrb.mxu0 %v457_v47  ;;  %570 = vmatpush.msra.mxu1 %v403_v0  ;;  %v3994_v0 = vld [vmem:[%s5190_s3 + $0x278] sm:$0xff] }
 0x21b   :  { %5249 = vst [vmem:[#allocation16_spill] sm:$0xff] %v3994_v0 }
 0x21c   :  { %506 = vmatpush.msrb.mxu0 %v454_v28  ;;  %571 = vmatpush.msra.mxu1 %v400_v59  ;;  %v3999_v28 = vld [vmem:[%s5190_s3 + $0x270] sm:$0xff]  ;;  %v4005_v59 = vld [vmem:[%s5190_s3 + $0x268] sm:$0xff] }
 0x21d   :  { %5250 = vst [vmem:[#allocation17_spill] sm:$0xff] %v3999_v28 }
 0x21e   :  { %507 = vmatpush.msrb.mxu0 %v451_v3  ;;  %572 = vmatpush.msra.mxu1 %v397_v51  ;;  %5251 = vst [vmem:[#allocation18_spill] sm:$0xff] %v4005_v59  ;;  %v4018_v51 = vld [vmem:[%s5190_s3 + $0x260] sm:$0xff]  ;;  %v4026_v3 = vld [vmem:[%s5190_s3 + $0x258] sm:$0xff] }
 0x21f   :  { %5252 = vst [vmem:[#allocation19_spill] sm:$0xff] %v4018_v51 }
 0x220   :  { %508 = vmatpush.msrb.mxu0 %v448_v54  ;;  %573 = vmatpush.msra.mxu1 %v394_v2  ;;  %5253 = vst [vmem:[#allocation20_spill] sm:$0xff] %v4026_v3  ;;  %v4031_v2 = vld [vmem:[%s5190_s3 + $0x250] sm:$0xff] }
 0x221   :  { %2832 = vmatmul.msk.f32.vlgmr.msrb.gmra.mxu0 %vm239_vm9, %v2824_v60  ;;  %2840 = vmatmul.msk.f32.vlgmr.msra.gmra.mxu1 %vm239_vm9, %v406_v53  ;;  %v633_v47 = vpop.f32.mrf.mxu2  ;;  %v2825_v53 = vld [vmem:[%s5191_s8 + $0x48] sm:$0xff]  ;;  %5254 = vst [vmem:[#allocation21_spill] sm:$0xff] %v4031_v2 }
 0x222   :  { %872 = vmatpush.msrb.mxu1 %v3994_v0  ;;  %v407_v60 = vld [vmem:[%s5191_s8 + $0x8] sm:$0xff]  ;;  %v4090_v0 = vld [vmem:[%s5190_s3 + $0x218] sm:$0xff] }
 0x224   :  { %873 = vmatpush.msrb.mxu1 %v3999_v28  ;;  %v4058_v28 = vld [vmem:[%s5190_s3 + $0x238] sm:$0xff] }
 0x225   :  { %5257 = vst [vmem:[#allocation24_spill] sm:$0xff] %v4058_v28 }
 0x226   :  { %874 = vmatpush.msrb.mxu1 %v4005_v59  ;;  %v4049_v59 = vld [vmem:[%s5190_s3 + $0x240] sm:$0xff] }
 0x227   :  { %5256 = vst [vmem:[#allocation23_spill] sm:$0xff] %v4049_v59 }
 0x228   :  { %875 = vmatpush.msrb.mxu1 %v4018_v51  ;;  %v408_v51 = vld [vmem:[%s5191_s8 + $0x10] sm:$0xff] }
 0x229   :  { %2833 = vmatmul.msk.f32.gmra.mxu0 %vm239_vm9, %v2825_v53  ;;  %2841 = vmatmul.msk.f32.gmra.mxu1 %vm239_vm9, %v407_v60  ;;  %v636_v54 = vpop.f32.mrf.mxu2  ;;  %v4037_v53 = vld [vmem:[%s5190_s3 + $0x248] sm:$0xff]  ;;  %v2826_v60 = vld [vmem:[%s5191_s8 + $0x50] sm:$0xff] }
 0x22a   :  { %876 = vmatpush.msrb.mxu1 %v4026_v3  ;;  %5255 = vst [vmem:[#allocation22_spill] sm:$0xff] %v4037_v53 }
 0x22c   :  { %877 = vmatpush.msrb.mxu1 %v4031_v2  ;;  %v4063_v2 = vld [vmem:[%s5190_s3 + $0x230] sm:$0xff] }
 0x22e   :  { %878 = vmatpush.msrb.mxu1 %v4037_v53  ;;  %v4081_v53 = vld [vmem:[%s5190_s3 + $0x220] sm:$0xff] }
 0x230   :  { %879 = vmatpush.msrb.mxu1 %v4049_v59  ;;  %v409_v59 = vld [vmem:[%s5191_s8 + $0x18] sm:$0xff] }
 0x231   :  { %2834 = vmatmul.msk.f32.gmra.mxu0 %vm239_vm9, %v2826_v60  ;;  %2842 = vmatmul.msk.f32.gmra.mxu1 %vm239_vm9, %v408_v51  ;;  %v639_v3 = vpop.f32.mrf.mxu2  ;;  %v4069_v60 = vld [vmem:[%s5190_s3 + $0x228] sm:$0xff]  ;;  %v2827_v51 = vld [vmem:[%s5191_s8 + $0x58] sm:$0xff] }
 0x232   :  { %880 = vmatpush.msrb.mxu1 %v4058_v28  ;;  %5258 = vst [vmem:[#allocation25_spill] sm:$0xff] %v4069_v60 }
 0x234   :  { %881 = vmatpush.msrb.mxu1 %v4063_v2 }
 0x236   :  { %882 = vmatpush.msrb.mxu1 %v4069_v60  ;;  %v4096_v60 = vld [vmem:[%s5190_s3 + $0x210] sm:$0xff] }
 0x237   :  { %5259 = vst [vmem:[#allocation26_spill] sm:$0xff] %v4096_v60 }
 0x238   :  { %883 = vmatpush.msrb.mxu1 %v4081_v53 }
 0x239   :  { %2835 = vmatmul.msk.f32.gmra.mxu0 %vm239_vm9, %v2827_v51  ;;  %2843 = vmatmul.msk.f32.gmra.mxu1 %vm239_vm9, %v409_v59  ;;  %v642_v28 = vpop.f32.mrf.mxu2  ;;  %v410_v59 = vld [vmem:[%s5191_s8 + $0x20] sm:$0xff] }
 0x23a   :  { %690 = vmatpush.msrb.mxu3 %v642_v28  ;;  %884 = vmatpush.msrb.mxu1 %v4090_v0  ;;  %v2828_v28 = vld [vmem:[%s5191_s8 + $0x60] sm:$0xff] }
 0x23b   :  { %v2864_v51 = vld [vmem:[%s5191_s8 + $0x80] sm:$0xff] }
 0x23c   :  { %691 = vmatpush.msrb.mxu3 %v639_v3  ;;  %885 = vmatpush.msrb.mxu1 %v4096_v60  ;;  %v4108_v3 = vld [vmem:[%s5190_s3 + $0x208] sm:$0xff] }
 0x23e   :  { %692 = vmatpush.msrb.mxu3 %v636_v54  ;;  %886 = vmatpush.msrb.mxu1 %v4108_v3  ;;  %v4117_v54 = vld [vmem:[%s5190_s3 + $0x200] sm:$0xff] }
 0x240   :  { %693 = vmatpush.msrb.mxu3 %v633_v47  ;;  %887 = vmatpush.msrb.mxu1 %v4117_v54  ;;  %v2829_v47 = vld [vmem:[%s5191_s8 + $0x68] sm:$0xff] }
 0x241   :  { %2836 = vmatmul.msk.f32.gmra.mxu0 %vm239_vm9, %v2828_v28  ;;  %2844 = vmatmul.msk.f32.gmra.mxu1 %vm239_vm9, %v410_v59  ;;  %v761_v60 = vpop.f32.mrf.mxu2  ;;  %v411_v28 = vld [vmem:[%s5191_s8 + $0x28] sm:$0xff] }
 0x242   :  { %2872 = vmatmul.msk.f32.vlgmr.msrb.gmra.mxu3 %vm239_vm9, %v2864_v51  ;;  %1160 = vmatpush.msra.mxu1 %v3551_v7  ;;  %v2865_v59 = vld [vmem:[%s5191_s8 + $0x88] sm:$0xff]  ;;  %v2830_v7 = vld [vmem:[%s5191_s8 + $0x70] sm:$0xff]  ;;  %v2935_v51 = vld [vmem:[%s5191_s8 + $0x138] sm:$0xff] }
 0x243   :  { %1123 = vmatpush.msra.mxu3 %v3546_v6 }
 0x244   :  { %1161 = vmatpush.msra.mxu1 %v3563_v9  ;;  %v2866_v9 = vld [vmem:[%s5191_s8 + $0x90] sm:$0xff] }
 0x245   :  { %1124 = vmatpush.msra.mxu3 %v3558_v8  ;;  %v412_v8 = vld [vmem:[%s5191_s8 + $0x30] sm:$0xff] }
 0x246   :  { %1162 = vmatpush.msra.mxu1 %v3575_v11  ;;  %v2831_v11 = vld [vmem:[%s5191_s8 + $0x78] sm:$0xff] }
 0x247   :  { %1125 = vmatpush.msra.mxu3 %v3570_v10 }
 0x248   :  { %1163 = vmatpush.msra.mxu1 %v3587_v13  ;;  %v2867_v13 = vld [vmem:[%s5191_s8 + $0x98] sm:$0xff] }
 0x249   :  { %2837 = vmatmul.msk.f32.gmra.mxu0 %vm239_vm9, %v2829_v47  ;;  %2845 = vmatmul.msk.f32.gmra.mxu1 %vm239_vm9, %v411_v28  ;;  %v764_v6 = vpop.f32.mrf.mxu2 }
 0x24a   :  { %2873 = vmatmul.msk.f32.gmra.mxu3 %vm239_vm9, %v2865_v59  ;;  %1164 = vmatpush.msra.mxu1 %v3599_v15  ;;  %v2896_v15 = vld [vmem:[%s5191_s8 + $0xc0] sm:$0xff] }
 0x24b   :  { %1126 = vmatpush.msra.mxu3 %v3582_v12  ;;  %v413_v12 = vld [vmem:[%s5191_s8 + $0x38] sm:$0xff] }
 0x24c   :  { %1165 = vmatpush.msra.mxu1 %v3611_v17  ;;  %v2897_v17 = vld [vmem:[%s5191_s8 + $0xc8] sm:$0xff] }
 0x24d   :  { %1127 = vmatpush.msra.mxu3 %v3594_v14 }
 0x24e   :  { %1166 = vmatpush.msra.mxu1 %v3623_v19  ;;  %v2898_v19 = vld [vmem:[%s5191_s8 + $0xd0] sm:$0xff] }
 0x24f   :  { %1128 = vmatpush.msra.mxu3 %v3606_v16  ;;  %v2868_v16 = vld [vmem:[%s5191_s8 + $0xa0] sm:$0xff] }
 0x250   :  { %1167 = vmatpush.msra.mxu1 %v3635_v21  ;;  %v2899_v21 = vld [vmem:[%s5191_s8 + $0xd8] sm:$0xff] }
 0x251   :  { %2838 = vmatmul.msk.f32.gmra.mxu0 %vm239_vm9, %v2830_v7  ;;  %2846 = vmatmul.msk.f32.gmra.mxu1 %vm239_vm9, %v412_v8  ;;  %v767_v10 = vpop.f32.mrf.mxu2 }
 0x252   :  { %2874 = vmatmul.msk.f32.gmra.mxu3 %vm239_vm9, %v2866_v9  ;;  %1168 = vmatpush.msra.mxu1 %v3647_v23  ;;  %v2900_v23 = vld [vmem:[%s5191_s8 + $0xe0] sm:$0xff] }
 0x253   :  { %1129 = vmatpush.msra.mxu3 %v3618_v18  ;;  %v2869_v18 = vld [vmem:[%s5191_s8 + $0xa8] sm:$0xff] }
 0x254   :  { %1169 = vmatpush.msra.mxu1 %v3659_v25  ;;  %v5261_v25 = vld [vmem:[#allocation3_spill] sm:$0xff] }
 0x255   :  { %1130 = vmatpush.msra.mxu3 %v3630_v20  ;;  %v2870_v20 = vld [vmem:[%s5191_s8 + $0xb0] sm:$0xff] }
 0x256   :  { %1170 = vmatpush.msra.mxu1 %v3671_v27  ;;  %v2901_v27 = vld [vmem:[%s5191_s8 + $0xe8] sm:$0xff] }
 0x257   :  { %1131 = vmatpush.msra.mxu3 %v3642_v22  ;;  %v2871_v22 = vld [vmem:[%s5191_s8 + $0xb8] sm:$0xff] }
 0x258   :  { %1171 = vmatpush.msra.mxu1 %v3683_v30  ;;  %v2903_v30 = vld [vmem:[%s5191_s8 + $0xf8] sm:$0xff] }
 0x259   :  { %2839 = vmatmul.msk.f32.gmra.mxu0 %vm239_vm9, %v2831_v11  ;;  %2847 = vmatmul.msk.f32.gmra.mxu1 %vm239_vm9, %v413_v12  ;;  %v770_v14 = vpop.f32.mrf.mxu2 }
 0x25a   :  { %2875 = vmatmul.msk.f32.gmra.mxu3 %vm239_vm9, %v2867_v13  ;;  %818 = vmatpush.msra.mxu0 %v770_v14 }
 0x25b   :  { %1132 = vmatpush.msra.mxu3 %v3654_v24  ;;  %1172 = vmatpush.msra.mxu1 %v3695_v33  ;;  %v5260_v24 = vld [vmem:[#allocation2_spill] sm:$0xff] }
 0x25c   :  { %819 = vmatpush.msra.mxu0 %v767_v10 }
 0x25d   :  { %1133 = vmatpush.msra.mxu3 %v3666_v26  ;;  %1173 = vmatpush.msra.mxu1 %v3709_v36  ;;  %v5262_v26 = vld [vmem:[#allocation4_spill] sm:$0xff] }
 0x25e   :  { %820 = vmatpush.msra.mxu0 %v764_v6 }
 0x25f   :  { %1134 = vmatpush.msra.mxu3 %v3678_v29  ;;  %1174 = vmatpush.msra.mxu1 %v3722_v39  ;;  %v2902_v29 = vld [vmem:[%s5191_s8 + $0xf0] sm:$0xff] }
 0x260   :  { %821 = vmatpush.msra.mxu0 %v761_v60 }
 0x261   :  { %2904 = vmatmul.msk.f32.vlgmr.msra.gmra.mxu0 %vm239_vm9, %v2896_v15  ;;  %888 = vmatmul.f32.vlgmr.msrb.gmra.mxu1 %v3850_v31 }
 0x262   :  { %2876 = vmatmul.msk.f32.gmra.mxu3 %vm239_vm9, %v2868_v16  ;;  %1175 = vmatpush.msra.mxu1 %v3734_v44 }
 0x263   :  { %1135 = vmatpush.msra.mxu3 %v3690_v32 }
 0x264   :  { %1328 = vmatpush.msrb.mxu1 %v3741_v48 }
 0x265   :  { %1136 = vmatpush.msra.mxu3 %v3704_v35 }
 0x266   :  { %1329 = vmatpush.msrb.mxu1 %v3749_v50 }
 0x267   :  { %1137 = vmatpush.msra.mxu3 %v3717_v38 }
 0x268   :  { %1330 = vmatpush.msrb.mxu1 %v3756_v52 }
 0x269   :  { %2905 = vmatmul.msk.f32.gmra.mxu0 %vm239_vm9, %v2897_v17  ;;  %891 = vmatmul.f32.gmra.mxu1 %v3883_v57 }
 0x26a   :  { %2877 = vmatmul.msk.f32.gmra.mxu3 %vm239_vm9, %v2869_v18  ;;  %1331 = vmatpush.msrb.mxu1 %v3762_v55 }
 0x26b   :  { %1138 = vmatpush.msra.mxu3 %v3729_v42 }
 0x26c   :  { %1332 = vmatpush.msrb.mxu1 %v3768_v63  ;;  %v2928_v63 = vld [vmem:[%s5191_s8 + $0x100] sm:$0xff] }
 0x26e   :  { %1333 = vmatpush.msrb.mxu1 %v3776_v1  ;;  %v2929_v1 = vld [vmem:[%s5191_s8 + $0x108] sm:$0xff] }
 0x270   :  { %1334 = vmatpush.msrb.mxu1 %v3783_v62  ;;  %v2930_v62 = vld [vmem:[%s5191_s8 + $0x110] sm:$0xff] }
 0x271   :  { %2906 = vmatmul.msk.f32.gmra.mxu0 %vm239_vm9, %v2898_v19  ;;  %894 = vmatmul.f32.gmra.mxu1 %v3916_v40 }
 0x272   :  { %2878 = vmatmul.msk.f32.gmra.mxu3 %vm239_vm9, %v2870_v20  ;;  %1335 = vmatpush.msrb.mxu1 %v3789_v41  ;;  %v2931_v41 = vld [vmem:[%s5191_s8 + $0x118] sm:$0xff] }
 0x274   :  { %1336 = vmatpush.msrb.mxu1 %v3795_v46  ;;  %v2932_v46 = vld [vmem:[%s5191_s8 + $0x120] sm:$0xff] }
 0x276   :  { %1337 = vmatpush.msrb.mxu1 %v3804_v56 }
 0x278   :  { %1338 = vmatpush.msrb.mxu1 %v3811_v61  ;;  %v2933_v61 = vld [vmem:[%s5191_s8 + $0x128] sm:$0xff] }
 0x279   :  { %2907 = vmatmul.msk.f32.gmra.mxu0 %vm239_vm9, %v2899_v21  ;;  %897 = vmatmul.f32.gmra.mxu1 %v3946_v37 }
 0x27a   :  { %2879 = vmatmul.msk.f32.gmra.mxu3 %vm239_vm9, %v2871_v22  ;;  %1339 = vmatpush.msrb.mxu1 %v3820_v5 }
 0x27c   :  { %1340 = vmatpush.msrb.mxu1 %v3826_v45  ;;  %v2934_v45 = vld [vmem:[%s5191_s8 + $0x130] sm:$0xff] }
 0x27e   :  { %1341 = vmatpush.msrb.mxu1 %v5260_v24 }
 0x280   :  { %1342 = vmatpush.msrb.mxu1 %v5261_v25 }
 0x281   :  { %2908 = vmatmul.msk.f32.gmra.mxu0 %vm239_vm9, %v2900_v23 }
 0x282   :  { %1343 = vmatpush.msrb.mxu1 %v5262_v26 }
 0x289   :  { %2909 = vmatmul.msk.f32.gmra.mxu0 %vm239_vm9, %v2901_v27 }
 0x291   :  { %2910 = vmatmul.msk.f32.gmra.mxu0 %vm239_vm9, %v2902_v29 }
 0x299   :  { %2911 = vmatmul.msk.f32.gmra.mxu0 %vm239_vm9, %v2903_v30  ;;  %v1014_v30 = vpop.permute.xlu2 %1013 }
 0x29e   :  { %v4259_v32 = vpop.f32.mrf.mxu1  ;;  %v4291_v56 = vpop.f32.mrf.mxu0 }
 0x2a6   :  { %v4261_v33 = vpop.f32.mrf.mxu1  ;;  %v4297_v5 = vpop.f32.mrf.mxu0 }
 0x2ae   :  { %v4263_v35 = vpop.f32.mrf.mxu1  ;;  %v4303_v60 = vpop.f32.mrf.mxu0 }
 0x2b6   :  { %v4265_v36 = vpop.f32.mrf.mxu1  ;;  %v4309_v47 = vpop.f32.mrf.mxu0 }
 0x2be   :  { %v587_v38 = vpop.f32.mrf.mxu1  ;;  %v522_v28 = vpop.f32.mrf.mxu0 }
 0x2bf   :  { %v588_v22 = vadd.f32 %v587_v38, %v522_v28 }
 0x2c5   :  { %v695_v8 = vpop.f32.mrf.mxu3 }
 0x2c6   :  { %v590_v39 = vpop.f32.mrf.mxu1  ;;  %v525_v59 = vpop.f32.mrf.mxu0 }
 0x2cd   :  { %v4313_v10 = vpop.f32.mrf.mxu3 }
 0x2ce   :  { %v4267_v42 = vpop.f32.mrf.mxu1  ;;  %v528_v6 = vpop.f32.mrf.mxu0 }
 0x2cf   :  { %v594_v38 = vadd.f32 %v4267_v42, %v528_v6  ;;  %v576_v6 = vadd.f32 %v4259_v32, %v4291_v56 }
 0x2d5   :  { %v4317_v12 = vpop.f32.mrf.mxu3 }
 0x2d6   :  { %v4269_v44 = vpop.f32.mrf.mxu1  ;;  %v531_v7 = vpop.f32.mrf.mxu0 }
 0x2dd   :  { %v4325_v16 = vpop.f32.mrf.mxu3 }
 0x2de   :  { %v889_v48 = vpop.f32.mrf.mxu1  ;;  %v4311_v9 = vpop.f32.mrf.mxu0 }
 0x2e5   :  { %v707_v19 = vpop.f32.mrf.mxu3 }
 0x2e6   :  { %v892_v50 = vpop.f32.mrf.mxu1  ;;  %v4315_v11 = vpop.f32.mrf.mxu0  ;;  %v723_v23 = vadd.f32 %v707_v19, %v588_v22 }
 0x2ed   :  { %v710_v24 = vpop.f32.mrf.mxu3 }
 0x2ee   :  { %v895_v52 = vpop.f32.mrf.mxu1  ;;  %v4321_v14 = vpop.f32.mrf.mxu0 }
 0x2f6   :  { %v898_v55 = vpop.f32.mrf.mxu1  ;;  %v4327_v17 = vpop.f32.mrf.mxu0 }
 0x2f7   :  { %946 = vmatpush.msra.mxu2 %v898_v55 }
 0x2f9   :  { %947 = vmatpush.msra.mxu2 %v895_v52 }
 0x2fb   :  { %948 = vmatpush.msra.mxu2 %v892_v50 }
 0x2fd   :  { %949 = vmatpush.msra.mxu2 %v889_v48  ;;  %v591_v48 = vadd.f32 %v590_v39, %v525_v59 }
 0x2fe   :  { %2936 = vmatmul.msk.f32.vlgmr.msra.gmra.mxu2 %vm239_vm9, %v2928_v63  ;;  %v835_v20 = vpop.f32.mrf.mxu0 }
 0x2ff   :  { %v851_v25 = vadd.f32 %v835_v20, %v723_v23  ;;  %v724_v52 = vadd.f32 %v710_v24, %v591_v48  ;;  %v1024_v23 = vpop.permute.xlu1 %1023 }
 0x306   :  { %2937 = vmatmul.msk.f32.gmra.mxu2 %vm239_vm9, %v2929_v1  ;;  %v838_v26 = vpop.f32.mrf.mxu0  ;;  %v713_v1 = vpop.f32.mrf.mxu3 }
 0x307   :  { %v852_v63 = vadd.f32 %v838_v26, %v724_v52  ;;  %v725_v28 = vadd.f32 %v713_v1, %v594_v38 }
 0x30e   :  { %2938 = vmatmul.msk.f32.gmra.mxu2 %vm239_vm9, %v2930_v62  ;;  %v716_v24 = vpop.f32.mrf.mxu3 }
 0x316   :  { %2939 = vmatmul.msk.f32.gmra.mxu2 %vm239_vm9, %v2931_v41 }
 0x31e   :  { %2940 = vmatmul.msk.f32.gmra.mxu2 %vm239_vm9, %v2932_v46  ;;  %v1019_v46 = vpop.permute.xlu0 %1018 }
 0x326   :  { %2941 = vmatmul.msk.f32.gmra.mxu2 %vm239_vm9, %v2933_v61  ;;  %v841_v61 = vpop.f32.mrf.mxu0 }
 0x327   :  { %v853_v22 = vadd.f32 %v841_v61, %v725_v28 }
 0x32e   :  { %2942 = vmatmul.msk.f32.gmra.mxu2 %vm239_vm9, %v2934_v45 }
 0x336   :  { %2943 = vmatmul.msk.f32.gmra.mxu2 %vm239_vm9, %v2935_v51 }
 0x381   :  { %v4319_v13 = vpop.f32.mrf.mxu2 }
 0x389   :  { %v4323_v15 = vpop.f32.mrf.mxu2 }
 0x391   :  { %v4329_v18 = vpop.f32.mrf.mxu2 }
 0x399   :  { %v4331_v21 = vpop.f32.mrf.mxu2 }
 0x3a1   :  { %v963_v27 = vpop.f32.mrf.mxu2 }
 0x3a2   :  { %v979_v29 = vadd.f32 %v963_v27, %v851_v25  ;;  %v597_v25 = vadd.f32 %v4269_v44, %v531_v7  ;;  %v844_v27 = vpop.f32.mrf.mxu0 }
 0x3a4   :  { %v1035_v50 = vadd.f32 %v1014_v30, %v979_v29  ;;  %v726_v30 = vadd.f32 %v716_v24, %v597_v25 }
 0x3a6   :  { %v2944_v55 = vmul.f32 -1.442695, %v1035_v50  ;;  %v854_v52 = vadd.f32 %v844_v27, %v726_v30 }
 0x3a8   :  { %3145 = vpow2.f32 %v2944_v55 }
 0x3a9   :  { %v966_v62 = vpop.f32.mrf.mxu2 }
 0x3aa   :  { %v980_v41 = vadd.f32 %v966_v62, %v852_v63  ;;  %v719_v63 = vadd.f32 %v695_v8, %v576_v6  ;;  %v579_v8 = vadd.f32 %v4261_v33, %v4297_v5 }
 0x3ac   :  { %v1036_v45 = vadd.f32 %v1019_v46, %v980_v41  ;;  %v1029_v46 = vpop.permute.xlu2 %1028  ;;  %v847_v44 = vadd.f32 %v4311_v9, %v719_v63  ;;  %v720_v24 = vadd.f32 %v4313_v10, %v579_v8  ;;  %v582_v10 = vadd.f32 %v4263_v35, %v4303_v60 }
 0x3ae   :  { %v3146_v51 = vpop.eup %3145  ;;  %v2945_v19 = vmul.f32 -1.442695, %v1036_v45  ;;  %v975_v45 = vadd.f32 %v4319_v13, %v847_v44 }
 0x3af   :  { %v1051_v20 = vadd.f32 1.0, %v3146_v51 }
 0x3b0   :  { %3147 = vpow2.f32 %v2945_v19 }
 0x3b1   :  { %3149 = vrcp.f32 %v1051_v20  ;;  %v969_v39 = vpop.f32.mrf.mxu2  ;;  %v1066_v61 = vand.u32 2147483648, %v1051_v20  ;;  %v1064_v51 = vand.u32 2147483647, %v1051_v20  ;;  %vm1060_vm4 = vweird.f32 %v1051_v20 }
 0x3b2   :  { %v981_v59 = vadd.f32 %v969_v39, %v853_v22  ;;  %v994_v39 = vpop.permute.xlu0 %993 }
 0x3b3   :  { %v1031_v13 = vadd.f32 %v994_v39, %v975_v45  ;;  %vm1065_vm6 = vcmp.eq.f32.partialorder %v1064_v51, 8.507059e+37 }
 0x3b4   :  { %v1037_v26 = vadd.f32 %v1024_v23, %v981_v59  ;;  %v1067_v59 = vor.u32 1.1754944e-38, %v1066_v61 }
 0x3b6   :  { %v3148_v29 = vpop.eup %3147  ;;  %v2946_v48 = vmul.f32 -1.442695, %v1037_v26  ;;  %v848_v26 = vadd.f32 %v4315_v11, %v720_v24 }
 0x3b7   :  { %v3150_v42 = vpop.eup %3149  ;;  %v1052_v50 = vadd.f32 1.0, %v3148_v29 }
 0x3b8   :  { %v1056_v55 = vmul.f32 %v3150_v42, %v1051_v20  ;;  %3151 = vpow2.f32 %v2946_v48  ;;  %vm1061_vm3 = vweird.f32 %v3150_v42  ;;  %v976_v29 = vadd.f32 %v4323_v15, %v848_v26  ;;  %v999_v15 = vpop.permute.xlu1 %998 }
 0x3b9   :  { %3153 = vrcp.f32 %v1052_v50  ;;  %v972_v1 = vpop.f32.mrf.mxu2  ;;  %vm1062_vm5 = vmor %vm1060_vm4, %vm1061_vm3  ;;  %v1081_v5 = vand.u32 2147483648, %v1052_v50  ;;  %v1079_v30 = vand.u32 2147483647, %v1052_v50  ;;  %vm1075_vm8 = vweird.f32 %v1052_v50 }
 0x3ba   :  { %v1057_v62 = vsub.f32 1.0, %v1056_v55  ;;  %v982_v41 = vadd.f32 %v972_v1, %v854_v52  ;;  %v1009_v24 = vpop.permute.xlu0 %1008 }
 0x3bb   :  { %v1082_v35 = vor.u32 1.1754944e-38, %v1081_v5  ;;  %vm1080_vm11 = vcmp.eq.f32.partialorder %v1079_v30, 8.507059e+37  ;;  %v5272_v5 = vld [vmem:[#allocation12_spill] sm:$0xff]  ;;  %v5274_v30 = vld [vmem:[#allocation14_spill] sm:$0xff] }
 0x3bc   :  { %v1058_v7 = vmul.f32 %v3150_v42, %v1057_v62  ;;  %v1038_v38 = vadd.f32 %v1029_v46, %v982_v41 }
 0x3be   :  { %v3152_v32 = vpop.eup %3151  ;;  %v1059_v56 = vadd.f32 %v3150_v42, %v1058_v7  ;;  %v2947_v28 = vmul.f32 -1.442695, %v1038_v38  ;;  %v585_v38 = vadd.f32 %v4265_v36, %v4309_v47 }
 0x3bf   :  { %v3154_v19 = vpop.eup %3153  ;;  %v4341_v22 = vadd.f32 1.0, %v3152_v32  ;;  %v1004_v32 = vpop.permute.xlu2 %1003 }
 0x3c0   :  { %v1063_v9 = vsel %vm1062_vm5, %v3150_v42, %v1059_v56  ;;  %v1071_v23 = vmul.f32 %v3154_v19, %v1052_v50  ;;  %3155 = vpow2.f32 %v2947_v28  ;;  %vm1076_vm7 = vweird.f32 %v3154_v19 }
 0x3c1   :  { %3157 = vrcp.f32 %v4341_v22  ;;  %v1068_v25 = vsel %vm1065_vm6, %v1067_v59, %v1063_v9  ;;  %vm4352_vm10 = vmor %vm1075_vm8, %vm1076_vm7  ;;  %v1032_v50 = vadd.f32 %v999_v15, %v976_v29  ;;  %v1094_v61 = vand.u32 2147483647, %v4341_v22  ;;  %v5273_v29 = vld [vmem:[#allocation13_spill] sm:$0xff] }
 0x3c2   :  { %v1072_v20 = vsub.f32 1.0, %v1071_v23  ;;  %v1115_v27 = vmul.f32 %v1068_v25, %v1031_v13  ;;  %vm1090_vm13 = vweird.f32 %v4341_v22 }
 0x3c3   :  { %vm1095_vm15 = vcmp.eq.f32.partialorder %v1094_v61, 8.507059e+37  ;;  %v5280_v61 = vld [vmem:[#allocation20_spill] sm:$0xff] }
 0x3c4   :  { %v1073_v33 = vmul.f32 %v3154_v19, %v1072_v20  ;;  %v4348_v48 = vadd.f32 %v1115_v27, %v3850_v31  ;;  %v721_v31 = vadd.f32 %v4317_v12, %v582_v10  ;;  %v1096_v12 = vand.u32 2147483648, %v4341_v22  ;;  %v5268_v20 = vld [vmem:[#allocation8_spill] sm:$0xff]  ;;  %v5270_v27 = vld [vmem:[#allocation10_spill] sm:$0xff] }
 0x3c6   :  { %v3156_v42 = vpop.eup %3155  ;;  %v1074_v6 = vadd.f32 %v3154_v19, %v1073_v33  ;;  %1139 = vmatmul.f32.vlgmr.msra.gmra.mxu3 %v4348_v48  ;;  %1176 = vmatmul.f32.vlgmr.msra.gmra.mxu1 %v4348_v48  ;;  %v849_v1 = vadd.f32 %v4321_v14, %v721_v31  ;;  %v1097_v56 = vor.u32 1.1754944e-38, %v1096_v12  ;;  %v5271_v33 = vld [vmem:[#allocation11_spill] sm:$0xff]  ;;  %v2948_v31 = vld [vmem:[%s5192_s10 + $0x40] sm:$0xff] }
 0x3c7   :  { %v3158_v52 = vpop.eup %3157  ;;  %v4356_v11 = vadd.f32 1.0, %v3156_v42  ;;  %1439 = vmatpush.msra.mxu1 %v3859_v58  ;;  %v5265_v58 = vld [vmem:[#allocation5_spill] sm:$0xff]  ;;  %v5275_v42 = vld [vmem:[#allocation15_spill] sm:$0xff] }
 0x3c8   :  { %v1078_v63 = vsel %vm4352_vm10, %v3154_v19, %v1074_v6  ;;  %v1086_v60 = vmul.f32 %v3158_v52, %v4341_v22  ;;  %v977_v44 = vadd.f32 %v4329_v18, %v849_v1  ;;  %vm1091_vm12 = vweird.f32 %v3158_v52  ;;  %v5276_v1 = vld [vmem:[#allocation16_spill] sm:$0xff]  ;;  %v1153_v12 = vld [vmem:[%s5192_s10 + $0x8] sm:$0xff] }
 0x3c9   :  { %3159 = vrcp.f32 %v4356_v11  ;;  %v1083_v41 = vsel %vm1080_vm11, %v1082_v35, %v1078_v63  ;;  %1440 = vmatpush.msra.mxu1 %v3864_v34  ;;  %v5266_v34 = vld [vmem:[#allocation6_spill] sm:$0xff]  ;;  %v722_v18 = vadd.f32 %v4325_v16, %v585_v38  ;;  %vm1092_vm14 = vmor %vm1090_vm13, %vm1091_vm12  ;;  %v1111_v39 = vand.u32 2147483648, %v4356_v11  ;;  %v5281_v38 = vld [vmem:[#allocation21_spill] sm:$0xff] }
 0x3ca   :  { %v1087_v62 = vsub.f32 1.0, %v1086_v60  ;;  %v1116_v46 = vmul.f32 %v1083_v41, %v1032_v50  ;;  %v1033_v28 = vadd.f32 %v1004_v32, %v977_v44  ;;  %v1109_v59 = vand.u32 2147483647, %v4356_v11  ;;  %v1152_v60 = vld [vmem:[%s5192_s10] sm:$0xff]  ;;  %v2949_v50 = vld [vmem:[%s5192_s10 + $0x48] sm:$0xff]  ;;  %v5277_v41 = vld [vmem:[#allocation17_spill] sm:$0xff] }
 0x3cb   :  { %1441 = vmatpush.msra.mxu1 %v5265_v58  ;;  %v850_v47 = vadd.f32 %v4327_v17, %v722_v18  ;;  %vm1105_vm2 = vweird.f32 %v4356_v11  ;;  %v5267_v17 = vld [vmem:[#allocation7_spill] sm:$0xff]  ;;  %v2950_v44 = vld [vmem:[%s5192_s10 + $0x50] sm:$0xff] }
 0x3cc   :  { %v1088_v7 = vmul.f32 %v3158_v52, %v1087_v62  ;;  %v4375_v14 = vadd.f32 %v1116_v46, %v3883_v57  ;;  %vm1110_vm4 = vcmp.eq.f32.partialorder %v1109_v59, 8.507059e+37  ;;  %v5278_v46 = vld [vmem:[#allocation18_spill] sm:$0xff]  ;;  %v5283_v32 = vld [vmem:[#allocation23_spill] sm:$0xff]  ;;  %v5284_v18 = vld [vmem:[#allocation24_spill] sm:$0xff] }
 0x3cd   :  { %1442 = vmatpush.msra.mxu1 %v5266_v34  ;;  %v978_v16 = vadd.f32 %v4331_v21, %v850_v47  ;;  %v5282_v34 = vld [vmem:[#allocation22_spill] sm:$0xff]  ;;  %v2955_v59 = vld [vmem:[%s5192_s10 + $0x78] sm:$0xff] }
 0x3ce   :  { %v1089_v45 = vadd.f32 %v3158_v52, %v1088_v7  ;;  %1142 = vmatmul.f32.gmra.mxu3 %v4375_v14  ;;  %1179 = vmatmul.f32.gmra.mxu1 %v4375_v14  ;;  %v5279_v7 = vld [vmem:[#allocation19_spill] sm:$0xff]  ;;  %v2972_v47 = vld [vmem:[%s5192_s10 + $0x80] sm:$0xff] }
 0x3cf   :  { %v3160_v51 = vpop.eup %3159  ;;  %1443 = vmatpush.msra.mxu1 %v3892_v4  ;;  %v1034_v21 = vadd.f32 %v1009_v24, %v978_v16  ;;  %v2954_v16 = vld [vmem:[%s5192_s10 + $0x70] sm:$0xff]  ;;  %v1159_v24 = vld [vmem:[%s5192_s10 + $0x38] sm:$0xff] }
 0x3d0   :  { %v1093_v36 = vsel %vm1092_vm14, %v3158_v52, %v1089_v45  ;;  %v1101_v57 = vmul.f32 %v3160_v51, %v4356_v11  ;;  %vm1106_vm1 = vweird.f32 %v3160_v51  ;;  %v1154_v45 = vld [vmem:[%s5192_s10 + $0x10] sm:$0xff] }
 0x3d1   :  { %v1098_v19 = vsel %vm1095_vm15, %v1097_v56, %v1093_v36  ;;  %1444 = vmatpush.msra.mxu1 %v3897_v49  ;;  %vm1107_vm3 = vmor %vm1105_vm2, %vm1106_vm1  ;;  %v1112_v49 = vor.u32 1.1754944e-38, %v1111_v39  ;;  %v5285_v36 = vld [vmem:[#allocation25_spill] sm:$0xff]  ;;  %v2974_v39 = vld [vmem:[%s5192_s10 + $0x90] sm:$0xff] }
 0x3d2   :  { %v1102_v8 = vsub.f32 1.0, %v1101_v57  ;;  %v1117_v22 = vmul.f32 %v1098_v19, %v1033_v28  ;;  %v1155_v28 = vld [vmem:[%s5192_s10 + $0x18] sm:$0xff]  ;;  %v2952_v57 = vld [vmem:[%s5192_s10 + $0x60] sm:$0xff] }
 0x3d3   :  { %1445 = vmatpush.msra.mxu1 %v3904_v43  ;;  %v5269_v43 = vld [vmem:[#allocation9_spill] sm:$0xff]  ;;  %v5286_v19 = vld [vmem:[#allocation26_spill] sm:$0xff] }
 0x3d4   :  { %v1103_v9 = vmul.f32 %v3160_v51, %v1102_v8  ;;  %v4390_v23 = vadd.f32 %v1117_v22, %v3916_v40  ;;  %v1156_v8 = vld [vmem:[%s5192_s10 + $0x20] sm:$0xff] }
 0x3d5   :  { %1446 = vmatpush.msra.mxu1 %v5267_v17 }
 0x3d6   :  { %v1104_v4 = vadd.f32 %v3160_v51, %v1103_v9  ;;  %1145 = vmatmul.f32.gmra.mxu3 %v4390_v23  ;;  %1182 = vmatmul.f32.gmra.mxu1 %v4390_v23  ;;  %v1158_v9 = vld [vmem:[%s5192_s10 + $0x30] sm:$0xff] }
 0x3d7   :  { %1447 = vmatpush.msra.mxu1 %v5268_v20  ;;  %v2989_v20 = vld [vmem:[%s5192_s10 + $0xc8] sm:$0xff] }
 0x3d8   :  { %v1108_v13 = vsel %vm1107_vm3, %v3160_v51, %v1104_v4  ;;  %v2951_v51 = vld [vmem:[%s5192_s10 + $0x58] sm:$0xff] }
 0x3d9   :  { %v1113_v40 = vsel %vm1110_vm4, %v1112_v49, %v1108_v13  ;;  %1448 = vmatpush.msra.mxu1 %v5269_v43  ;;  %v2975_v4 = vld [vmem:[%s5192_s10 + $0x98] sm:$0xff]  ;;  %v2976_v49 = vld [vmem:[%s5192_s10 + $0xa0] sm:$0xff]  ;;  %v2977_v13 = vld [vmem:[%s5192_s10 + $0xa8] sm:$0xff] }
 0x3da   :  { %v1118_v25 = vmul.f32 %v1113_v40, %v1034_v21  ;;  %v2988_v21 = vld [vmem:[%s5192_s10 + $0xc0] sm:$0xff]  ;;  %v2978_v40 = vld [vmem:[%s5192_s10 + $0xb0] sm:$0xff]  ;;  %v2979_v43 = vld [vmem:[%s5192_s10 + $0xb8] sm:$0xff] }
 0x3db   :  { %1449 = vmatpush.msra.mxu1 %v5270_v27  ;;  %v2991_v27 = vld [vmem:[%s5192_s10 + $0xd8] sm:$0xff] }
 0x3dc   :  { %v4400_v26 = vadd.f32 %v1118_v25, %v3946_v37  ;;  %v2990_v25 = vld [vmem:[%s5192_s10 + $0xd0] sm:$0xff] }
 0x3dd   :  { %1450 = vmatpush.msra.mxu1 %v5271_v33  ;;  %v2992_v33 = vld [vmem:[%s5192_s10 + $0xe0] sm:$0xff] }
 0x3de   :  { %1148 = vmatmul.f32.gmra.mxu3 %v4400_v26  ;;  %1185 = vmatmul.f32.gmra.mxu1 %v4400_v26 }
 0x3df   :  { %1451 = vmatpush.msra.mxu1 %v5272_v5  ;;  %v2993_v5 = vld [vmem:[%s5192_s10 + $0xe8] sm:$0xff] }
 0x3e1   :  { %1452 = vmatpush.msra.mxu1 %v5273_v29  ;;  %v2994_v29 = vld [vmem:[%s5192_s10 + $0xf0] sm:$0xff] }
 0x3e3   :  { %1453 = vmatpush.msra.mxu1 %v5274_v30  ;;  %v2995_v30 = vld [vmem:[%s5192_s10 + $0xf8] sm:$0xff] }
 0x3e5   :  { %1454 = vmatpush.msra.mxu1 %v5275_v42 }
 0x3e6   :  { %1344 = vmatmul.f32.vlgmr.msrb.gmra.mxu1 %v4348_v48 }
 0x3ee   :  { %1347 = vmatmul.f32.gmra.mxu1 %v4375_v14 }
 0x3f6   :  { %1350 = vmatmul.f32.gmra.mxu1 %v4390_v23 }
 0x3fe   :  { %1353 = vmatmul.f32.gmra.mxu1 %v4400_v26 }
 0x406   :  { %1455 = vmatmul.f32.vlgmr.msra.gmra.mxu1 %v4348_v48 }
 0x40e   :  { %1458 = vmatmul.f32.gmra.mxu1 %v4375_v14 }
 0x416   :  { %1461 = vmatmul.f32.gmra.mxu1 %v4390_v23 }
 0x41e   :  { %1464 = vmatmul.f32.gmra.mxu1 %v4400_v26 }
 0x443   :  { %v1177_v37 = vpop.f32.mrf.mxu1 }
 0x449   :  { %v1140_v10 = vpop.f32.mrf.mxu3 }
 0x44b   :  { %v1180_v6 = vpop.f32.mrf.mxu1 }
 0x451   :  { %v1143_v52 = vpop.f32.mrf.mxu3 }
 0x453   :  { %v1183_v55 = vpop.f32.mrf.mxu1 }
 0x459   :  { %v1146_v11 = vpop.f32.mrf.mxu3 }
 0x45b   :  { %v1186_v15 = vpop.f32.mrf.mxu1 }
 0x45c   :  { %1234 = vmatpush.msrb.mxu3 %v1186_v15 }
 0x45e   :  { %1235 = vmatpush.msrb.mxu3 %v1183_v55 }
 0x460   :  { %1236 = vmatpush.msrb.mxu3 %v1180_v6 }
 0x461   :  { %v1149_v63 = vpop.f32.mrf.mxu3 }
 0x462   :  { %1237 = vmatpush.msrb.mxu3 %v1177_v37  ;;  %1299 = vmatpush.msrb.mxu0 %v1149_v63 }
 0x463   :  { %2956 = vmatmul.msk.f32.vlgmr.msrb.gmra.mxu3 %vm239_vm9, %v2948_v31  ;;  %v1345_v35 = vpop.f32.mrf.mxu1 }
 0x464   :  { %1300 = vmatpush.msrb.mxu0 %v1146_v11 }
 0x466   :  { %1301 = vmatpush.msrb.mxu0 %v1143_v52 }
 0x468   :  { %1302 = vmatpush.msrb.mxu0 %v1140_v10 }
 0x469   :  { %2964 = vmatmul.msk.f32.vlgmr.msrb.gmra.mxu0 %vm239_vm9, %v1152_v60 }
 0x46a   :  { %1550 = vmatpush.msra.mxu0 %v5276_v1 }
 0x46b   :  { %2957 = vmatmul.msk.f32.gmra.mxu3 %vm239_vm9, %v2949_v50  ;;  %v1348_v62 = vpop.f32.mrf.mxu1 }
 0x46c   :  { %1551 = vmatpush.msra.mxu0 %v5277_v41 }
 0x46e   :  { %1552 = vmatpush.msra.mxu0 %v5278_v46 }
 0x470   :  { %1553 = vmatpush.msra.mxu0 %v5279_v7 }
 0x471   :  { %2965 = vmatmul.msk.f32.gmra.mxu0 %vm239_vm9, %v1153_v12 }
 0x472   :  { %1554 = vmatpush.msra.mxu0 %v5280_v61 }
 0x473   :  { %2958 = vmatmul.msk.f32.gmra.mxu3 %vm239_vm9, %v2950_v44  ;;  %v1351_v58 = vpop.f32.mrf.mxu1 }
 0x474   :  { %1555 = vmatpush.msra.mxu0 %v5281_v38 }
 0x476   :  { %1556 = vmatpush.msra.mxu0 %v5282_v34 }
 0x478   :  { %1557 = vmatpush.msra.mxu0 %v5283_v32 }
 0x479   :  { %2966 = vmatmul.msk.f32.gmra.mxu0 %vm239_vm9, %v1154_v45 }
 0x47a   :  { %1558 = vmatpush.msra.mxu0 %v5284_v18 }
 0x47b   :  { %2959 = vmatmul.msk.f32.gmra.mxu3 %vm239_vm9, %v2951_v51  ;;  %v1354_v56 = vpop.f32.mrf.mxu1 }
 0x47c   :  { %1402 = vmatpush.msrb.mxu2 %v1354_v56  ;;  %1559 = vmatpush.msra.mxu0 %v4063_v2 }
 0x47e   :  { %1403 = vmatpush.msrb.mxu2 %v1351_v58  ;;  %1560 = vmatpush.msra.mxu0 %v5285_v36 }
 0x480   :  { %1404 = vmatpush.msrb.mxu2 %v1348_v62  ;;  %1561 = vmatpush.msra.mxu0 %v4081_v53  ;;  %v2953_v53 = vld [vmem:[%s5192_s10 + $0x68] sm:$0xff] }
 0x481   :  { %2967 = vmatmul.msk.f32.gmra.mxu0 %vm239_vm9, %v1155_v28 }
 0x482   :  { %1405 = vmatpush.msrb.mxu2 %v1345_v35  ;;  %1562 = vmatpush.msra.mxu0 %v4090_v0  ;;  %v2973_v0 = vld [vmem:[%s5192_s10 + $0x88] sm:$0xff] }
 0x483   :  { %2960 = vmatmul.msk.f32.gmra.mxu3 %vm239_vm9, %v2952_v57  ;;  %2980 = vmatmul.msk.f32.vlgmr.msrb.gmra.mxu2 %vm239_vm9, %v2972_v47  ;;  %v1456_v2 = vpop.f32.mrf.mxu1 }
 0x484   :  { %1563 = vmatpush.msra.mxu0 %v5286_v19 }
 0x486   :  { %1564 = vmatpush.msra.mxu0 %v4108_v3  ;;  %v1157_v3 = vld [vmem:[%s5192_s10 + $0x28] sm:$0xff] }
 0x488   :  { %1565 = vmatpush.msra.mxu0 %v4117_v54 }
 0x489   :  { %2968 = vmatmul.msk.f32.gmra.mxu0 %vm239_vm9, %v1156_v8 }
 0x48b   :  { %2961 = vmatmul.msk.f32.gmra.mxu3 %vm239_vm9, %v2953_v53  ;;  %2981 = vmatmul.msk.f32.gmra.mxu2 %vm239_vm9, %v2973_v0  ;;  %v1459_v22 = vpop.f32.mrf.mxu1  ;;  %v3004_v0 = vld [vmem:[%s5192_s10 + $0x100] sm:$0xff] }
 0x491   :  { %2969 = vmatmul.msk.f32.gmra.mxu0 %vm239_vm9, %v1157_v3  ;;  %v3006_v3 = vld [vmem:[%s5192_s10 + $0x110] sm:$0xff] }
 0x493   :  { %2962 = vmatmul.msk.f32.gmra.mxu3 %vm239_vm9, %v2954_v16  ;;  %2982 = vmatmul.msk.f32.gmra.mxu2 %vm239_vm9, %v2974_v39  ;;  %v1462_v54 = vpop.f32.mrf.mxu1  ;;  %v3007_v16 = vld [vmem:[%s5192_s10 + $0x118] sm:$0xff]  ;;  %v3008_v39 = vld [vmem:[%s5192_s10 + $0x120] sm:$0xff] }
 0x499   :  { %2970 = vmatmul.msk.f32.gmra.mxu0 %vm239_vm9, %v1158_v9  ;;  %v3010_v9 = vld [vmem:[%s5192_s10 + $0x130] sm:$0xff] }
 0x49b   :  { %2963 = vmatmul.msk.f32.gmra.mxu3 %vm239_vm9, %v2955_v59  ;;  %2983 = vmatmul.msk.f32.gmra.mxu2 %vm239_vm9, %v2975_v4  ;;  %v1465_v17 = vpop.f32.mrf.mxu1  ;;  %v3011_v59 = vld [vmem:[%s5192_s10 + $0x138] sm:$0xff] }
 0x49c   :  { %1513 = vmatpush.msra.mxu3 %v1465_v17 }
 0x49e   :  { %1514 = vmatpush.msra.mxu3 %v1462_v54  ;;  %v3009_v54 = vld [vmem:[%s5192_s10 + $0x128] sm:$0xff] }
 0x4a0   :  { %1515 = vmatpush.msra.mxu3 %v1459_v22  ;;  %v3005_v22 = vld [vmem:[%s5192_s10 + $0x108] sm:$0xff] }
 0x4a1   :  { %2971 = vmatmul.msk.f32.gmra.mxu0 %vm239_vm9, %v1159_v24 }
 0x4a2   :  { %1516 = vmatpush.msra.mxu3 %v1456_v2 }
 0x4a3   :  { %2984 = vmatmul.msk.f32.gmra.mxu2 %vm239_vm9, %v2976_v49  ;;  %2996 = vmatmul.msk.f32.vlgmr.msra.gmra.mxu3 %vm239_vm9, %v2988_v21 }
 0x4a9   :  { %1566 = vmatmul.f32.vlgmr.msra.gmra.mxu0 %v4348_v48 }
 0x4ab   :  { %2985 = vmatmul.msk.f32.gmra.mxu2 %vm239_vm9, %v2977_v13  ;;  %2997 = vmatmul.msk.f32.gmra.mxu3 %vm239_vm9, %v2989_v20 }
 0x4b1   :  { %1569 = vmatmul.f32.gmra.mxu0 %v4375_v14 }
 0x4b3   :  { %2986 = vmatmul.msk.f32.gmra.mxu2 %vm239_vm9, %v2978_v40  ;;  %2998 = vmatmul.msk.f32.gmra.mxu3 %vm239_vm9, %v2990_v25 }
 0x4b9   :  { %1572 = vmatmul.f32.gmra.mxu0 %v4390_v23 }
 0x4bb   :  { %2987 = vmatmul.msk.f32.gmra.mxu2 %vm239_vm9, %v2979_v43  ;;  %2999 = vmatmul.msk.f32.gmra.mxu3 %vm239_vm9, %v2991_v27  ;;  %v1707_v27 = vpop.permute.xlu1 %1706 }
 0x4c1   :  { %1575 = vmatmul.f32.gmra.mxu0 %v4400_v26 }
 0x4c3   :  { %3000 = vmatmul.msk.f32.gmra.mxu3 %vm239_vm9, %v2992_v33 }
 0x4cb   :  { %3001 = vmatmul.msk.f32.gmra.mxu3 %vm239_vm9, %v2993_v5 }
 0x4d3   :  { %3002 = vmatmul.msk.f32.gmra.mxu3 %vm239_vm9, %v2994_v29 }
 0x4db   :  { %3003 = vmatmul.msk.f32.gmra.mxu3 %vm239_vm9, %v2995_v30 }
 0x4e6   :  { %v1239_v42 = vpop.f32.mrf.mxu3  ;;  %v1304_v37 = vpop.f32.mrf.mxu0 }
 0x4e7   :  { %v1305_v7 = vadd.f32 %v1304_v37, %v1239_v42 }
 0x4ee   :  { %v1242_v10 = vpop.f32.mrf.mxu3  ;;  %v1307_v6 = vpop.f32.mrf.mxu0 }
 0x4ef   :  { %v1308_v51 = vadd.f32 %v1307_v6, %v1242_v10 }
 0x4f6   :  { %v1245_v52 = vpop.f32.mrf.mxu3  ;;  %v1310_v55 = vpop.f32.mrf.mxu0 }
 0x4f7   :  { %v1311_v57 = vadd.f32 %v1310_v55, %v1245_v52  ;;  %v1692_v52 = vpop.permute.xlu1 %1691 }
 0x4fe   :  { %v4566_v11 = vpop.f32.mrf.mxu3  ;;  %v4568_v15 = vpop.f32.mrf.mxu0 }
 0x506   :  { %v1251_v31 = vpop.f32.mrf.mxu3  ;;  %v1316_v63 = vpop.f32.mrf.mxu0 }
 0x507   :  { %v1407_v12 = vpop.f32.mrf.mxu2  ;;  %v1317_v5 = vadd.f32 %v1316_v63, %v1251_v31 }
 0x508   :  { %v1431_v61 = vadd.f32 %v1407_v12, %v1305_v7 }
 0x50e   :  { %v1254_v35 = vpop.f32.mrf.mxu3  ;;  %v1319_v60 = vpop.f32.mrf.mxu0 }
 0x50f   :  { %v4570_v50 = vadd.f32 %v1319_v60, %v1254_v35  ;;  %v1410_v34 = vpop.f32.mrf.mxu2 }
 0x510   :  { %v1432_v32 = vadd.f32 %v1410_v34, %v1308_v51 }
 0x516   :  { %v1257_v1 = vpop.f32.mrf.mxu3  ;;  %v1322_v62 = vpop.f32.mrf.mxu0 }
 0x517   :  { %v4572_v41 = vadd.f32 %v1322_v62, %v1257_v1  ;;  %v1413_v36 = vpop.f32.mrf.mxu2 }
 0x518   :  { %v1433_v47 = vadd.f32 %v1413_v36, %v1311_v57 }
 0x51e   :  { %v4574_v46 = vpop.f32.mrf.mxu3  ;;  %v4576_v44 = vpop.f32.mrf.mxu0 }
 0x51f   :  { %v4614_v21 = vpop.f32.mrf.mxu2 }
 0x526   :  { %v1518_v58 = vpop.f32.mrf.mxu3  ;;  %v1567_v38 = vpop.f32.mrf.mxu0 }
 0x527   :  { %v1542_v45 = vadd.f32 %v1518_v58, %v1431_v61  ;;  %v1419_v25 = vpop.f32.mrf.mxu2  ;;  %v1697_v61 = vpop.permute.xlu0 %1696 }
 0x528   :  { %v1435_v29 = vadd.f32 %v1419_v25, %v1317_v5 }
 0x52e   :  { %v1521_v18 = vpop.f32.mrf.mxu3  ;;  %v1570_v56 = vpop.f32.mrf.mxu0 }
 0x52f   :  { %v1543_v28 = vadd.f32 %v1521_v18, %v1432_v32  ;;  %v1422_v30 = vpop.f32.mrf.mxu2 }
 0x530   :  { %v1436_v35 = vadd.f32 %v1422_v30, %v4570_v50 }
 0x536   :  { %v1524_v2 = vpop.f32.mrf.mxu3  ;;  %v1573_v19 = vpop.f32.mrf.mxu0 }
 0x537   :  { %v1544_v8 = vadd.f32 %v1524_v2, %v1433_v47  ;;  %v1425_v62 = vpop.f32.mrf.mxu2 }
 0x53e   :  { %v1576_v53 = vpop.f32.mrf.mxu0  ;;  %v4616_v13 = vpop.f32.mrf.mxu3 }
 0x53f   :  { %1624 = vmatpush.msrb.mxu1 %v1576_v53 }
 0x541   :  { %1625 = vmatpush.msrb.mxu1 %v1573_v19 }
 0x543   :  { %1626 = vmatpush.msrb.mxu1 %v1570_v56  ;;  %v1428_v56 = vpop.f32.mrf.mxu2 }
 0x545   :  { %1627 = vmatpush.msrb.mxu1 %v1567_v38  ;;  %v1702_v38 = vpop.permute.xlu2 %1701 }
 0x546   :  { %3012 = vmatmul.msk.f32.vlgmr.msrb.gmra.mxu1 %vm239_vm9, %v3004_v0  ;;  %v1530_v43 = vpop.f32.mrf.mxu3 }
 0x547   :  { %v1546_v42 = vadd.f32 %v1530_v43, %v1435_v29 }
 0x54d   :  { %v4626_v2 = vpop.permute.xlu2 %1686 }
 0x54e   :  { %3013 = vmatmul.msk.f32.gmra.mxu1 %vm239_vm9, %v3005_v22  ;;  %v1533_v37 = vpop.f32.mrf.mxu3 }
 0x54f   :  { %v1547_v1 = vadd.f32 %v1533_v37, %v1436_v35 }
 0x555   :  { %v1672_v43 = vpop.permute.xlu2 %1671 }
 0x556   :  { %3014 = vmatmul.msk.f32.gmra.mxu1 %vm239_vm9, %v3006_v3  ;;  %v1536_v58 = vpop.f32.mrf.mxu3 }
 0x55e   :  { %3015 = vmatmul.msk.f32.gmra.mxu1 %vm239_vm9, %v3007_v16  ;;  %v1539_v57 = vpop.f32.mrf.mxu3 }
 0x566   :  { %3016 = vmatmul.msk.f32.gmra.mxu1 %vm239_vm9, %v3008_v39 }
 0x56e   :  { %3017 = vmatmul.msk.f32.gmra.mxu1 %vm239_vm9, %v3009_v54 }
 0x576   :  { %3018 = vmatmul.msk.f32.gmra.mxu1 %vm239_vm9, %v3010_v9 }
 0x57e   :  { %3019 = vmatmul.msk.f32.gmra.mxu1 %vm239_vm9, %v3011_v59 }
 0x5c3   :  { %v1629_v4 = vpop.f32.mrf.mxu1 }
 0x5c4   :  { %v4610_v17 = vadd.f32 %v1629_v4, %v1542_v45  ;;  %v1437_v45 = vadd.f32 %v1425_v62, %v4572_v41 }
 0x5c6   :  { %v1548_v32 = vadd.f32 %v1536_v58, %v1437_v45 }
 0x5cb   :  { %v1632_v24 = vpop.f32.mrf.mxu1 }
 0x5cc   :  { %v4612_v49 = vadd.f32 %v1632_v24, %v1543_v28  ;;  %v1326_v28 = vadd.f32 %v4576_v44, %v4574_v46 }
 0x5ce   :  { %v1438_v19 = vadd.f32 %v1428_v56, %v1326_v28  ;;  %v1682_v56 = vpop.permute.xlu0 %1681 }
 0x5d0   :  { %v1549_v0 = vadd.f32 %v1539_v57, %v1438_v19 }
 0x5d3   :  { %v1635_v20 = vpop.f32.mrf.mxu1 }
 0x5d4   :  { %v4618_v40 = vadd.f32 %v1635_v20, %v1544_v8 }
 0x5db   :  { %v4620_v33 = vpop.f32.mrf.mxu1 }
 0x5e3   :  { %v1641_v10 = vpop.f32.mrf.mxu1 }
 0x5e4   :  { %v1657_v6 = vadd.f32 %v1641_v10, %v1546_v42  ;;  %v1709_v42 = vadd.f32 %v1672_v43, %v4610_v17  ;;  %v1812_v43 = vld [vmem:[%s5193_s12 + $0x58] sm:$0xff] }
 0x5e6   :  { %v1713_v55 = vadd.f32 %v1692_v52, %v1657_v6 }
 0x5e8   :  { %v3020_v60 = vmul.f32 -1.442695, %v1713_v55 }
 0x5ea   :  { %3161 = vpow2.f32 %v3020_v60 }
 0x5eb   :  { %v1644_v12 = vpop.f32.mrf.mxu1 }
 0x5ec   :  { %v1658_v7 = vadd.f32 %v1644_v12, %v1547_v1  ;;  %v1677_v12 = vpop.permute.xlu1 %1676 }
 0x5ed   :  { %v1710_v17 = vadd.f32 %v1677_v12, %v4612_v49 }
 0x5ee   :  { %v1714_v31 = vadd.f32 %v1697_v61, %v1658_v7 }
 0x5f0   :  { %v3162_v63 = vpop.eup %3161  ;;  %v3021_v34 = vmul.f32 -1.442695, %v1714_v31 }
 0x5f1   :  { %v1729_v51 = vadd.f32 1.0, %v3162_v63 }
 0x5f2   :  { %3163 = vpow2.f32 %v3021_v34 }
 0x5f3   :  { %3165 = vrcp.f32 %v1729_v51  ;;  %v1647_v18 = vpop.f32.mrf.mxu1  ;;  %v1744_v46 = vand.u32 2147483648, %v1729_v51  ;;  %v1742_v44 = vand.u32 2147483647, %v1729_v51  ;;  %vm1738_vm6 = vweird.f32 %v1729_v51 }
 0x5f4   :  { %v1659_v50 = vadd.f32 %v1647_v18, %v1548_v32  ;;  %v1314_v32 = vadd.f32 %v4568_v15, %v4566_v11 }
 0x5f5   :  { %v1745_v30 = vor.u32 1.1754944e-38, %v1744_v46  ;;  %vm1743_vm8 = vcmp.eq.f32.partialorder %v1742_v44, 8.507059e+37  ;;  %v1805_v46 = vld [vmem:[%s5193_s12 + $0x20] sm:$0xff]  ;;  %v1806_v44 = vld [vmem:[%s5193_s12 + $0x28] sm:$0xff] }
 0x5f6   :  { %v1715_v36 = vadd.f32 %v1702_v38, %v1659_v50  ;;  %v1434_v28 = vadd.f32 %v4614_v21, %v1314_v32 }
 0x5f8   :  { %v3164_v47 = vpop.eup %3163  ;;  %v3022_v8 = vmul.f32 -1.442695, %v1715_v36  ;;  %v1711_v36 = vadd.f32 %v1682_v56, %v4618_v40 }
 0x5f9   :  { %v3166_v53 = vpop.eup %3165  ;;  %v1730_v41 = vadd.f32 1.0, %v3164_v47 }
 0x5fa   :  { %v1734_v22 = vmul.f32 %v3166_v53, %v1729_v51  ;;  %3167 = vpow2.f32 %v3022_v8  ;;  %vm1739_vm5 = vweird.f32 %v3166_v53  ;;  %v1545_v8 = vadd.f32 %v4616_v13, %v1434_v28 }
 0x5fb   :  { %3169 = vrcp.f32 %v1730_v41  ;;  %v1650_v3 = vpop.f32.mrf.mxu1  ;;  %vm1740_vm7 = vmor %vm1738_vm6, %vm1739_vm5  ;;  %v1759_v52 = vand.u32 2147483648, %v1730_v41  ;;  %v1757_v55 = vand.u32 2147483647, %v1730_v41  ;;  %vm1753_vm11 = vweird.f32 %v1730_v41 }
 0x5fc   :  { %v1660_v16 = vadd.f32 %v1650_v3, %v1549_v0  ;;  %v1735_v39 = vsub.f32 1.0, %v1734_v22  ;;  %v1656_v11 = vadd.f32 %v4620_v33, %v1545_v8 }
 0x5fd   :  { %v1760_v58 = vor.u32 1.1754944e-38, %v1759_v52  ;;  %vm1758_vm13 = vcmp.eq.f32.partialorder %v1757_v55, 8.507059e+37 }
 0x5fe   :  { %v1716_v54 = vadd.f32 %v1707_v27, %v1660_v16  ;;  %v1736_v9 = vmul.f32 %v3166_v53, %v1735_v39  ;;  %v1712_v40 = vadd.f32 %v4626_v2, %v1656_v11  ;;  %v2610_v11 = vld [vmem:[%s5187_s15 + $0x10] sm:$0xff] }
 0x600   :  { %v3168_v59 = vpop.eup %3167  ;;  %v3023_v4 = vmul.f32 -1.442695, %v1716_v54  ;;  %v1737_v24 = vadd.f32 %v3166_v53, %v1736_v9 }
 0x601   :  { %v3170_v20 = vpop.eup %3169  ;;  %v1731_v25 = vadd.f32 1.0, %v3168_v59  ;;  %v1807_v59 = vld [vmem:[%s5193_s12 + $0x30] sm:$0xff] }
 0x602   :  { %v1749_v5 = vmul.f32 %v3170_v20, %v1730_v41  ;;  %3171 = vpow2.f32 %v3023_v4  ;;  %v1741_v29 = vsel %vm1740_vm7, %v3166_v53, %v1737_v24  ;;  %vm1754_vm10 = vweird.f32 %v3170_v20  ;;  %v1808_v4 = vld [vmem:[%s5193_s12 + $0x38] sm:$0xff]  ;;  %v1809_v24 = vld [vmem:[%s5193_s12 + $0x40] sm:$0xff] }
 0x603   :  { %3173 = vrcp.f32 %v1731_v25  ;;  %v1746_v37 = vsel %vm1743_vm8, %v1745_v30, %v1741_v29  ;;  %vm1755_vm12 = vmor %vm1753_vm11, %vm1754_vm10  ;;  %v1774_v63 = vand.u32 2147483648, %v1731_v25  ;;  %v1772_v51 = vand.u32 2147483647, %v1731_v25  ;;  %v1848_v30 = vpop.permute.xlu0 %1847 }
 0x604   :  { %v1750_v27 = vsub.f32 1.0, %v1749_v5  ;;  %v1793_v10 = vmul.f32 %v1746_v37, %v1709_v42  ;;  %vm1768_vm15 = vweird.f32 %v1731_v25  ;;  %v1853_v5 = vpop.permute.xlu1 %1852  ;;  %v1833_v42 = vpop.permute.xlu2 %1832 }
 0x605   :  { %v1775_v49 = vor.u32 1.1754944e-38, %v1774_v63  ;;  %vm1773_vm2 = vcmp.eq.f32.partialorder %v1772_v51, 8.507059e+37 }
 0x606   :  { %v1751_v6 = vmul.f32 %v3170_v20, %v1750_v27  ;;  %v4650_v2 = vadd.f32 %v1793_v10, %v4348_v48  ;;  %v1804_v48 = vld [vmem:[%s5193_s12 + $0x18] sm:$0xff] }
 0x608   :  { %v3172_v35 = vpop.eup %3171  ;;  %v1752_v60 = vadd.f32 %v3170_v20, %v1751_v6 }
 0x609   :  { %v3174_v1 = vpop.eup %3173  ;;  %v1732_v62 = vadd.f32 1.0, %v3172_v35 }
 0x60a   :  { %v1764_v7 = vmul.f32 %v3174_v1, %v1731_v25  ;;  %v1756_v61 = vsel %vm1755_vm12, %v3170_v20, %v1752_v60  ;;  %vm1769_vm14 = vweird.f32 %v3174_v1  ;;  %v1810_v20 = vld [vmem:[%s5193_s12 + $0x48] sm:$0xff]  ;;  %v1811_v25 = vld [vmem:[%s5193_s12 + $0x50] sm:$0xff] }
 0x60b   :  { %3175 = vrcp.f32 %v1732_v62  ;;  %v1761_v31 = vsel %vm1758_vm13, %v1760_v58, %v1756_v61  ;;  %vm1770_vm1 = vmor %vm1768_vm15, %vm1769_vm14  ;;  %v1789_v0 = vand.u32 2147483648, %v1732_v62  ;;  %v1787_v22 = vand.u32 2147483647, %v1732_v62  ;;  %v1858_v52 = vpop.permute.xlu0 %1857 }
 0x60c   :  { %v1765_v38 = vsub.f32 1.0, %v1764_v7  ;;  %v1794_v45 = vmul.f32 %v1761_v31, %v1710_v17  ;;  %vm1783_vm4 = vweird.f32 %v1732_v62  ;;  %v1828_v10 = vpop.permute.xlu1 %1827  ;;  %v1863_v63 = vpop.permute.xlu2 %1862 }
 0x60d   :  { %v1790_v21 = vor.u32 1.1754944e-38, %v1789_v0  ;;  %vm1788_vm6 = vcmp.eq.f32.partialorder %v1787_v22, 8.507059e+37 }
 0x60e   :  { %v1766_v34 = vmul.f32 %v3174_v1, %v1765_v38  ;;  %v4646_v9 = vadd.f32 %v1794_v45, %v4375_v14  ;;  %v1803_v14 = vld [vmem:[%s5193_s12 + $0x10] sm:$0xff] }
 0x610   :  { %v1767_v18 = vadd.f32 %v3174_v1, %v1766_v34 }
 0x611   :  { %v3176_v50 = vpop.eup %3175 }
 0x612   :  { %v1779_v57 = vmul.f32 %v3176_v50, %v1732_v62  ;;  %v1771_v47 = vsel %vm1770_vm1, %v3174_v1, %v1767_v18  ;;  %vm1784_vm3 = vweird.f32 %v3176_v50 }
 0x613   :  { %v1776_v19 = vsel %vm1773_vm2, %v1775_v49, %v1771_v47  ;;  %vm1785_vm5 = vmor %vm1783_vm4, %vm1784_vm3  ;;  %v1843_v35 = vpop.permute.xlu0 %1842 }
 0x614   :  { %v1780_v53 = vsub.f32 1.0, %v1779_v57  ;;  %v1795_v41 = vmul.f32 %v1776_v19, %v1711_v36  ;;  %v1838_v62 = vpop.permute.xlu1 %1837 }
 0x616   :  { %v1781_v15 = vmul.f32 %v3176_v50, %v1780_v53  ;;  %v4642_v33 = vadd.f32 %v1795_v41, %v4390_v23  ;;  %v1802_v23 = vld [vmem:[%s5193_s12 + $0x8] sm:$0xff] }
 0x618   :  { %v1782_v3 = vadd.f32 %v3176_v50, %v1781_v15 }
 0x61a   :  { %v1786_v16 = vsel %vm1785_vm5, %v3176_v50, %v1782_v3 }
 0x61b   :  { %v1791_v39 = vsel %vm1788_vm6, %v1790_v21, %v1786_v16  ;;  %v2608_v16 = vld [vmem:[%s5187_s15] sm:$0xff] }
 0x61c   :  { %v1796_v54 = vmul.f32 %v1791_v39, %v1712_v40 }
 0x61e   :  { %v4638_v13 = vadd.f32 %v1796_v54, %v4400_v26  ;;  %v1801_v26 = vld [vmem:[%s5193_s12] sm:$0xff] }
 0x620   :  { %1933 = vmatpush.msra.mxu2 %v4638_v13 }
 0x622   :  { %1934 = vmatpush.msra.mxu2 %v4642_v33 }
 0x624   :  { %1935 = vmatpush.msra.mxu2 %v4646_v9 }
 0x626   :  { %1936 = vmatpush.msra.mxu2 %v4650_v2 }
 0x627   :  { %3024 = vmatmul.msk.f32.vlgmr.msra.gmra.mxu2 %vm239_vm9, %v1801_v26 }
 0x62f   :  { %3025 = vmatmul.msk.f32.gmra.mxu2 %vm239_vm9, %v1802_v23 }
 0x637   :  { %3026 = vmatmul.msk.f32.gmra.mxu2 %vm239_vm9, %v1803_v14 }
 0x63f   :  { %3027 = vmatmul.msk.f32.gmra.mxu2 %vm239_vm9, %v1804_v48 }
 0x647   :  { %3028 = vmatmul.msk.f32.gmra.mxu2 %vm239_vm9, %v1805_v46 }
 0x64f   :  { %3029 = vmatmul.msk.f32.gmra.mxu2 %vm239_vm9, %v1806_v44 }
 0x657   :  { %3030 = vmatmul.msk.f32.gmra.mxu2 %vm239_vm9, %v1807_v59 }
 0x65f   :  { %3031 = vmatmul.msk.f32.gmra.mxu2 %vm239_vm9, %v1808_v4 }
 0x667   :  { %3032 = vmatmul.msk.f32.gmra.mxu2 %vm239_vm9, %v1809_v24 }
 0x66f   :  { %3033 = vmatmul.msk.f32.gmra.mxu2 %vm239_vm9, %v1810_v20 }
 0x677   :  { %3034 = vmatmul.msk.f32.gmra.mxu2 %vm239_vm9, %v1811_v25 }
 0x67f   :  { %3035 = vmatmul.msk.f32.gmra.mxu2 %vm239_vm9, %v1812_v43 }
 0x6aa   :  { %v1938_v29 = vpop.f32.mrf.mxu2 }
 0x6ab   :  { %v1939_v6 = vadd.f32 %v1938_v29, %v1828_v10 }
 0x6b2   :  { %v1941_v27 = vpop.f32.mrf.mxu2 }
 0x6b3   :  { %v1942_v37 = vadd.f32 %v1941_v27, %v1833_v42  ;;  %v1974_v27 = vld [vmem:[%s5194_s1] sm:$0xff] }
 0x6b5   :  { %2084 = vmatpush.msrb.mxu0 %v1942_v37  ;;  %v1978_v37 = vld [vmem:[%s5194_s1 + $0x20] sm:$0xff] }
 0x6b7   :  { %2085 = vmatpush.msrb.mxu0 %v1939_v6 }
 0x6ba   :  { %v1944_v55 = vpop.f32.mrf.mxu2 }
 0x6bb   :  { %v1945_v12 = vadd.f32 %v1944_v55, %v1838_v62  ;;  %v1975_v62 = vld [vmem:[%s5194_s1 + $0x8] sm:$0xff] }
 0x6c2   :  { %v1947_v60 = vpop.f32.mrf.mxu2 }
 0x6c3   :  { %v1948_v1 = vadd.f32 %v1947_v60, %v1843_v35 }
 0x6c5   :  { %2391 = vmatpush.msra.mxu1 %v1948_v1 }
 0x6c7   :  { %2392 = vmatpush.msra.mxu1 %v1945_v12  ;;  %v1979_v12 = vld [vmem:[%s5194_s1 + $0x28] sm:$0xff] }
 0x6ca   :  { %v1950_v7 = vpop.f32.mrf.mxu2 }
 0x6cb   :  { %v1951_v61 = vadd.f32 %v1950_v7, %v1848_v30 }
 0x6cd   :  { %1990 = vxpose.xlu2.b32.start [1/2] (short) %v1951_v61, 128 }
 0x6d2   :  { %v1953_v58 = vpop.f32.mrf.mxu2 }
 0x6d3   :  { %v1954_v17 = vadd.f32 %v1953_v58, %v1853_v5 }
 0x6d5   :  { %1991 = vxpose.xlu2.b32.end [2/2] (short) %v1954_v17, 128 }
 0x6da   :  { %v1956_v38 = vpop.f32.mrf.mxu2 }
 0x6db   :  { %v1957_v31 = vadd.f32 %v1956_v38, %v1858_v52 }
 0x6dd   :  { %2297 = vxpose.xlu0.b32.start [1/2] (short) %v1957_v31, 128 }
 0x6e2   :  { %v1959_v45 = vpop.f32.mrf.mxu2 }
 0x6e3   :  { %v1960_v34 = vadd.f32 %v1959_v45, %v1863_v63  ;;  %v1976_v45 = vld [vmem:[%s5194_s1 + $0x10] sm:$0xff] }
 0x6e5   :  { %2298 = vxpose.xlu0.b32.end [2/2] (short) %v1960_v34, 128  ;;  %v1980_v34 = vld [vmem:[%s5194_s1 + $0x30] sm:$0xff] }
 0x766   :  { %v2006_v51 = vpop.trf.xlu2 }
 0x767   :  { %3036 = vmatmul.msk.f32.vlgmr.msrb.gmra.mxu0 %vm89_vm0, %v2006_v51 }
 0x76e   :  { %v2007_v32 = vpop.trf.xlu2 }
 0x76f   :  { %3037 = vmatmul.msk.f32.gmra.mxu0 %vm89_vm0, %v2007_v32 }
 0x776   :  { %v2008_v18 = vpop.trf.xlu2 }
 0x777   :  { %3038 = vmatmul.msk.f32.gmra.mxu0 %vm89_vm0, %v2008_v18 }
 0x77e   :  { %v2009_v50 = vpop.trf.xlu2 }
 0x77f   :  { %3039 = vmatmul.msk.f32.gmra.mxu0 %vm89_vm0, %v2009_v50 }
 0x781   :  { %v2313_v56 = vpop.trf.xlu0 }
 0x782   :  { %3052 = vmatmul.msk.f32.vlgmr.msra.gmra.mxu1 %vm89_vm0, %v2313_v56 }
 0x786   :  { %v2010_v28 = vpop.trf.xlu2 }
 0x787   :  { %3040 = vmatmul.msk.f32.gmra.mxu0 %vm89_vm0, %v2010_v28 }
 0x789   :  { %v2314_v49 = vpop.trf.xlu0 }
 0x78a   :  { %3053 = vmatmul.msk.f32.gmra.mxu1 %vm89_vm0, %v2314_v49 }
 0x78e   :  { %v2011_v36 = vpop.trf.xlu2 }
 0x78f   :  { %3041 = vmatmul.msk.f32.gmra.mxu0 %vm89_vm0, %v2011_v36 }
 0x791   :  { %v2315_v57 = vpop.trf.xlu0 }
 0x792   :  { %3054 = vmatmul.msk.f32.gmra.mxu1 %vm89_vm0, %v2315_v57 }
 0x796   :  { %v2012_v47 = vpop.trf.xlu2 }
 0x797   :  { %3042 = vmatmul.msk.f32.gmra.mxu0 %vm89_vm0, %v2012_v47 }
 0x799   :  { %v2316_v19 = vpop.trf.xlu0 }
 0x79a   :  { %3055 = vmatmul.msk.f32.gmra.mxu1 %vm89_vm0, %v2316_v19 }
 0x79e   :  { %v2013_v8 = vpop.trf.xlu2 }
 0x79f   :  { %3043 = vmatmul.msk.f32.gmra.mxu0 %vm89_vm0, %v2013_v8 }
 0x7a1   :  { %v2317_v53 = vpop.trf.xlu0 }
 0x7a2   :  { %3056 = vmatmul.msk.f32.gmra.mxu1 %vm89_vm0, %v2317_v53 }
 0x7a6   :  { %v2014_v41 = vpop.trf.xlu2 }
 0x7a7   :  { %3044 = vmatmul.msk.f32.gmra.mxu0 %vm89_vm0, %v2014_v41 }
 0x7a9   :  { %v2318_v0 = vpop.trf.xlu0 }
 0x7aa   :  { %3057 = vmatmul.msk.f32.gmra.mxu1 %vm89_vm0, %v2318_v0 }
 0x7ae   :  { %2624 = vperm.xlu2 %3096, %v2610_v11   ;;  %v2015_v15 = vpop.trf.xlu2 }
 0x7af   :  { %3045 = vmatmul.msk.f32.gmra.mxu0 %vm89_vm0, %v2015_v15 }
 0x7b1   :  { %v2319_v22 = vpop.trf.xlu0 }
 0x7b2   :  { %3058 = vmatmul.msk.f32.gmra.mxu1 %vm89_vm0, %v2319_v22 }
 0x7b6   :  { %v2016_v3 = vpop.trf.xlu2 }
 0x7b7   :  { %3046 = vmatmul.msk.f32.gmra.mxu0 %vm89_vm0, %v2016_v3 }
 0x7b9   :  { %v2320_v21 = vpop.trf.xlu0 }
 0x7ba   :  { %3059 = vmatmul.msk.f32.gmra.mxu1 %vm89_vm0, %v2320_v21 }
 0x7be   :  { %v2017_v40 = vpop.trf.xlu2 }
 0x7bf   :  { %3047 = vmatmul.msk.f32.gmra.mxu0 %vm89_vm0, %v2017_v40 }
 0x7c1   :  { %v2321_v39 = vpop.trf.xlu0 }
 0x7c2   :  { %3060 = vmatmul.msk.f32.gmra.mxu1 %vm89_vm0, %v2321_v39 }
 0x7c3   :  { %2614 = vperm.xlu0 %3094, %v2608_v16  }
 0x7c6   :  { %v2018_v54 = vpop.trf.xlu2 }
 0x7c7   :  { %3048 = vmatmul.msk.f32.gmra.mxu0 %vm89_vm0, %v2018_v54 }
 0x7c9   :  { %v2322_v26 = vpop.trf.xlu0 }
 0x7ca   :  { %3061 = vmatmul.msk.f32.gmra.mxu1 %vm89_vm0, %v2322_v26 }
 0x7ce   :  { %v2019_v23 = vpop.trf.xlu2 }
 0x7cf   :  { %3049 = vmatmul.msk.f32.gmra.mxu0 %vm89_vm0, %v2019_v23 }
 0x7d1   :  { %v2323_v14 = vpop.trf.xlu0 }
 0x7d2   :  { %3062 = vmatmul.msk.f32.gmra.mxu1 %vm89_vm0, %v2323_v14 }
 0x7d6   :  { %v2020_v48 = vpop.trf.xlu2 }
 0x7d7   :  { %3050 = vmatmul.msk.f32.gmra.mxu0 %vm89_vm0, %v2020_v48 }
 0x7d9   :  { %v2324_v46 = vpop.trf.xlu0 }
 0x7da   :  { %3063 = vmatmul.msk.f32.gmra.mxu1 %vm89_vm0, %v2324_v46 }
 0x7de   :  { %v2021_v44 = vpop.trf.xlu2 }
 0x7df   :  { %3051 = vmatmul.msk.f32.gmra.mxu0 %vm89_vm0, %v2021_v44 }
 0x7e1   :  { %v2325_v59 = vpop.trf.xlu0 }
 0x7e2   :  { %3064 = vmatmul.msk.f32.gmra.mxu1 %vm89_vm0, %v2325_v59 }
 0x7e4   :  { %v2087_v4 = vpop.f32.mrf.mxu0 }
 0x7e5   :  { %v2135_v42 = vmul.f32 0.17677669, %v2087_v4 }
 0x7e7   :  { %v4747_v52 = vadd.f32 %v2135_v42, %v1974_v27  ;;  %v1986_v42 = vld [vmem:[%s5194_s1 + $0x60] sm:$0xff] }
 0x7e9   :  { %v2326_v24 = vpop.trf.xlu0 }
 0x7ea   :  { %3065 = vmatmul.msk.f32.gmra.mxu1 %vm89_vm0, %v2326_v24 }
 0x7ec   :  { %v2090_v20 = vpop.f32.mrf.mxu0 }
 0x7ed   :  { %v2136_v1 = vmul.f32 0.17677669, %v2090_v20 }
 0x7ef   :  { %v4759_v58 = vadd.f32 %v2136_v1, %v1975_v62 }
 0x7f1   :  { %v2327_v25 = vpop.trf.xlu0 }
 0x7f2   :  { %3066 = vmatmul.msk.f32.gmra.mxu1 %vm89_vm0, %v2327_v25 }
 0x7f4   :  { %v2093_v43 = vpop.f32.mrf.mxu0 }
 0x7f5   :  { %v2137_v63 = vmul.f32 0.17677669, %v2093_v43  ;;  %v1982_v43 = vld [vmem:[%s5194_s1 + $0x40] sm:$0xff] }
 0x7f7   :  { %v4771_v18 = vadd.f32 %v2137_v63, %v1976_v45 }
 0x7f9   :  { %v2328_v5 = vpop.trf.xlu0 }
 0x7fa   :  { %3067 = vmatmul.msk.f32.gmra.mxu1 %vm89_vm0, %v2328_v5  ;;  %v1983_v5 = vld [vmem:[%s5194_s1 + $0x48] sm:$0xff]  ;;  %vm2791_vm0 = vcmask 15360  }
 0x7fc   :  { %v4739_v29 = vpop.f32.mrf.mxu0 }
 0x7ff   :  { %v2394_v30 = vpop.f32.mrf.mxu1 }
 0x800   :  { %v2442_v36 = vmul.f32 0.17677669, %v2394_v30 }
 0x802   :  { %v4779_v19 = vadd.f32 %v2442_v36, %v1974_v27  ;;  %v2138_v36 = vmul.f32 0.17677669, %v4739_v29  ;;  %v4841_v29 = vld [vmem:[%s5194_s1 + $0x70] sm:$0xff] }
 0x804   :  { %v2099_v10 = vpop.f32.mrf.mxu0 }
 0x805   :  { %v2139_v6 = vmul.f32 0.17677669, %v2099_v10  ;;  %v1987_v10 = vld [vmem:[%s5194_s1 + $0x68] sm:$0xff] }
 0x807   :  { %v4749_v55 = vadd.f32 %v2139_v6, %v1978_v37  ;;  %v2397_v35 = vpop.f32.mrf.mxu1 }
 0x808   :  { %v2443_v0 = vmul.f32 0.17677669, %v2397_v35 }
 0x809   :  { %v2167_v60 = vmax.f32 %v4747_v52, %v4749_v55 }
 0x80a   :  { %v4785_v22 = vadd.f32 %v2443_v0, %v1975_v62 }
 0x80c   :  { %v2102_v7 = vpop.f32.mrf.mxu0 }
 0x80d   :  { %v2140_v61 = vmul.f32 0.17677669, %v2102_v7 }
 0x80f   :  { %v4761_v17 = vadd.f32 %v2140_v61, %v1979_v12  ;;  %v2400_v38 = vpop.f32.mrf.mxu1 }
 0x810   :  { %v2444_v16 = vmul.f32 0.17677669, %v2400_v38 }
 0x811   :  { %v2168_v31 = vmax.f32 %v4759_v58, %v4761_v17 }
 0x812   :  { %v4791_v26 = vadd.f32 %v2444_v16, %v1976_v45 }
 0x814   :  { %v2105_v51 = vpop.f32.mrf.mxu0 }
 0x815   :  { %v2141_v32 = vmul.f32 0.17677669, %v2105_v51 }
 0x817   :  { %v4773_v50 = vadd.f32 %v2141_v32, %v1980_v34  ;;  %v4775_v56 = vpop.f32.mrf.mxu1  ;;  %v1981_v32 = vld [vmem:[%s5194_s1 + $0x38] sm:$0xff] }
 0x819   :  { %v2169_v28 = vmax.f32 %v4771_v18, %v4773_v50 }
 0x81c   :  { %v2108_v49 = vpop.f32.mrf.mxu0 }
 0x81d   :  { %v2142_v51 = vmul.f32 0.17677669, %v2108_v49  ;;  %v1985_v49 = vld [vmem:[%s5194_s1 + $0x58] sm:$0xff] }
 0x81f   :  { %v2406_v57 = vpop.f32.mrf.mxu1  ;;  %v4836_v0 = vadd.f32 %v2142_v51, %v1981_v32 }
 0x820   :  { %v2446_v47 = vmul.f32 0.17677669, %v2406_v57 }
 0x822   :  { %v4781_v8 = vadd.f32 %v2446_v47, %v1978_v37 }
 0x824   :  { %v2474_v53 = vmax.f32 %v4779_v19, %v4781_v8  ;;  %v2111_v41 = vpop.f32.mrf.mxu0 }
 0x825   :  { %v2143_v24 = vmul.f32 0.17677669, %v2111_v41  ;;  %v1984_v41 = vld [vmem:[%s5194_s1 + $0x50] sm:$0xff] }
 0x827   :  { %v2409_v11 = vpop.f32.mrf.mxu1  ;;  %v4808_v27 = vadd.f32 %v2143_v24, %v1982_v43 }
 0x828   :  { %v2447_v15 = vmul.f32 0.17677669, %v2409_v11 }
 0x829   :  { %v2171_v62 = vmax.f32 %v2167_v60, %v4808_v27 }
 0x82a   :  { %v4787_v3 = vadd.f32 %v2447_v15, %v1979_v12 }
 0x82c   :  { %v2475_v21 = vmax.f32 %v4785_v22, %v4787_v3  ;;  %v2114_v40 = vpop.f32.mrf.mxu0 }
 0x82d   :  { %v2144_v20 = vmul.f32 0.17677669, %v2114_v40 }
 0x82f   :  { %v2412_v39 = vpop.f32.mrf.mxu1  ;;  %v4810_v37 = vadd.f32 %v2144_v20, %v1983_v5 }
 0x830   :  { %v2448_v54 = vmul.f32 0.17677669, %v2412_v39  ;;  %v4850_v39 = vld [vmem:[%s5194_s1 + $0x78] sm:$0xff] }
 0x831   :  { %v2172_v12 = vmax.f32 %v2168_v31, %v4810_v37  ;;  %v1977_v31 = vld [vmem:[%s5194_s1 + $0x18] sm:$0xff] }
 0x832   :  { %v4793_v23 = vadd.f32 %v2448_v54, %v1980_v34  ;;  %v2154_v15 = vadd.f32 %v2138_v36, %v1977_v31 }
 0x834   :  { %v2476_v14 = vmax.f32 %v4791_v26, %v4793_v23  ;;  %v2117_v48 = vpop.f32.mrf.mxu0 }
 0x835   :  { %v2145_v57 = vmul.f32 0.17677669, %v2117_v48  ;;  %v2170_v48 = vmax.f32 %v2154_v15, %v4836_v0 }
 0x837   :  { %v4797_v46 = vpop.f32.mrf.mxu1  ;;  %v4843_v40 = vadd.f32 %v2145_v57, %v1984_v41 }
 0x839   :  { %v2173_v24 = vmax.f32 %v2169_v28, %v4843_v40 }
 0x83c   :  { %v2120_v44 = vpop.f32.mrf.mxu0 }
 0x83d   :  { %v2146_v60 = vmul.f32 0.17677669, %v2120_v44 }
 0x83f   :  { %v2418_v59 = vpop.f32.mrf.mxu1  ;;  %v4845_v16 = vadd.f32 %v2146_v60, %v1985_v49 }
 0x841   :  { %v2174_v20 = vmax.f32 %v2170_v48, %v4845_v16 }
 0x844   :  { %v2123_v4 = vpop.f32.mrf.mxu0 }
 0x845   :  { %v2147_v30 = vmul.f32 0.17677669, %v2123_v4 }
 0x847   :  { %v2421_v25 = vpop.f32.mrf.mxu1  ;;  %v4815_v35 = vadd.f32 %v2147_v30, %v1986_v42 }
 0x849   :  { %v2175_v38 = vmax.f32 %v2171_v62, %v4815_v35 }
 0x84c   :  { %v2126_v6 = vpop.f32.mrf.mxu0 }
 0x84d   :  { %v2148_v1 = vmul.f32 0.17677669, %v2126_v6 }
 0x84f   :  { %v4819_v7 = vadd.f32 %v2148_v1, %v1987_v10  ;;  %v2424_v61 = vpop.f32.mrf.mxu1 }
 0x851   :  { %v2176_v63 = vmax.f32 %v2172_v12, %v4819_v7  ;;  %v2450_v12 = vmul.f32 0.17677669, %v2418_v59 }
 0x853   :  { %v2179_v45 = vmax.f32 %v2175_v38, %v2176_v63  ;;  %v2451_v38 = vmul.f32 0.17677669, %v2421_v25  ;;  %v4866_v36 = vadd.f32 %v2450_v12, %v1982_v43 }
 0x854   :  { %v2129_v34 = vpop.f32.mrf.mxu0 }
 0x855   :  { %v2149_v11 = vmul.f32 0.17677669, %v2129_v34  ;;  %v4868_v57 = vadd.f32 %v2451_v38, %v1983_v5 }
 0x857   :  { %v2427_v47 = vpop.f32.mrf.mxu1  ;;  %v4854_v44 = vadd.f32 %v2149_v11, %v4841_v29  ;;  %v2479_v59 = vmax.f32 %v2475_v21, %v4868_v57 }
 0x859   :  { %v2177_v1 = vmax.f32 %v2173_v24, %v4854_v44 }
 0x85c   :  { %v2132_v54 = vpop.f32.mrf.mxu0 }
 0x85d   :  { %v2150_v4 = vmul.f32 0.17677669, %v2132_v54 }
 0x85f   :  { %v4862_v30 = vadd.f32 %v2150_v4, %v4850_v39  ;;  %v2430_v6 = vpop.f32.mrf.mxu1  ;;  %v2478_v4 = vmax.f32 %v2474_v53, %v4866_v36  ;;  %v2449_v53 = vmul.f32 0.17677669, %v4797_v46 }
 0x860   :  { %v2454_v34 = vmul.f32 0.17677669, %v2430_v6 }
 0x861   :  { %v2178_v62 = vmax.f32 %v2174_v20, %v4862_v30 }
 0x862   :  { %v4870_v11 = vadd.f32 %v2454_v34, %v1986_v42  ;;  %v2445_v34 = vmul.f32 0.17677669, %v4775_v56 }
 0x863   :  { %v2180_v63 = vmax.f32 %v2177_v1, %v2178_v62 }
 0x864   :  { %v2482_v5 = vmax.f32 %v2478_v4, %v4870_v11 }
 0x865   :  { %v2181_v51 = vmax.f32 %v2179_v45, %v2180_v63 }
 0x867   :  { %v2182_v28 = vrot.slane %v2181_v51, 4  ;;  %v2433_v60 = vpop.f32.mrf.mxu1 }
 0x868   :  { %v2455_v54 = vmul.f32 0.17677669, %v2433_v60 }
 0x869   :  { %v2183_v48 = vmax.f32 %v2181_v51, %v2182_v28  ;;  %v2453_v51 = vmul.f32 0.17677669, %v2427_v47  ;;  %v4901_v28 = vadd.f32 %v2449_v53, %v1981_v32 }
 0x86a   :  { %v4880_v25 = vadd.f32 %v2455_v54, %v1987_v10 }
 0x86b   :  { %v2184_v43 = vrot.slane %v2183_v48, 2 }
 0x86c   :  { %v2483_v42 = vmax.f32 %v2479_v59, %v4880_v25 }
 0x86d   :  { %v2185_v45 = vmax.f32 %v2183_v48, %v2184_v43 }
 0x86e   :  { %v2486_v24 = vmax.f32 %v2482_v5, %v2483_v42 }
 0x86f   :  { %v2186_v20 = vrot.slane %v2185_v45, 1  ;;  %v2436_v6 = vpop.f32.mrf.mxu1 }
 0x870   :  { %v2456_v54 = vmul.f32 0.17677669, %v2436_v6 }
 0x871   :  { %v4884_v1 = vmax.f32 %v2185_v45, %v2186_v20 }
 0x872   :  { %v4912_v32 = vadd.f32 %v2456_v54, %v4841_v29 }
 0x873   :  { %v2188_v62 = vsub.f32 %v4747_v52, %v4884_v1  ;;  %v2189_v21 = vsub.f32 %v4759_v58, %v4884_v1  ;;  %v2190_v10 = vsub.f32 %v4771_v18, %v4884_v1  ;;  %v2191_v12 = vsub.f32 %v2154_v15, %v4884_v1 }
 0x874   :  { %v2192_v38 = vsub.f32 %v4749_v55, %v4884_v1  ;;  %v2193_v63 = vsub.f32 %v4761_v17, %v4884_v1  ;;  %v2194_v46 = vsub.f32 %v4773_v50, %v4884_v1  ;;  %v2452_v52 = vmul.f32 0.17677669, %v2424_v61 }
 0x875   :  { %v2204_v58 = vmul.f32 1.442695, %v2188_v62  ;;  %v2206_v60 = vmul.f32 1.442695, %v2189_v21  ;;  %v2208_v18 = vmul.f32 1.442695, %v2190_v10  ;;  %v4903_v15 = vadd.f32 %v2445_v34, %v1977_v31 }
 0x876   :  { %v4905_v48 = vadd.f32 %v2452_v52, %v1984_v41  ;;  %v4907_v55 = vadd.f32 %v2453_v51, %v1985_v49  ;;  %v2210_v50 = vmul.f32 1.442695, %v2191_v12  ;;  %v2212_v61 = vmul.f32 1.442695, %v2192_v38 }
 0x877   :  { %3177 = vpow2.f32 %v2204_v58  ;;  %v2439_v17 = vpop.f32.mrf.mxu1  ;;  %v2477_v56 = vmax.f32 %v4903_v15, %v4901_v28  ;;  %v2195_v49 = vsub.f32 %v4836_v0, %v4884_v1  ;;  %v2214_v4 = vmul.f32 1.442695, %v2193_v63 }
 0x878   :  { %3179 = vpow2.f32 %v2206_v60  ;;  %v2457_v47 = vmul.f32 0.17677669, %v2439_v17  ;;  %v2480_v31 = vmax.f32 %v2476_v14, %v4905_v48  ;;  %v2196_v29 = vsub.f32 %v4808_v27, %v4884_v1 }
 0x879   :  { %3181 = vpow2.f32 %v2208_v18  ;;  %v2481_v41 = vmax.f32 %v2477_v56, %v4907_v55  ;;  %v2216_v42 = vmul.f32 1.442695, %v2194_v46  ;;  %v2218_v6 = vmul.f32 1.442695, %v2195_v49 }
 0x87a   :  { %3183 = vpow2.f32 %v2210_v50  ;;  %v4922_v59 = vadd.f32 %v2457_v47, %v4850_v39  ;;  %v2484_v14 = vmax.f32 %v2480_v31, %v4912_v32  ;;  %v2197_v39 = vsub.f32 %v4810_v37, %v4884_v1 }
 0x87b   :  { %3185 = vpow2.f32 %v2212_v61  ;;  %v2198_v21 = vsub.f32 %v4843_v40, %v4884_v1  ;;  %v2220_v10 = vmul.f32 1.442695, %v2196_v29  ;;  %v2199_v37 = vsub.f32 %v4845_v16, %v4884_v1 }
 0x87c   :  { %v2485_v45 = vmax.f32 %v2481_v41, %v4922_v59  ;;  %3187 = vpow2.f32 %v2214_v4  ;;  %v2222_v46 = vmul.f32 1.442695, %v2197_v39  ;;  %v2200_v40 = vsub.f32 %v4815_v35, %v4884_v1 }
 0x87d   :  { %v4924_v43 = vpop.eup %3177  ;;  %3189 = vpow2.f32 %v2216_v42  ;;  %v2224_v58 = vmul.f32 1.442695, %v2198_v21  ;;  %v2201_v60 = vsub.f32 %v4819_v7, %v4884_v1  ;;  %v2226_v16 = vmul.f32 1.442695, %v2199_v37 }
 0x87e   :  { %v4928_v5 = vpop.eup %3179  ;;  %v2487_v53 = vmax.f32 %v2484_v14, %v2485_v45  ;;  %3191 = vpow2.f32 %v2218_v6  ;;  %v2202_v35 = vsub.f32 %v4854_v44, %v4884_v1  ;;  %v2228_v61 = vmul.f32 1.442695, %v2200_v40 }
 0x87f   :  { %v2236_v0 = vadd.f32 %v4928_v5, %v4924_v43  ;;  %v4934_v20 = vpop.eup %3181  ;;  %3193 = vpow2.f32 %v2220_v10  ;;  %v2203_v7 = vsub.f32 %v4862_v30, %v4884_v1  ;;  %v2230_v31 = vmul.f32 1.442695, %v2201_v60 }
 0x880   :  { %v4939_v62 = vpop.eup %3183  ;;  %v2488_v12 = vmax.f32 %v2486_v24, %v2487_v53  ;;  %3195 = vpow2.f32 %v2222_v46  ;;  %v2232_v14 = vmul.f32 1.442695, %v2202_v35 }
 0x881   :  { %v2237_v27 = vadd.f32 %v4934_v20, %v2236_v0  ;;  %v4944_v63 = vpop.eup %3185  ;;  %3197 = vpow2.f32 %v2224_v58  ;;  %v2234_v45 = vmul.f32 1.442695, %v2203_v7 }
 0x882   :  { %v2489_v34 = vrot.slane %v2488_v12, 4  ;;  %v4949_v51 = vpop.eup %3187  ;;  %3199 = vpow2.f32 %v2226_v16 }
 0x883   :  { %v2238_v38 = vadd.f32 %v4939_v62, %v2237_v27  ;;  %v4956_v54 = vpop.eup %3189  ;;  %3201 = vpow2.f32 %v2228_v61 }
 0x884   :  { %v2490_v24 = vmax.f32 %v2488_v12, %v2489_v34  ;;  %v4959_v56 = vpop.eup %3191  ;;  %3203 = vpow2.f32 %v2230_v31 }
 0x885   :  { %v2239_v52 = vadd.f32 %v4944_v63, %v2238_v38  ;;  %v4966_v49 = vpop.eup %3193  ;;  %3205 = vpow2.f32 %v2232_v14 }
 0x886   :  { %v2491_v17 = vrot.slane %v2490_v24, 2  ;;  %v4969_v42 = vpop.eup %3195  ;;  %3207 = vpow2.f32 %v2234_v45 }
 0x887   :  { %v2240_v18 = vadd.f32 %v4949_v51, %v2239_v52  ;;  %v4974_v30 = vpop.eup %3197 }
 0x888   :  { %v2492_v47 = vmax.f32 %v2490_v24, %v2491_v17  ;;  %v4991_v12 = vpop.eup %3199 }
 0x889   :  { %v2241_v50 = vadd.f32 %v4956_v54, %v2240_v18 }
 0x88a   :  { %v2493_v4 = vrot.slane %v2492_v47, 1 }
 0x88b   :  { %v2242_v41 = vadd.f32 %v4959_v56, %v2241_v50 }
 0x88c   :  { %v4971_v44 = vmax.f32 %v2492_v47, %v2493_v4 }
 0x88d   :  { %v2243_v29 = vadd.f32 %v4966_v49, %v2242_v41 }
 0x88e   :  { %v2495_v1 = vsub.f32 %v4779_v19, %v4971_v44  ;;  %v2496_v39 = vsub.f32 %v4785_v22, %v4971_v44  ;;  %v2497_v6 = vsub.f32 %v4791_v26, %v4971_v44  ;;  %v2498_v53 = vsub.f32 %v4903_v15, %v4971_v44  ;;  %v4994_v26 = vpop.eup %3201 }
 0x88f   :  { %v2244_v0 = vadd.f32 %v4969_v42, %v2243_v29  ;;  %v2499_v21 = vsub.f32 %v4781_v8, %v4971_v44  ;;  %v2500_v10 = vsub.f32 %v4787_v3, %v4971_v44  ;;  %v2501_v19 = vsub.f32 %v4793_v23, %v4971_v44  ;;  %v4996_v37 = vpop.eup %3203 }
 0x890   :  { %v2511_v15 = vmul.f32 1.442695, %v2495_v1  ;;  %v2513_v38 = vmul.f32 1.442695, %v2496_v39  ;;  %v2515_v46 = vmul.f32 1.442695, %v2497_v6  ;;  %v5000_v34 = vpop.eup %3205  ;;  %v2502_v60 = vsub.f32 %v4901_v28, %v4971_v44 }
 0x891   :  { %v2245_v27 = vadd.f32 %v4974_v30, %v2244_v0  ;;  %v2517_v23 = vmul.f32 1.442695, %v2498_v53  ;;  %v2519_v40 = vmul.f32 1.442695, %v2499_v21  ;;  %v5003_v58 = vpop.eup %3207  ;;  %v2521_v18 = vmul.f32 1.442695, %v2500_v10 }
 0x892   :  { %3209 = vpow2.f32 %v2511_v15  ;;  %v2503_v35 = vsub.f32 %v4866_v36, %v4971_v44  ;;  %v2523_v61 = vmul.f32 1.442695, %v2501_v19  ;;  %v2504_v28 = vsub.f32 %v4868_v57, %v4971_v44 }
 0x893   :  { %v2246_v22 = vadd.f32 %v4991_v12, %v2245_v27  ;;  %3211 = vpow2.f32 %v2513_v38  ;;  %v2525_v41 = vmul.f32 1.442695, %v2502_v60  ;;  %v2505_v4 = vsub.f32 %v4905_v48, %v4971_v44 }
 0x894   :  { %3213 = vpow2.f32 %v2515_v46  ;;  %v2527_v45 = vmul.f32 1.442695, %v2503_v35  ;;  %v2506_v57 = vsub.f32 %v4907_v55, %v4971_v44  ;;  %v2529_v6 = vmul.f32 1.442695, %v2504_v28 }
 0x895   :  { %v2247_v8 = vadd.f32 %v4994_v26, %v2246_v22  ;;  %3215 = vpow2.f32 %v2517_v23  ;;  %v2507_v48 = vsub.f32 %v4870_v11, %v4971_v44  ;;  %v2531_v53 = vmul.f32 1.442695, %v2505_v4 }
 0x896   :  { %3217 = vpow2.f32 %v2519_v40  ;;  %v2508_v19 = vsub.f32 %v4880_v25, %v4971_v44  ;;  %v2509_v22 = vsub.f32 %v4912_v32, %v4971_v44  ;;  %v2510_v11 = vsub.f32 %v4922_v59, %v4971_v44 }
 0x897   :  { %v2248_v3 = vadd.f32 %v4996_v37, %v2247_v8  ;;  %3219 = vpow2.f32 %v2521_v18  ;;  %v2533_v8 = vmul.f32 1.442695, %v2506_v57  ;;  %v2535_v46 = vmul.f32 1.442695, %v2507_v48 }
 0x898   :  { %v5008_v16 = vpop.eup %3209  ;;  %3221 = vpow2.f32 %v2523_v61  ;;  %v2537_v25 = vmul.f32 1.442695, %v2508_v19  ;;  %v1868_v19 = vpop.permute.xlu1 %1867 }
 0x899   :  { %v2249_v52 = vadd.f32 %v5000_v34, %v2248_v3  ;;  %v5010_v17 = vpop.eup %3211  ;;  %3223 = vpow2.f32 %v2525_v41 }
 0x89a   :  { %v2543_v47 = vadd.f32 %v5010_v17, %v5008_v16  ;;  %v5016_v7 = vpop.eup %3213  ;;  %3225 = vpow2.f32 %v2527_v45 }
 0x89b   :  { %v2250_v24 = vadd.f32 %v5003_v58, %v2249_v52  ;;  %v5023_v14 = vpop.eup %3215  ;;  %3227 = vpow2.f32 %v2529_v6  ;;  %v2539_v52 = vmul.f32 1.442695, %v2509_v22 }
 0x89c   :  { %v2544_v29 = vadd.f32 %v5016_v7, %v2543_v47  ;;  %v5026_v1 = vpop.eup %3217  ;;  %3229 = vpow2.f32 %v2531_v53 }
 0x89d   :  { %v2251_v50 = vrot.slane %v2250_v24, 4  ;;  %v5033_v21 = vpop.eup %3219 }
 0x89e   :  { %v2545_v0 = vadd.f32 %v5023_v14, %v2544_v29  ;;  %v5040_v15 = vpop.eup %3221 }
 0x89f   :  { %v2252_v31 = vadd.f32 %v2251_v50, %v2250_v24  ;;  %v5045_v23 = vpop.eup %3223  ;;  %v2541_v24 = vmul.f32 1.442695, %v2510_v11 }
 0x8a0   :  { %v2546_v27 = vadd.f32 %v5026_v1, %v2545_v0  ;;  %v5048_v40 = vpop.eup %3225 }
 0x8a1   :  { %v2253_v36 = vrot.slane %v2252_v31, 2  ;;  %v5051_v44 = vpop.eup %3227 }
 0x8a2   :  { %v2547_v55 = vadd.f32 %v5033_v21, %v2546_v27  ;;  %v5053_v60 = vpop.eup %3229 }
 0x8a3   :  { %v2254_v39 = vadd.f32 %v2253_v36, %v2252_v31 }
 0x8a4   :  { %v2548_v3 = vadd.f32 %v5040_v15, %v2547_v55 }
 0x8a5   :  { %v2255_v10 = vrot.slane %v2254_v39, 1 }
 0x8a6   :  { %v2549_v32 = vadd.f32 %v5045_v23, %v2548_v3 }
 0x8a7   :  { %v2256_v38 = vadd.f32 %v2255_v10, %v2254_v39 }
 0x8a8   :  { %v2550_v59 = vadd.f32 %v5048_v40, %v2549_v32 }
 0x8a9   :  { %3231 = vrcp.f32 %v2256_v38 }
 0x8aa   :  { %3233 = vpow2.f32 %v2533_v8  ;;  %v2551_v18 = vadd.f32 %v5051_v44, %v2550_v59 }
 0x8ab   :  { %3235 = vpow2.f32 %v2535_v46 }
 0x8ac   :  { %3237 = vpow2.f32 %v2537_v25  ;;  %v2552_v35 = vadd.f32 %v5053_v60, %v2551_v18 }
 0x8ad   :  { %3239 = vpow2.f32 %v2539_v52 }
 0x8ae   :  { %3241 = vpow2.f32 %v2541_v24 }
 0x8af   :  { %v3232_v50 = vpop.eup %3231 }
 0x8b0   :  { %v2273_v61 = vmul.f32 %v3232_v50, %v5003_v58  ;;  %v2272_v47 = vmul.f32 %v3232_v50, %v5000_v34  ;;  %v2271_v31 = vmul.f32 %v3232_v50, %v4996_v37  ;;  %v3234_v28 = vpop.eup %3233  ;;  %v2270_v41 = vmul.f32 %v3232_v50, %v4994_v26 }
 0x8b1   :  { %v2269_v4 = vmul.f32 %v3232_v50, %v4991_v12  ;;  %v2268_v29 = vmul.f32 %v3232_v50, %v4974_v30  ;;  %v2267_v36 = vmul.f32 %v3232_v50, %v4969_v42  ;;  %v3236_v45 = vpop.eup %3235  ;;  %v2553_v0 = vadd.f32 %v3234_v28, %v2552_v35 }
 0x8b2   :  { %2274 = vmatpush.msrb.mxu3 %v2273_v61  ;;  %v2266_v39 = vmul.f32 %v3232_v50, %v4966_v49  ;;  %v2265_v58 = vmul.f32 %v3232_v50, %v4959_v56  ;;  %v2264_v34 = vmul.f32 %v3232_v50, %v4956_v54  ;;  %v3238_v57 = vpop.eup %3237  ;;  %v2263_v37 = vmul.f32 %v3232_v50, %v4949_v51 }
 0x8b3   :  { %v2262_v26 = vmul.f32 %v3232_v50, %v4944_v63  ;;  %v2261_v12 = vmul.f32 %v3232_v50, %v4939_v62  ;;  %v2260_v30 = vmul.f32 %v3232_v50, %v4934_v20  ;;  %v3240_v6 = vpop.eup %3239  ;;  %v2554_v42 = vadd.f32 %v3236_v45, %v2553_v0 }
 0x8b4   :  { %2275 = vmatpush.msrb.mxu3 %v2272_v47  ;;  %v2259_v48 = vmul.f32 %v3232_v50, %v4928_v5  ;;  %v2258_v49 = vmul.f32 %v3232_v50, %v4924_v43  ;;  %v3242_v53 = vpop.eup %3241  ;;  %v1962_v43 = vpop.f32.mrf.mxu2 }
 0x8b5   :  { %v2555_v56 = vadd.f32 %v3238_v57, %v2554_v42  ;;  %v1963_v55 = vadd.f32 %v1962_v43, %v1868_v19  ;;  %v2752_v43 = vld [vmem:[%s5196_s2 + $0x30] sm:$0xff]  ;;  %v2751_v19 = vld [vmem:[%s5196_s2 + $0x28] sm:$0xff] }
 0x8b6   :  { %2276 = vmatpush.msrb.mxu3 %v2271_v31 }
 0x8b7   :  { %v2556_v54 = vadd.f32 %v3240_v6, %v2555_v56 }
 0x8b8   :  { %2277 = vmatpush.msrb.mxu3 %v2270_v41 }
 0x8b9   :  { %v2557_v27 = vadd.f32 %v3242_v53, %v2556_v54 }
 0x8ba   :  { %2278 = vmatpush.msrb.mxu3 %v2269_v4  ;;  %v2604_v4 = vld [vmem:[%s5195_s14] sm:$0xff] }
 0x8bb   :  { %v2558_v51 = vrot.slane %v2557_v27, 4 }
 0x8bc   :  { %2279 = vmatpush.msrb.mxu3 %v2268_v29  ;;  %v2605_v29 = vld [vmem:[%s5195_s14 + $0x8] sm:$0xff] }
 0x8bd   :  { %v2559_v63 = vadd.f32 %v2558_v51, %v2557_v27  ;;  %v2759_v27 = vld [vmem:[%s5196_s2 + $0x68] sm:$0xff]  ;;  %v2758_v51 = vld [vmem:[%s5196_s2 + $0x60] sm:$0xff] }
 0x8be   :  { %2280 = vmatpush.msrb.mxu3 %v2267_v36  ;;  %v2606_v36 = vld [vmem:[%s5195_s14 + $0x10] sm:$0xff] }
 0x8bf   :  { %v2560_v62 = vrot.slane %v2559_v63, 2 }
 0x8c0   :  { %2281 = vmatpush.msrb.mxu3 %v2266_v39 }
 0x8c1   :  { %v2561_v20 = vadd.f32 %v2560_v62, %v2559_v63  ;;  %v2757_v62 = vld [vmem:[%s5196_s2 + $0x58] sm:$0xff] }
 0x8c2   :  { %2282 = vmatpush.msrb.mxu3 %v2265_v58 }
 0x8c3   :  { %v2562_v10 = vrot.slane %v2561_v20, 1 }
 0x8c4   :  { %2283 = vmatpush.msrb.mxu3 %v2264_v34 }
 0x8c5   :  { %v2563_v5 = vadd.f32 %v2562_v10, %v2561_v20  ;;  %v2754_v20 = vld [vmem:[%s5196_s2 + $0x40] sm:$0xff]  ;;  %v2678_v10 = vld [vmem:[%s5197_s16 + $0x8] sm:$0xff] }
 0x8c6   :  { %2284 = vmatpush.msrb.mxu3 %v2263_v37 }
 0x8c7   :  { %3243 = vrcp.f32 %v2563_v5  ;;  %v2753_v5 = vld [vmem:[%s5196_s2 + $0x38] sm:$0xff] }
 0x8c8   :  { %2285 = vmatpush.msrb.mxu3 %v2262_v26 }
 0x8ca   :  { %2286 = vmatpush.msrb.mxu3 %v2261_v12 }
 0x8cc   :  { %2287 = vmatpush.msrb.mxu3 %v2260_v30 }
 0x8cd   :  { %v3244_v22 = vpop.eup %3243 }
 0x8ce   :  { %2288 = vmatpush.msrb.mxu3 %v2259_v48  ;;  %v2580_v38 = vmul.f32 %v3244_v22, %v3242_v53  ;;  %v2579_v11 = vmul.f32 %v3244_v22, %v3240_v6  ;;  %v2578_v8 = vmul.f32 %v3244_v22, %v3238_v57  ;;  %v2577_v46 = vmul.f32 %v3244_v22, %v3236_v45  ;;  %v2607_v45 = vld [vmem:[%s5195_s14 + $0x18] sm:$0xff]  ;;  %v2625_v57 = vpop.permute.xlu2 %2624  ;;  %v2615_v48 = vpop.permute.xlu0 %2614  ;;  %v2760_v53 = vld [vmem:[%s5196_s2 + $0x70] sm:$0xff] }
 0x8cf   :  { %v2576_v3 = vmul.f32 %v3244_v22, %v3234_v28  ;;  %v2575_v25 = vmul.f32 %v3244_v22, %v5053_v60  ;;  %v2574_v52 = vmul.f32 %v3244_v22, %v5051_v44  ;;  %v2573_v32 = vmul.f32 %v3244_v22, %v5048_v40  ;;  %v1965_v44 = vpop.f32.mrf.mxu2 }
 0x8d0   :  { %2289 = vmatpush.msrb.mxu3 %v2258_v49  ;;  %2581 = vmatpush.msra.mxu0 %v2580_v38  ;;  %v2572_v24 = vmul.f32 %v3244_v22, %v5045_v23  ;;  %v2571_v59 = vmul.f32 %v3244_v22, %v5040_v15  ;;  %v2570_v18 = vmul.f32 %v3244_v22, %v5033_v21  ;;  %v1873_v23 = vpop.permute.xlu1 %1872  ;;  %v2761_v49 = vld [vmem:[%s5196_s2 + $0x78] sm:$0xff] }
 0x8d1   :  { %2290 = vmatmul.f32.vlgmr.msrb.gmra.mxu3 %v1963_v55  ;;  %v2569_v50 = vmul.f32 %v3244_v22, %v5026_v1  ;;  %v2568_v35 = vmul.f32 %v3244_v22, %v5023_v14  ;;  %v2567_v61 = vmul.f32 %v3244_v22, %v5016_v7  ;;  %v2566_v60 = vmul.f32 %v3244_v22, %v5010_v17  ;;  %v2679_v55 = vld [vmem:[%s5197_s16 + $0x10] sm:$0xff] }
 0x8d2   :  { %3076 = vmatpush.msra.mxu3 %v2580_v38  ;;  %2582 = vmatpush.msra.mxu0 %v2579_v11  ;;  %v2565_v40 = vmul.f32 %v3244_v22, %v5008_v16  ;;  %v1966_v15 = vadd.f32 %v1965_v44, %v1873_v23  ;;  %v2750_v22 = vld [vmem:[%s5196_s2 + $0x20] sm:$0xff]  ;;  %v2749_v38 = vld [vmem:[%s5196_s2 + $0x18] sm:$0xff] }
 0x8d4   :  { %3077 = vmatpush.msra.mxu3 %v2579_v11  ;;  %2583 = vmatpush.msra.mxu0 %v2578_v8  ;;  %v2748_v11 = vld [vmem:[%s5196_s2 + $0x10] sm:$0xff] }
 0x8d6   :  { %3078 = vmatpush.msra.mxu3 %v2578_v8  ;;  %2584 = vmatpush.msra.mxu0 %v2577_v46  ;;  %v2680_v8 = vld [vmem:[%s5197_s16 + $0x18] sm:$0xff] }
 0x8d7   :  { %v1968_v17 = vpop.f32.mrf.mxu2 }
 0x8d8   :  { %3079 = vmatpush.msra.mxu3 %v2577_v46  ;;  %2585 = vmatpush.msra.mxu0 %v2576_v3  ;;  %v1883_v16 = vpop.permute.xlu1 %1882  ;;  %v2747_v46 = vld [vmem:[%s5196_s2 + $0x8] sm:$0xff] }
 0x8d9   :  { %2293 = vmatmul.f32.gmra.mxu3 %v1966_v15 }
 0x8da   :  { %3080 = vmatpush.msra.mxu3 %v2576_v3  ;;  %2586 = vmatpush.msra.mxu0 %v2575_v25  ;;  %v2746_v3 = vld [vmem:[%s5196_s2] sm:$0xff] }
 0x8dc   :  { %3081 = vmatpush.msra.mxu3 %v2575_v25  ;;  %2587 = vmatpush.msra.mxu0 %v2574_v52 }
 0x8de   :  { %3082 = vmatpush.msra.mxu3 %v2574_v52  ;;  %2588 = vmatpush.msra.mxu0 %v2573_v32 }
 0x8df   :  { %v1971_v7 = vpop.f32.mrf.mxu2 }
 0x8e0   :  { %3083 = vmatpush.msra.mxu3 %v2573_v32  ;;  %2589 = vmatpush.msra.mxu0 %v2572_v24  ;;  %v1878_v14 = vpop.permute.xlu1 %1877  ;;  %v1972_v21 = vadd.f32 %v1971_v7, %v1883_v16 }
 0x8e1   :  { %v1969_v1 = vadd.f32 %v1968_v17, %v1878_v14 }
 0x8e2   :  { %3084 = vmatpush.msra.mxu3 %v2572_v24  ;;  %2590 = vmatpush.msra.mxu0 %v2571_v59 }
 0x8e4   :  { %3085 = vmatpush.msra.mxu3 %v2571_v59  ;;  %2591 = vmatpush.msra.mxu0 %v2570_v18 }
 0x8e6   :  { %3086 = vmatpush.msra.mxu3 %v2570_v18  ;;  %2592 = vmatpush.msra.mxu0 %v2569_v50 }
 0x8e8   :  { %3087 = vmatpush.msra.mxu3 %v2569_v50  ;;  %2593 = vmatpush.msra.mxu0 %v2568_v35  ;;  %v2630_v58 = vpop.permute.xlu1 %2629 }
 0x8ea   :  { %3088 = vmatpush.msra.mxu3 %v2568_v35  ;;  %2594 = vmatpush.msra.mxu0 %v2567_v61 }
 0x8ec   :  { %3089 = vmatpush.msra.mxu3 %v2567_v61  ;;  %2595 = vmatpush.msra.mxu0 %v2566_v60 }
 0x8ee   :  { %3090 = vmatpush.msra.mxu3 %v2566_v60  ;;  %2596 = vmatpush.msra.mxu0 %v2565_v40 }
 0x8ef   :  { %2597 = vmatmul.f32.vlgmr.msra.gmra.mxu0 %v1969_v1 }
 0x8f0   :  { %3091 = vmatpush.msra.mxu3 %v2565_v40  ;;  %v2620_v30 = vpop.permute.xlu1 %2619 }
 0x8f1   :  { %2600 = vmatmul.f32.vlgmr.msra.gmra.mxu3 %v1972_v21 }
 0x8f8   :  { %v2688_v25 = vpop.permute.xlu1 %2687 }
 0x900   :  { %v2693_v24 = vpop.permute.xlu1 %2692 }
 0x908   :  { %v2698_v50 = vpop.permute.xlu1 %2697 }
 0x910   :  { %v2703_v60 = vpop.permute.xlu1 %2702 }
 0x954   :  { %v2291_v47 = vpop.f32.mrf.mxu3 }
 0x95c   :  { %v2294_v31 = vpop.f32.mrf.mxu3 }
 0x96c   :  { %v2598_v41 = vpop.f32.mrf.mxu0 }
 0x974   :  { %v2601_v28 = vpop.f32.mrf.mxu3 }
 0x975   :  { %2656 = vmatpush.msrb.mxu3 %v2601_v28 }
 0x977   :  { %2657 = vmatpush.msrb.mxu3 %v2598_v41 }
 0x979   :  { %2658 = vmatpush.msrb.mxu3 %v2294_v31 }
 0x97b   :  { %2659 = vmatpush.msrb.mxu3 %v2291_v47 }
 0x97c   :  { %3068 = vmatmul.msk.f32.vlgmr.msrb.gmra.mxu3 %vm239_vm9, %v2604_v4 }
 0x97d   :  { %2762 = vmatpush.msra.mxu3 %v2761_v49 }
 0x97f   :  { %2763 = vmatpush.msra.mxu3 %v2760_v53 }
 0x981   :  { %2764 = vmatpush.msra.mxu3 %v2759_v27 }
 0x983   :  { %2765 = vmatpush.msra.mxu3 %v2758_v51 }
 0x984   :  { %3069 = vmatmul.msk.f32.gmra.mxu3 %vm239_vm9, %v2605_v29 }
 0x985   :  { %2766 = vmatpush.msra.mxu3 %v2757_v62 }
 0x98c   :  { %3070 = vmatmul.msk.f32.gmra.mxu3 %vm239_vm9, %v2606_v36 }
 0x994   :  { %3071 = vmatmul.msk.f32.gmra.mxu3 %vm239_vm9, %v2607_v45 }
 0x9ff   :  { %v2661_v0 = vpop.f32.mrf.mxu3 }
 0xa00   :  { %v2662_v56 = vadd.f32 %v2661_v0, %v2615_v48 }
 0xa02   :  { %v2673_v63 = vadd.f32 %v2662_v56, %v4650_v2  ;;  %v2755_v2 = vld [vmem:[%s5196_s2 + $0x48] sm:$0xff] }
 0xa07   :  { %v2664_v39 = vpop.f32.mrf.mxu3 }
 0xa08   :  { %v2665_v6 = vadd.f32 %v2664_v39, %v2620_v30 }
 0xa0f   :  { %v2667_v34 = vpop.f32.mrf.mxu3 }
 0xa10   :  { %v2668_v26 = vadd.f32 %v2667_v34, %v2625_v57 }
 0xa12   :  { %v2675_v54 = vadd.f32 %v2668_v26, %v4642_v33  ;;  %v2677_v33 = vld [vmem:[%s5197_s16] sm:$0xff] }
 0xa17   :  { %v2670_v37 = vpop.f32.mrf.mxu3 }
 0xa18   :  { %v2671_v12 = vadd.f32 %v2670_v37, %v2630_v58 }
 0xa1a   :  { %v2676_v42 = vadd.f32 %v2671_v12, %v4638_v13  ;;  %v2674_v13 = vadd.f32 %v2665_v6, %v4646_v9  ;;  %v2756_v9 = vld [vmem:[%s5196_s2 + $0x50] sm:$0xff] }
 0xa1b   :  { %2767 = vmatpush.msra.mxu3 %v2756_v9 }
 0xa1c   :  { %2729 = vmatpush.msrb.mxu2 %v2676_v42 }
 0xa1d   :  { %2768 = vmatpush.msra.mxu3 %v2755_v2 }
 0xa1e   :  { %2730 = vmatpush.msrb.mxu2 %v2675_v54 }
 0xa1f   :  { %2769 = vmatpush.msra.mxu3 %v2754_v20 }
 0xa20   :  { %2731 = vmatpush.msrb.mxu2 %v2674_v13 }
 0xa21   :  { %2770 = vmatpush.msra.mxu3 %v2753_v5 }
 0xa22   :  { %2732 = vmatpush.msrb.mxu2 %v2673_v63 }
 0xa23   :  { %3072 = vmatmul.msk.f32.vlgmr.msrb.gmra.mxu2 %vm239_vm9, %v2677_v33  ;;  %2771 = vmatpush.msra.mxu3 %v2752_v43 }
 0xa25   :  { %2772 = vmatpush.msra.mxu3 %v2751_v19 }
 0xa27   :  { %2773 = vmatpush.msra.mxu3 %v2750_v22 }
 0xa29   :  { %2774 = vmatpush.msra.mxu3 %v2749_v38 }
 0xa2b   :  { %3073 = vmatmul.msk.f32.gmra.mxu2 %vm239_vm9, %v2678_v10  ;;  %2775 = vmatpush.msra.mxu3 %v2748_v11 }
 0xa2d   :  { %2776 = vmatpush.msra.mxu3 %v2747_v46 }
 0xa2f   :  { %2777 = vmatpush.msra.mxu3 %v2746_v3 }
 0xa33   :  { %3074 = vmatmul.msk.f32.gmra.mxu2 %vm239_vm9, %v2679_v55 }
 0xa3b   :  { %3075 = vmatmul.msk.f32.gmra.mxu2 %vm239_vm9, %v2680_v8 }
 0xaa6   :  { %v2734_v52 = vpop.f32.mrf.mxu2 }
 0xaa7   :  { %v2735_v32 = vadd.f32 %v2734_v52, %v2688_v25 }
 0xaa9   :  { %2778 = vmatmul.f32.vlgmr.msra.gmra.mxu3 %v2735_v32 }
 0xaae   :  { %v2737_v59 = vpop.f32.mrf.mxu2 }
 0xaaf   :  { %v2738_v18 = vadd.f32 %v2737_v59, %v2693_v24 }
 0xab1   :  { %2781 = vmatmul.f32.gmra.mxu3 %v2738_v18 }
 0xab6   :  { %v2740_v35 = vpop.f32.mrf.mxu2 }
 0xab7   :  { %v2741_v61 = vadd.f32 %v2740_v35, %v2698_v50 }
 0xab9   :  { %2784 = vmatmul.f32.gmra.mxu3 %v2741_v61 }
 0xabe   :  { %v2743_v40 = vpop.f32.mrf.mxu2 }
 0xabf   :  { %v2744_v44 = vadd.f32 %v2743_v40, %v2703_v60 }
 0xac1   :  { %2787 = vmatmul.f32.gmra.mxu3 %v2744_v44 }
 0xb2c   :  { %v2779_v23 = vpop.f32.mrf.mxu3 }
 0xb2d   :  { %2792 = vst.msk [vmem:[%s5198_s18] sm:$0xff] %vm2791_vm0, %v2779_v23 }
 0xb34   :  { %v2782_v15 = vpop.f32.mrf.mxu3 }
 0xb35   :  { %2793 = vst.msk [vmem:[%s5198_s18 + $0x8] sm:$0xff] %vm2791_vm0, %v2782_v15 }
 0xb3c   :  { %v2785_v17 = vpop.f32.mrf.mxu3 }
 0xb3d   :  { %2794 = vst.msk [vmem:[%s5198_s18 + $0x10] sm:$0xff] %vm2791_vm0, %v2785_v17 }
 0xb44   :  { %v2788_v16 = vpop.f32.mrf.mxu3 }
 0xb45   :  { %2795 = vst.msk [vmem:[%s5198_s18 + $0x18] sm:$0xff] %vm2791_vm0, %v2788_v16 }

</bundles_post_ra>
